<compile_context>
chip_gen: v5e
topology: v5e:2x2
jax: 0.10.0
libtpu: 0.0.40
codegen_flags: <defaults>
</compile_context>

<pallas_src>
import functools

import jax
import jax.numpy as jnp
from jax.experimental import pallas as pl
from jax.experimental.pallas import tpu as pltpu


_VMEM_LIMIT_BYTES = 48 * 1024 * 1024     # <= physical on v5e/v6e (128M) & v7x (64M)
_VMEM_TILE_BUDGET = 20 * 1024 * 1024     # working-set target used to pick the strip


def _pick_row_tile(h, w, cu, cs, cout, budget_bytes=_VMEM_TILE_BUDGET):
    """Largest even row-strip TH dividing h whose VMEM working set fits the budget."""
    best = 2
    for th in range(2, h + 1, 2):
        if h % th:
            continue
        thl = th // 2
        tile_bytes = 4 * (
            2 * ((thl + 2) * (w + 2) * cu          # low-res strip (double-buffered)
                 + (th + 4) * (w + 2) * cs         # skip strip    (double-buffered)
                 + th * w * cout)                  # output tile   (double-buffered)
            + (th + 4) * (w + 2) * cu              # up scratch
            + (th + 2) * (w + 2) * cout            # mid scratch
            + (th + 2) * w * cout)                 # f32 accumulator
        if tile_bytes <= budget_bytes:
            best = th
    return best


def decoder_block_kernel(in_ref, skip_ref, w1_ref, b1_ref, w2_ref, b2_ref,
                         out_ref, up_ref, mid_ref, acc_ref):
    """One (batch, row-strip) tile: upsample+concat+pad -> conv3x3+ReLU -> conv3x3+ReLU.

    in_ref:   (1, TH//2+2, W+2, Cu)  low-res rows; cols already 2x, 1-row/col halo, zero pad
    skip_ref: (1, TH+4,    W+2, Cs)  full-res skip rows; 2-row/1-col halo, zero pad
    w1_ref:   (9, Cu+Cs, Cout)       conv_1 taps, tap = ky*3+kx, channels in concat order
    b1_ref:   (1, Cout)
    w2_ref:   (9, Cout, Cout)
    b2_ref:   (1, Cout)
    out_ref:  (1, TH, W, Cout)
    up_ref:   (TH+4, W+2, Cu)        VMEM scratch: row-upsampled low-res tile
    mid_ref:  (TH+2, W+2, Cout)      VMEM scratch: conv_1 activation incl. 1-px halo ring
    acc_ref:  ((TH+2)*W, Cout) f32   VMEM scratch: MXU accumulator
    """
    _, hl, wp, cu = in_ref.shape            # hl = TH//2 + 2, wp = W + 2
    _, hs, _, cs = skip_ref.shape           # hs = TH + 4
    th = hs - 4
    w = wp - 2
    cout = w1_ref.shape[2]
    hm = th + 2                             # mid rows computed by this strip

    t = pl.program_id(1)
    n_t = pl.num_programs(1)

    # ---- fused nearest-neighbour 2x upsample (rows) of the low-res path ----
    inp = in_ref[0]                                                 # (hl, wp, cu)
    up = jnp.broadcast_to(inp[:, None, :, :], (hl, 2, wp, cu))
    up_ref[...] = up.reshape(2 * hl, wp, cu).astype(up_ref.dtype)   # 2*hl == th+4

    # ---- conv_1 + bias + ReLU over TH+2 rows (incl. 1-row halo) ------------
    # concat([up, skip], C) @ W  ==  up @ W[:Cu] + skip @ W[Cu:]  (split-K),
    # so the channel concat is never materialised.
    for ky in range(3):
        part = None
        for kx in range(3):
            tap = ky * 3 + kx
            w1t = w1_ref[tap]                                       # (Cu+Cs, Cout)
            a = up_ref[ky:ky + hm, kx:kx + w, :].reshape(hm * w, cu)
            b = skip_ref[:, ky:ky + hm, kx:kx + w, :].reshape(hm * w, cs)
            d = (jnp.dot(a, w1t[0:cu, :], preferred_element_type=jnp.float32) +
                 jnp.dot(b, w1t[cu:cu + cs, :], preferred_element_type=jnp.float32))
            part = d if part is None else part + d
        if ky == 0:
            acc_ref[...] = part
        else:
            acc_ref[...] += part

    h1 = jnp.maximum(acc_ref[...] + b1_ref[...], 0.0)               # (hm*w, cout) f32
    mid_ref[:, 1:1 + w, :] = h1.reshape(hm, w, cout).astype(mid_ref.dtype)
    # conv_2 'same' padding: the 1-col halo ring is always outside the image...
    zcol = jnp.zeros((hm, 1, cout), mid_ref.dtype)
    mid_ref[:, 0:1, :] = zcol
    mid_ref[:, w + 1:w + 2, :] = zcol

    # ... the 1-row halo is outside the image only for the edge strips.
    @pl.when(t == 0)
    def _zero_top():
        mid_ref[0:1, :, :] = jnp.zeros((1, wp, cout), mid_ref.dtype)

    @pl.when(t == n_t - 1)
    def _zero_bot():
        mid_ref[hm - 1:hm, :, :] = jnp.zeros((1, wp, cout), mid_ref.dtype)

    # ---- conv_2 + bias + ReLU over the strip's TH output rows --------------
    n2 = th * w
    for ky in range(3):
        part = None
        for kx in range(3):
            tap = ky * 3 + kx
            m = mid_ref[ky:ky + th, kx:kx + w, :].reshape(n2, cout)
            d = jnp.dot(m, w2_ref[tap], preferred_element_type=jnp.float32)
            part = d if part is None else part + d
        if ky == 0:
            acc_ref[0:n2, :] = part
        else:
            acc_ref[0:n2, :] += part

    out = jnp.maximum(acc_ref[0:n2, :] + b2_ref[...], 0.0)
    out_ref[...] = out.reshape(1, th, w, cout).astype(out_ref.dtype)


def decoder_block(inputs_nchw, skip_nchw, w1, b1, w2, b2, *,
                  row_tile=None, compute_dtype=None):
    """DecoderBlock forward.

    inputs_nchw: [B, Cu, H0, W0]; skip_nchw: [B, Cs, 2*H0, 2*W0]
    w1: [Cout, Cu+Cs, 3, 3] (torch OIHW), b1: [Cout]; w2: [Cout, Cout, 3, 3], b2: [Cout]
    compute_dtype: pass jnp.bfloat16 on v6e/v7x for MXU-peak matmuls (f32 accumulation).
    """
    B, Cu, H0, W0 = inputs_nchw.shape
    Bs, Cs, H, W = skip_nchw.shape
    assert Bs == B and H == 2 * H0 and W == 2 * W0
    Cout, Cin = w1.shape[0], w1.shape[1]
    assert Cin == Cu + Cs
    cdt = inputs_nchw.dtype if compute_dtype is None else compute_dtype

    TH = _pick_row_tile(H, W, Cu, Cs, Cout) if row_tile is None else row_tile
    assert TH % 2 == 0 and H % TH == 0, (H, TH)
    T = H // TH
    THL = TH // 2

    # ---- NCHW -> NHWC and halo'd row strips (one fused XLA copy per operand).
    # The full-resolution upsampled/concatenated/padded map is NOT built in HBM;
    # row upsample, concat and padding are resolved inside the kernel.
    x = jnp.transpose(inputs_nchw, (0, 2, 3, 1))            # [B, H0, W0, Cu]
    x = jnp.repeat(x, 2, axis=2)                            # cols -> full res
    x = jnp.pad(x, ((0, 0), (1, 1), (1, 1), (0, 0)))        # [B, H0+2, W+2, Cu]
    s = jnp.transpose(skip_nchw, (0, 2, 3, 1))              # [B, H,  W,  Cs]
    s = jnp.pad(s, ((0, 0), (2, 2), (1, 1), (0, 0)))        # [B, H+4, W+2, Cs]

    x_strips = jnp.stack([x[:, t * THL:t * THL + THL + 2] for t in range(T)], axis=1)
    s_strips = jnp.stack([s[:, t * TH:t * TH + TH + 4] for t in range(T)], axis=1)
    x_strips = x_strips.reshape(B * T, THL + 2, W + 2, Cu).astype(cdt)
    s_strips = s_strips.reshape(B * T, TH + 4, W + 2, Cs).astype(cdt)

    # torch OIHW -> [tap = ky*3+kx, Cin, Cout] (Cin in concat order: up then skip)
    w1k = jnp.transpose(w1, (2, 3, 1, 0)).reshape(9, Cin, Cout).astype(cdt)
    w2k = jnp.transpose(w2, (2, 3, 1, 0)).reshape(9, Cout, Cout).astype(cdt)
    b1k = b1.reshape(1, Cout).astype(jnp.float32)
    b2k = b2.reshape(1, Cout).astype(jnp.float32)

    itemsize = x_strips.dtype.itemsize
    flops = 2 * B * H * W * 9 * (Cin * Cout + Cout * Cout)
    bytes_accessed = ((x_strips.size + s_strips.size + w1k.size + w2k.size) * itemsize
                      + B * H * W * Cout * 4)

    out_nhwc = pl.pallas_call(
        decoder_block_kernel,
        out_shape=jax.ShapeDtypeStruct((B, H, W, Cout), jnp.float32),
        grid=(B, T),
        in_specs=[
            pl.BlockSpec((1, THL + 2, W + 2, Cu), lambda b, t: (b * T + t, 0, 0, 0)),
            pl.BlockSpec((1, TH + 4, W + 2, Cs), lambda b, t: (b * T + t, 0, 0, 0)),
            pl.BlockSpec((9, Cin, Cout), lambda b, t: (0, 0, 0)),
            pl.BlockSpec((1, Cout), lambda b, t: (0, 0)),
            pl.BlockSpec((9, Cout, Cout), lambda b, t: (0, 0, 0)),
            pl.BlockSpec((1, Cout), lambda b, t: (0, 0)),
        ],
        out_specs=pl.BlockSpec((1, TH, W, Cout), lambda b, t: (b, t, 0, 0)),
        scratch_shapes=[
            pltpu.VMEM((TH + 4, W + 2, Cu), cdt),             # up_ref
            pltpu.VMEM((TH + 2, W + 2, Cout), cdt),           # mid_ref
            pltpu.VMEM(((TH + 2) * W, Cout), jnp.float32),    # acc_ref
        ],
        compiler_params=pltpu.CompilerParams(
            dimension_semantics=("parallel", "parallel"),
            vmem_limit_bytes=_VMEM_LIMIT_BYTES),
        cost_estimate=pl.CostEstimate(flops=flops, transcendentals=0,
                                      bytes_accessed=bytes_accessed),
    )(x_strips, s_strips, w1k, b1k, w2k, b2k)

    return jnp.transpose(out_nhwc, (0, 3, 1, 2))              # NHWC -> NCHW


def _reference(inputs, skip, w1, b1, w2, b2):
    """Pure-JAX reference mirroring the PyTorch forward (NCHW)."""
    up = jnp.repeat(jnp.repeat(inputs, 2, axis=2), 2, axis=3)
    x = jnp.concatenate([up, skip], axis=1)
    y = jax.lax.conv_general_dilated(
        x, w1, (1, 1), 'SAME',
        dimension_numbers=('NCHW', 'OIHW', 'NCHW')) + b1[None, :, None, None]
    y = jnp.maximum(y, 0.0)
    y = jax.lax.conv_general_dilated(
        y, w2, (1, 1), 'SAME',
        dimension_numbers=('NCHW', 'OIHW', 'NCHW')) + b2[None, :, None, None]
    return jnp.maximum(y, 0.0)


if __name__ == "__main__":
    key = jax.random.PRNGKey(0)
    k_in, k_skip, kw1, kb1, kw2, kb2 = jax.random.split(key, 6)

    # inputs [2,4,8,8] upsampled to 16x16, skip [2,4,16,16] -> concat channels = 8.
    B, Cu, H0, W0 = 2, 4, 8, 8
    Cs = 4
    in_channels = Cu + Cs
    out_channels = 8

    inputs = jax.random.normal(k_in, (B, Cu, H0, W0), dtype=jnp.float32)
    skip = jax.random.normal(k_skip, (B, Cs, 2 * H0, 2 * W0), dtype=jnp.float32)
    w1 = 0.1 * jax.random.normal(kw1, (out_channels, in_channels, 3, 3), jnp.float32)
    b1 = 0.1 * jax.random.normal(kb1, (out_channels,), jnp.float32)
    w2 = 0.1 * jax.random.normal(kw2, (out_channels, out_channels, 3, 3), jnp.float32)
    b2 = 0.1 * jax.random.normal(kb2, (out_channels,), jnp.float32)

    # row_tile=8 -> 2 row-strips per image, exercising the halo / edge logic.
    fwd = jax.jit(functools.partial(decoder_block, row_tile=8))
    out = jax.block_until_ready(fwd(inputs, skip, w1, b1, w2, b2))

    ref = jax.block_until_ready(_reference(inputs, skip, w1, b1, w2, b2))
    assert out.shape == (B, out_channels, 2 * H0, 2 * W0), out.shape
    max_err = float(jnp.max(jnp.abs(out - ref)))
    assert jnp.allclose(out, ref, rtol=1e-4, atol=1e-4), max_err

    print("KERNEL_OK")
</pallas_src>

<mosaic_0001>
module attributes {stable_mosaic.version = 11 : i64} {
  func.func @decoder_block_kernel(%arg0: i32, %arg1: i32, %arg2: memref<1x6x18x4xf32, #tpu.memory_space<vmem>>, %arg3: memref<1x12x18x4xf32, #tpu.memory_space<vmem>>, %arg4: memref<9x8x8xf32, #tpu.memory_space<vmem>>, %arg5: memref<1x8xf32, #tpu.memory_space<vmem>>, %arg6: memref<9x8x8xf32, #tpu.memory_space<vmem>>, %arg7: memref<1x8xf32, #tpu.memory_space<vmem>>, %arg8: memref<1x8x16x8xf32, #tpu.memory_space<vmem>>, %arg9: memref<12x18x4xf32, #tpu.memory_space<vmem>>, %arg10: memref<10x18x8xf32, #tpu.memory_space<vmem>>, %arg11: memref<160x8xf32, #tpu.memory_space<vmem>>) attributes {dimension_semantics = [#tpu.dimension_semantics<parallel>, #tpu.dimension_semantics<parallel>], iteration_bounds = array<i64: 2, 2>, scalar_prefetch = 0 : i64, scratch_operands = 3 : i64, tpu.core_type = #tpu.core_type<tc>, window_params = [{transform_indices = @transform_0, window_bounds = array<i64: 1, 6, 18, 4>}, {transform_indices = @transform_1, window_bounds = array<i64: 1, 12, 18, 4>}, {pipeline_mode = #tpu.pipeline_mode<synchronous>, transform_indices = @transform_2, window_bounds = array<i64: 9, 8, 8>}, {pipeline_mode = #tpu.pipeline_mode<synchronous>, transform_indices = @transform_3, window_bounds = array<i64: 1, 8>}, {pipeline_mode = #tpu.pipeline_mode<synchronous>, transform_indices = @transform_4, window_bounds = array<i64: 9, 8, 8>}, {pipeline_mode = #tpu.pipeline_mode<synchronous>, transform_indices = @transform_5, window_bounds = array<i64: 1, 8>}, {transform_indices = @transform_6, window_bounds = array<i64: 1, 8, 16, 8>}]} {
    %c0 = arith.constant 0 : index
    %c0_0 = arith.constant 0 : index
    %c0_1 = arith.constant 0 : index
    %c0_2 = arith.constant 0 : index
    %0 = vector.load %arg2[%c0, %c0_0, %c0_1, %c0_2] : memref<1x6x18x4xf32, #tpu.memory_space<vmem>>, vector<1x6x18x4xf32>
    %1 = vector.shape_cast %0 : vector<1x6x18x4xf32> to vector<6x18x4xf32>
    %2 = vector.shape_cast %1 : vector<6x18x4xf32> to vector<6x1x18x4xf32>
    %3 = vector.shape_cast %2 : vector<6x1x18x4xf32> to vector<6x1x18x4xf32>
    %4 = vector.broadcast %3 : vector<6x1x18x4xf32> to vector<6x2x18x4xf32>
    %5 = vector.shape_cast %4 : vector<6x2x18x4xf32> to vector<12x18x4xf32>
    %c0_3 = arith.constant 0 : index
    %c0_4 = arith.constant 0 : index
    %c0_5 = arith.constant 0 : index
    %6 = vector.load %arg9[%c0_3, %c0_4, %c0_5] : memref<12x18x4xf32, #tpu.memory_space<vmem>>, vector<12x18x4xf32>
    tpu.vector_store %arg9[%c0_3, %c0_4, %c0_5], %5 {strides = array<i32>} : memref<12x18x4xf32, #tpu.memory_space<vmem>>, vector<12x18x4xf32>,
    %c0_6 = arith.constant 0 : index
    %c0_7 = arith.constant 0 : index
    %c0_8 = arith.constant 0 : index
    %7 = vector.load %arg4[%c0_6, %c0_7, %c0_8] : memref<9x8x8xf32, #tpu.memory_space<vmem>>, vector<1x8x8xf32>
    %8 = vector.shape_cast %7 : vector<1x8x8xf32> to vector<8x8xf32>
    %c0_9 = arith.constant 0 : index
    %c0_10 = arith.constant 0 : index
    %c0_11 = arith.constant 0 : index
    %9 = vector.load %arg9[%c0_9, %c0_10, %c0_11] : memref<12x18x4xf32, #tpu.memory_space<vmem>>, vector<10x16x4xf32>
    %10 = vector.shape_cast %9 : vector<10x16x4xf32> to vector<160x4xf32>
    %c0_12 = arith.constant 0 : index
    %c0_13 = arith.constant 0 : index
    %c0_14 = arith.constant 0 : index
    %c0_15 = arith.constant 0 : index
    %11 = vector.load %arg3[%c0_12, %c0_13, %c0_14, %c0_15] : memref<1x12x18x4xf32, #tpu.memory_space<vmem>>, vector<1x10x16x4xf32>
    %12 = vector.shape_cast %11 : vector<1x10x16x4xf32> to vector<160x4xf32>
    %13 = vector.extract_strided_slice %8 {offsets = [0, 0], sizes = [4, 8], strides = [1, 1]} : vector<8x8xf32> to vector<4x8xf32>
    %cst = arith.constant dense<0.000000e+00> : vector<160x8xf32>
    %14 = tpu.matmul %10, %13, %cst {dimension_numbers = #tpu.dot_dimension_numbers<[1], [0], [0], [1], [0, 0, 1, 1], [], []>} : vector<160x4xf32>, vector<4x8xf32>, vector<160x8xf32> -> vector<160x8xf32>
    %15 = vector.extract_strided_slice %8 {offsets = [4, 0], sizes = [4, 8], strides = [1, 1]} : vector<8x8xf32> to vector<4x8xf32>
    %cst_16 = arith.constant dense<0.000000e+00> : vector<160x8xf32>
    %16 = tpu.matmul %12, %15, %cst_16 {dimension_numbers = #tpu.dot_dimension_numbers<[1], [0], [0], [1], [0, 0, 1, 1], [], []>} : vector<160x4xf32>, vector<4x8xf32>, vector<160x8xf32> -> vector<160x8xf32>
    %17 = arith.addf %14, %16 : vector<160x8xf32>
    %c1 = arith.constant 1 : index
    %c0_17 = arith.constant 0 : index
    %c0_18 = arith.constant 0 : index
    %18 = vector.load %arg4[%c1, %c0_17, %c0_18] : memref<9x8x8xf32, #tpu.memory_space<vmem>>, vector<1x8x8xf32>
    %19 = vector.shape_cast %18 : vector<1x8x8xf32> to vector<8x8xf32>
    %c0_19 = arith.constant 0 : index
    %c1_20 = arith.constant 1 : index
    %c0_21 = arith.constant 0 : index
    %20 = vector.load %arg9[%c0_19, %c1_20, %c0_21] : memref<12x18x4xf32, #tpu.memory_space<vmem>>, vector<10x16x4xf32>
    %21 = vector.shape_cast %20 : vector<10x16x4xf32> to vector<160x4xf32>
    %c0_22 = arith.constant 0 : index
    %c0_23 = arith.constant 0 : index
    %c1_24 = arith.constant 1 : index
    %c0_25 = arith.constant 0 : index
    %22 = vector.load %arg3[%c0_22, %c0_23, %c1_24, %c0_25] : memref<1x12x18x4xf32, #tpu.memory_space<vmem>>, vector<1x10x16x4xf32>
    %23 = vector.shape_cast %22 : vector<1x10x16x4xf32> to vector<160x4xf32>
    %24 = vector.extract_strided_slice %19 {offsets = [0, 0], sizes = [4, 8], strides = [1, 1]} : vector<8x8xf32> to vector<4x8xf32>
    %cst_26 = arith.constant dense<0.000000e+00> : vector<160x8xf32>
    %25 = tpu.matmul %21, %24, %cst_26 {dimension_numbers = #tpu.dot_dimension_numbers<[1], [0], [0], [1], [0, 0, 1, 1], [], []>} : vector<160x4xf32>, vector<4x8xf32>, vector<160x8xf32> -> vector<160x8xf32>
    %26 = vector.extract_strided_slice %19 {offsets = [4, 0], sizes = [4, 8], strides = [1, 1]} : vector<8x8xf32> to vector<4x8xf32>
    %cst_27 = arith.constant dense<0.000000e+00> : vector<160x8xf32>
    %27 = tpu.matmul %23, %26, %cst_27 {dimension_numbers = #tpu.dot_dimension_numbers<[1], [0], [0], [1], [0, 0, 1, 1], [], []>} : vector<160x4xf32>, vector<4x8xf32>, vector<160x8xf32> -> vector<160x8xf32>
    %28 = arith.addf %25, %27 : vector<160x8xf32>
    %29 = arith.addf %17, %28 : vector<160x8xf32>
    %c2 = arith.constant 2 : index
    %c0_28 = arith.constant 0 : index
    %c0_29 = arith.constant 0 : index
    %30 = vector.load %arg4[%c2, %c0_28, %c0_29] : memref<9x8x8xf32, #tpu.memory_space<vmem>>, vector<1x8x8xf32>
    %31 = vector.shape_cast %30 : vector<1x8x8xf32> to vector<8x8xf32>
    %c0_30 = arith.constant 0 : index
    %c2_31 = arith.constant 2 : index
    %c0_32 = arith.constant 0 : index
    %32 = vector.load %arg9[%c0_30, %c2_31, %c0_32] : memref<12x18x4xf32, #tpu.memory_space<vmem>>, vector<10x16x4xf32>
    %33 = vector.shape_cast %32 : vector<10x16x4xf32> to vector<160x4xf32>
    %c0_33 = arith.constant 0 : index
    %c0_34 = arith.constant 0 : index
    %c2_35 = arith.constant 2 : index
    %c0_36 = arith.constant 0 : index
    %34 = vector.load %arg3[%c0_33, %c0_34, %c2_35, %c0_36] : memref<1x12x18x4xf32, #tpu.memory_space<vmem>>, vector<1x10x16x4xf32>
    %35 = vector.shape_cast %34 : vector<1x10x16x4xf32> to vector<160x4xf32>
    %36 = vector.extract_strided_slice %31 {offsets = [0, 0], sizes = [4, 8], strides = [1, 1]} : vector<8x8xf32> to vector<4x8xf32>
    %cst_37 = arith.constant dense<0.000000e+00> : vector<160x8xf32>
    %37 = tpu.matmul %33, %36, %cst_37 {dimension_numbers = #tpu.dot_dimension_numbers<[1], [0], [0], [1], [0, 0, 1, 1], [], []>} : vector<160x4xf32>, vector<4x8xf32>, vector<160x8xf32> -> vector<160x8xf32>
    %38 = vector.extract_strided_slice %31 {offsets = [4, 0], sizes = [4, 8], strides = [1, 1]} : vector<8x8xf32> to vector<4x8xf32>
    %cst_38 = arith.constant dense<0.000000e+00> : vector<160x8xf32>
    %39 = tpu.matmul %35, %38, %cst_38 {dimension_numbers = #tpu.dot_dimension_numbers<[1], [0], [0], [1], [0, 0, 1, 1], [], []>} : vector<160x4xf32>, vector<4x8xf32>, vector<160x8xf32> -> vector<160x8xf32>
    %40 = arith.addf %37, %39 : vector<160x8xf32>
    %41 = arith.addf %29, %40 : vector<160x8xf32>
    %c0_39 = arith.constant 0 : index
    %c0_40 = arith.constant 0 : index
    %42 = vector.load %arg11[%c0_39, %c0_40] : memref<160x8xf32, #tpu.memory_space<vmem>>, vector<160x8xf32>
    tpu.vector_store %arg11[%c0_39, %c0_40], %41 {strides = array<i32>} : memref<160x8xf32, #tpu.memory_space<vmem>>, vector<160x8xf32>,
    %c3 = arith.constant 3 : index
    %c0_41 = arith.constant 0 : index
    %c0_42 = arith.constant 0 : index
    %43 = vector.load %arg4[%c3, %c0_41, %c0_42] : memref<9x8x8xf32, #tpu.memory_space<vmem>>, vector<1x8x8xf32>
    %44 = vector.shape_cast %43 : vector<1x8x8xf32> to vector<8x8xf32>
    %c1_43 = arith.constant 1 : index
    %c0_44 = arith.constant 0 : index
    %c0_45 = arith.constant 0 : index
    %45 = vector.load %arg9[%c1_43, %c0_44, %c0_45] : memref<12x18x4xf32, #tpu.memory_space<vmem>>, vector<10x16x4xf32>
    %46 = vector.shape_cast %45 : vector<10x16x4xf32> to vector<160x4xf32>
    %c0_46 = arith.constant 0 : index
    %c1_47 = arith.constant 1 : index
    %c0_48 = arith.constant 0 : index
    %c0_49 = arith.constant 0 : index
    %47 = vector.load %arg3[%c0_46, %c1_47, %c0_48, %c0_49] : memref<1x12x18x4xf32, #tpu.memory_space<vmem>>, vector<1x10x16x4xf32>
    %48 = vector.shape_cast %47 : vector<1x10x16x4xf32> to vector<160x4xf32>
    %49 = vector.extract_strided_slice %44 {offsets = [0, 0], sizes = [4, 8], strides = [1, 1]} : vector<8x8xf32> to vector<4x8xf32>
    %cst_50 = arith.constant dense<0.000000e+00> : vector<160x8xf32>
    %50 = tpu.matmul %46, %49, %cst_50 {dimension_numbers = #tpu.dot_dimension_numbers<[1], [0], [0], [1], [0, 0, 1, 1], [], []>} : vector<160x4xf32>, vector<4x8xf32>, vector<160x8xf32> -> vector<160x8xf32>
    %51 = vector.extract_strided_slice %44 {offsets = [4, 0], sizes = [4, 8], strides = [1, 1]} : vector<8x8xf32> to vector<4x8xf32>
    %cst_51 = arith.constant dense<0.000000e+00> : vector<160x8xf32>
    %52 = tpu.matmul %48, %51, %cst_51 {dimension_numbers = #tpu.dot_dimension_numbers<[1], [0], [0], [1], [0, 0, 1, 1], [], []>} : vector<160x4xf32>, vector<4x8xf32>, vector<160x8xf32> -> vector<160x8xf32>
    %53 = arith.addf %50, %52 : vector<160x8xf32>
    %c4 = arith.constant 4 : index
    %c0_52 = arith.constant 0 : index
    %c0_53 = arith.constant 0 : index
    %54 = vector.load %arg4[%c4, %c0_52, %c0_53] : memref<9x8x8xf32, #tpu.memory_space<vmem>>, vector<1x8x8xf32>
    %55 = vector.shape_cast %54 : vector<1x8x8xf32> to vector<8x8xf32>
    %c1_54 = arith.constant 1 : index
    %c1_55 = arith.constant 1 : index
    %c0_56 = arith.constant 0 : index
    %56 = vector.load %arg9[%c1_54, %c1_55, %c0_56] : memref<12x18x4xf32, #tpu.memory_space<vmem>>, vector<10x16x4xf32>
    %57 = vector.shape_cast %56 : vector<10x16x4xf32> to vector<160x4xf32>
    %c0_57 = arith.constant 0 : index
    %c1_58 = arith.constant 1 : index
    %c1_59 = arith.constant 1 : index
    %c0_60 = arith.constant 0 : index
    %58 = vector.load %arg3[%c0_57, %c1_58, %c1_59, %c0_60] : memref<1x12x18x4xf32, #tpu.memory_space<vmem>>, vector<1x10x16x4xf32>
    %59 = vector.shape_cast %58 : vector<1x10x16x4xf32> to vector<160x4xf32>
    %60 = vector.extract_strided_slice %55 {offsets = [0, 0], sizes = [4, 8], strides = [1, 1]} : vector<8x8xf32> to vector<4x8xf32>
    %cst_61 = arith.constant dense<0.000000e+00> : vector<160x8xf32>
    %61 = tpu.matmul %57, %60, %cst_61 {dimension_numbers = #tpu.dot_dimension_numbers<[1], [0], [0], [1], [0, 0, 1, 1], [], []>} : vector<160x4xf32>, vector<4x8xf32>, vector<160x8xf32> -> vector<160x8xf32>
    %62 = vector.extract_strided_slice %55 {offsets = [4, 0], sizes = [4, 8], strides = [1, 1]} : vector<8x8xf32> to vector<4x8xf32>
    %cst_62 = arith.constant dense<0.000000e+00> : vector<160x8xf32>
    %63 = tpu.matmul %59, %62, %cst_62 {dimension_numbers = #tpu.dot_dimension_numbers<[1], [0], [0], [1], [0, 0, 1, 1], [], []>} : vector<160x4xf32>, vector<4x8xf32>, vector<160x8xf32> -> vector<160x8xf32>
    %64 = arith.addf %61, %63 : vector<160x8xf32>
    %65 = arith.addf %53, %64 : vector<160x8xf32>
    %c5 = arith.constant 5 : index
    %c0_63 = arith.constant 0 : index
    %c0_64 = arith.constant 0 : index
    %66 = vector.load %arg4[%c5, %c0_63, %c0_64] : memref<9x8x8xf32, #tpu.memory_space<vmem>>, vector<1x8x8xf32>
    %67 = vector.shape_cast %66 : vector<1x8x8xf32> to vector<8x8xf32>
    %c1_65 = arith.constant 1 : index
    %c2_66 = arith.constant 2 : index
    %c0_67 = arith.constant 0 : index
    %68 = vector.load %arg9[%c1_65, %c2_66, %c0_67] : memref<12x18x4xf32, #tpu.memory_space<vmem>>, vector<10x16x4xf32>
    %69 = vector.shape_cast %68 : vector<10x16x4xf32> to vector<160x4xf32>
    %c0_68 = arith.constant 0 : index
    %c1_69 = arith.constant 1 : index
    %c2_70 = arith.constant 2 : index
    %c0_71 = arith.constant 0 : index
    %70 = vector.load %arg3[%c0_68, %c1_69, %c2_70, %c0_71] : memref<1x12x18x4xf32, #tpu.memory_space<vmem>>, vector<1x10x16x4xf32>
    %71 = vector.shape_cast %70 : vector<1x10x16x4xf32> to vector<160x4xf32>
    %72 = vector.extract_strided_slice %67 {offsets = [0, 0], sizes = [4, 8], strides = [1, 1]} : vector<8x8xf32> to vector<4x8xf32>
    %cst_72 = arith.constant dense<0.000000e+00> : vector<160x8xf32>
    %73 = tpu.matmul %69, %72, %cst_72 {dimension_numbers = #tpu.dot_dimension_numbers<[1], [0], [0], [1], [0, 0, 1, 1], [], []>} : vector<160x4xf32>, vector<4x8xf32>, vector<160x8xf32> -> vector<160x8xf32>
    %74 = vector.extract_strided_slice %67 {offsets = [4, 0], sizes = [4, 8], strides = [1, 1]} : vector<8x8xf32> to vector<4x8xf32>
    %cst_73 = arith.constant dense<0.000000e+00> : vector<160x8xf32>
    %75 = tpu.matmul %71, %74, %cst_73 {dimension_numbers = #tpu.dot_dimension_numbers<[1], [0], [0], [1], [0, 0, 1, 1], [], []>} : vector<160x4xf32>, vector<4x8xf32>, vector<160x8xf32> -> vector<160x8xf32>
    %76 = arith.addf %73, %75 : vector<160x8xf32>
    %77 = arith.addf %65, %76 : vector<160x8xf32>
    %c0_74 = arith.constant 0 : index
    %c0_75 = arith.constant 0 : index
    %78 = vector.load %arg11[%c0_74, %c0_75] : memref<160x8xf32, #tpu.memory_space<vmem>>, vector<160x8xf32>
    %79 = arith.addf %78, %77 : vector<160x8xf32>
    %c0_76 = arith.constant 0 : index
    %c0_77 = arith.constant 0 : index
    %80 = vector.load %arg11[%c0_76, %c0_77] : memref<160x8xf32, #tpu.memory_space<vmem>>, vector<160x8xf32>
    tpu.vector_store %arg11[%c0_76, %c0_77], %79 {strides = array<i32>} : memref<160x8xf32, #tpu.memory_space<vmem>>, vector<160x8xf32>,
    %c6 = arith.constant 6 : index
    %c0_78 = arith.constant 0 : index
    %c0_79 = arith.constant 0 : index
    %81 = vector.load %arg4[%c6, %c0_78, %c0_79] : memref<9x8x8xf32, #tpu.memory_space<vmem>>, vector<1x8x8xf32>
    %82 = vector.shape_cast %81 : vector<1x8x8xf32> to vector<8x8xf32>
    %c2_80 = arith.constant 2 : index
    %c0_81 = arith.constant 0 : index
    %c0_82 = arith.constant 0 : index
    %83 = vector.load %arg9[%c2_80, %c0_81, %c0_82] : memref<12x18x4xf32, #tpu.memory_space<vmem>>, vector<10x16x4xf32>
    %84 = vector.shape_cast %83 : vector<10x16x4xf32> to vector<160x4xf32>
    %c0_83 = arith.constant 0 : index
    %c2_84 = arith.constant 2 : index
    %c0_85 = arith.constant 0 : index
    %c0_86 = arith.constant 0 : index
    %85 = vector.load %arg3[%c0_83, %c2_84, %c0_85, %c0_86] : memref<1x12x18x4xf32, #tpu.memory_space<vmem>>, vector<1x10x16x4xf32>
    %86 = vector.shape_cast %85 : vector<1x10x16x4xf32> to vector<160x4xf32>
    %87 = vector.extract_strided_slice %82 {offsets = [0, 0], sizes = [4, 8], strides = [1, 1]} : vector<8x8xf32> to vector<4x8xf32>
    %cst_87 = arith.constant dense<0.000000e+00> : vector<160x8xf32>
    %88 = tpu.matmul %84, %87, %cst_87 {dimension_numbers = #tpu.dot_dimension_numbers<[1], [0], [0], [1], [0, 0, 1, 1], [], []>} : vector<160x4xf32>, vector<4x8xf32>, vector<160x8xf32> -> vector<160x8xf32>
    %89 = vector.extract_strided_slice %82 {offsets = [4, 0], sizes = [4, 8], strides = [1, 1]} : vector<8x8xf32> to vector<4x8xf32>
    %cst_88 = arith.constant dense<0.000000e+00> : vector<160x8xf32>
    %90 = tpu.matmul %86, %89, %cst_88 {dimension_numbers = #tpu.dot_dimension_numbers<[1], [0], [0], [1], [0, 0, 1, 1], [], []>} : vector<160x4xf32>, vector<4x8xf32>, vector<160x8xf32> -> vector<160x8xf32>
    %91 = arith.addf %88, %90 : vector<160x8xf32>
    %c7 = arith.constant 7 : index
    %c0_89 = arith.constant 0 : index
    %c0_90 = arith.constant 0 : index
    %92 = vector.load %arg4[%c7, %c0_89, %c0_90] : memref<9x8x8xf32, #tpu.memory_space<vmem>>, vector<1x8x8xf32>
    %93 = vector.shape_cast %92 : vector<1x8x8xf32> to vector<8x8xf32>
    %c2_91 = arith.constant 2 : index
    %c1_92 = arith.constant 1 : index
    %c0_93 = arith.constant 0 : index
    %94 = vector.load %arg9[%c2_91, %c1_92, %c0_93] : memref<12x18x4xf32, #tpu.memory_space<vmem>>, vector<10x16x4xf32>
    %95 = vector.shape_cast %94 : vector<10x16x4xf32> to vector<160x4xf32>
    %c0_94 = arith.constant 0 : index
    %c2_95 = arith.constant 2 : index
    %c1_96 = arith.constant 1 : index
    %c0_97 = arith.constant 0 : index
    %96 = vector.load %arg3[%c0_94, %c2_95, %c1_96, %c0_97] : memref<1x12x18x4xf32, #tpu.memory_space<vmem>>, vector<1x10x16x4xf32>
    %97 = vector.shape_cast %96 : vector<1x10x16x4xf32> to vector<160x4xf32>
    %98 = vector.extract_strided_slice %93 {offsets = [0, 0], sizes = [4, 8], strides = [1, 1]} : vector<8x8xf32> to vector<4x8xf32>
    %cst_98 = arith.constant dense<0.000000e+00> : vector<160x8xf32>
    %99 = tpu.matmul %95, %98, %cst_98 {dimension_numbers = #tpu.dot_dimension_numbers<[1], [0], [0], [1], [0, 0, 1, 1], [], []>} : vector<160x4xf32>, vector<4x8xf32>, vector<160x8xf32> -> vector<160x8xf32>
    %100 = vector.extract_strided_slice %93 {offsets = [4, 0], sizes = [4, 8], strides = [1, 1]} : vector<8x8xf32> to vector<4x8xf32>
    %cst_99 = arith.constant dense<0.000000e+00> : vector<160x8xf32>
    %101 = tpu.matmul %97, %100, %cst_99 {dimension_numbers = #tpu.dot_dimension_numbers<[1], [0], [0], [1], [0, 0, 1, 1], [], []>} : vector<160x4xf32>, vector<4x8xf32>, vector<160x8xf32> -> vector<160x8xf32>
    %102 = arith.addf %99, %101 : vector<160x8xf32>
    %103 = arith.addf %91, %102 : vector<160x8xf32>
    %c8 = arith.constant 8 : index
    %c0_100 = arith.constant 0 : index
    %c0_101 = arith.constant 0 : index
    %104 = vector.load %arg4[%c8, %c0_100, %c0_101] : memref<9x8x8xf32, #tpu.memory_space<vmem>>, vector<1x8x8xf32>
    %105 = vector.shape_cast %104 : vector<1x8x8xf32> to vector<8x8xf32>
    %c2_102 = arith.constant 2 : index
    %c2_103 = arith.constant 2 : index
    %c0_104 = arith.constant 0 : index
    %106 = vector.load %arg9[%c2_102, %c2_103, %c0_104] : memref<12x18x4xf32, #tpu.memory_space<vmem>>, vector<10x16x4xf32>
    %107 = vector.shape_cast %106 : vector<10x16x4xf32> to vector<160x4xf32>
    %c0_105 = arith.constant 0 : index
    %c2_106 = arith.constant 2 : index
    %c2_107 = arith.constant 2 : index
    %c0_108 = arith.constant 0 : index
    %108 = vector.load %arg3[%c0_105, %c2_106, %c2_107, %c0_108] : memref<1x12x18x4xf32, #tpu.memory_space<vmem>>, vector<1x10x16x4xf32>
    %109 = vector.shape_cast %108 : vector<1x10x16x4xf32> to vector<160x4xf32>
    %110 = vector.extract_strided_slice %105 {offsets = [0, 0], sizes = [4, 8], strides = [1, 1]} : vector<8x8xf32> to vector<4x8xf32>
    %cst_109 = arith.constant dense<0.000000e+00> : vector<160x8xf32>
    %111 = tpu.matmul %107, %110, %cst_109 {dimension_numbers = #tpu.dot_dimension_numbers<[1], [0], [0], [1], [0, 0, 1, 1], [], []>} : vector<160x4xf32>, vector<4x8xf32>, vector<160x8xf32> -> vector<160x8xf32>
    %112 = vector.extract_strided_slice %105 {offsets = [4, 0], sizes = [4, 8], strides = [1, 1]} : vector<8x8xf32> to vector<4x8xf32>
    %cst_110 = arith.constant dense<0.000000e+00> : vector<160x8xf32>
    %113 = tpu.matmul %109, %112, %cst_110 {dimension_numbers = #tpu.dot_dimension_numbers<[1], [0], [0], [1], [0, 0, 1, 1], [], []>} : vector<160x4xf32>, vector<4x8xf32>, vector<160x8xf32> -> vector<160x8xf32>
    %114 = arith.addf %111, %113 : vector<160x8xf32>
    %115 = arith.addf %103, %114 : vector<160x8xf32>
    %c0_111 = arith.constant 0 : index
    %c0_112 = arith.constant 0 : index
    %116 = vector.load %arg11[%c0_111, %c0_112] : memref<160x8xf32, #tpu.memory_space<vmem>>, vector<160x8xf32>
    %117 = arith.addf %116, %115 : vector<160x8xf32>
    %c0_113 = arith.constant 0 : index
    %c0_114 = arith.constant 0 : index
    %118 = vector.load %arg11[%c0_113, %c0_114] : memref<160x8xf32, #tpu.memory_space<vmem>>, vector<160x8xf32>
    tpu.vector_store %arg11[%c0_113, %c0_114], %117 {strides = array<i32>} : memref<160x8xf32, #tpu.memory_space<vmem>>, vector<160x8xf32>,
    %c0_115 = arith.constant 0 : index
    %c0_116 = arith.constant 0 : index
    %119 = vector.load %arg11[%c0_115, %c0_116] : memref<160x8xf32, #tpu.memory_space<vmem>>, vector<160x8xf32>
    %c0_117 = arith.constant 0 : index
    %c0_118 = arith.constant 0 : index
    %120 = vector.load %arg5[%c0_117, %c0_118] : memref<1x8xf32, #tpu.memory_space<vmem>>, vector<1x8xf32>
    %121 = vector.broadcast %120 : vector<1x8xf32> to vector<160x8xf32>
    %122 = arith.addf %119, %121 : vector<160x8xf32>
    %cst_119 = arith.constant 0.000000e+00 : f32
    %123 = vector.broadcast %cst_119 : f32 to vector<160x8xf32>
    %124 = arith.maximumf %122, %123 : vector<160x8xf32>
    %125 = vector.shape_cast %124 : vector<160x8xf32> to vector<10x16x8xf32>
    %c0_120 = arith.constant 0 : index
    %c1_121 = arith.constant 1 : index
    %c0_122 = arith.constant 0 : index
    %126 = vector.load %arg10[%c0_120, %c1_121, %c0_122] : memref<10x18x8xf32, #tpu.memory_space<vmem>>, vector<10x16x8xf32>
    tpu.vector_store %arg10[%c0_120, %c1_121, %c0_122], %125 {strides = array<i32>} : memref<10x18x8xf32, #tpu.memory_space<vmem>>, vector<10x16x8xf32>,
    %cst_123 = arith.constant 0.000000e+00 : f32
    %127 = vector.broadcast %cst_123 : f32 to vector<10x1x8xf32>
    %c0_124 = arith.constant 0 : index
    %c0_125 = arith.constant 0 : index
    %c0_126 = arith.constant 0 : index
    %128 = vector.load %arg10[%c0_124, %c0_125, %c0_126] : memref<10x18x8xf32, #tpu.memory_space<vmem>>, vector<10x1x8xf32>
    tpu.vector_store %arg10[%c0_124, %c0_125, %c0_126], %127 {strides = array<i32>} : memref<10x18x8xf32, #tpu.memory_space<vmem>>, vector<10x1x8xf32>,
    %c0_127 = arith.constant 0 : index
    %c17 = arith.constant 17 : index
    %c0_128 = arith.constant 0 : index
    %129 = vector.load %arg10[%c0_127, %c17, %c0_128] : memref<10x18x8xf32, #tpu.memory_space<vmem>>, vector<10x1x8xf32>
    tpu.vector_store %arg10[%c0_127, %c17, %c0_128], %127 {strides = array<i32>} : memref<10x18x8xf32, #tpu.memory_space<vmem>>, vector<10x1x8xf32>,
    %c0_i32 = arith.constant 0 : i32
    %130 = arith.cmpi eq, %arg1, %c0_i32 : i32
    %131 = arith.extui %130 : i1 to i32
    %c0_i32_129 = arith.constant 0 : i32
    %132 = arith.cmpi ne, %131, %c0_i32_129 : i32
    scf.if %132 {
      %cst_213 = arith.constant 0.000000e+00 : f32
      %202 = vector.broadcast %cst_213 : f32 to vector<1x18x8xf32>
      %c0_214 = arith.constant 0 : index
      %c0_215 = arith.constant 0 : index
      %c0_216 = arith.constant 0 : index
      %203 = vector.load %arg10[%c0_214, %c0_215, %c0_216] : memref<10x18x8xf32, #tpu.memory_space<vmem>>, vector<1x18x8xf32>
      tpu.vector_store %arg10[%c0_214, %c0_215, %c0_216], %202 {strides = array<i32>} : memref<10x18x8xf32, #tpu.memory_space<vmem>>, vector<1x18x8xf32>,
    } else {
    }
    %c1_i32 = arith.constant 1 : i32
    %133 = arith.cmpi eq, %arg1, %c1_i32 : i32
    %134 = arith.extui %133 : i1 to i32
    %c0_i32_130 = arith.constant 0 : i32
    %135 = arith.cmpi ne, %134, %c0_i32_130 : i32
    scf.if %135 {
      %cst_213 = arith.constant 0.000000e+00 : f32
      %202 = vector.broadcast %cst_213 : f32 to vector<1x18x8xf32>
      %c9 = arith.constant 9 : index
      %c0_214 = arith.constant 0 : index
      %c0_215 = arith.constant 0 : index
      %203 = vector.load %arg10[%c9, %c0_214, %c0_215] : memref<10x18x8xf32, #tpu.memory_space<vmem>>, vector<1x18x8xf32>
      tpu.vector_store %arg10[%c9, %c0_214, %c0_215], %202 {strides = array<i32>} : memref<10x18x8xf32, #tpu.memory_space<vmem>>, vector<1x18x8xf32>,
    } else {
    }
    %c0_131 = arith.constant 0 : index
    %c0_132 = arith.constant 0 : index
    %c0_133 = arith.constant 0 : index
    %136 = vector.load %arg10[%c0_131, %c0_132, %c0_133] : memref<10x18x8xf32, #tpu.memory_space<vmem>>, vector<8x16x8xf32>
    %137 = vector.shape_cast %136 : vector<8x16x8xf32> to vector<128x8xf32>
    %c0_134 = arith.constant 0 : index
    %c0_135 = arith.constant 0 : index
    %c0_136 = arith.constant 0 : index
    %138 = vector.load %arg6[%c0_134, %c0_135, %c0_136] : memref<9x8x8xf32, #tpu.memory_space<vmem>>, vector<1x8x8xf32>
    %139 = vector.shape_cast %138 : vector<1x8x8xf32> to vector<8x8xf32>
    %cst_137 = arith.constant dense<0.000000e+00> : vector<128x8xf32>
    %140 = tpu.matmul %137, %139, %cst_137 {dimension_numbers = #tpu.dot_dimension_numbers<[1], [0], [0], [1], [0, 0, 1, 1], [], []>} : vector<128x8xf32>, vector<8x8xf32>, vector<128x8xf32> -> vector<128x8xf32>
    %c0_138 = arith.constant 0 : index
    %c1_139 = arith.constant 1 : index
    %c0_140 = arith.constant 0 : index
    %141 = vector.load %arg10[%c0_138, %c1_139, %c0_140] : memref<10x18x8xf32, #tpu.memory_space<vmem>>, vector<8x16x8xf32>
    %142 = vector.shape_cast %141 : vector<8x16x8xf32> to vector<128x8xf32>
    %c1_141 = arith.constant 1 : index
    %c0_142 = arith.constant 0 : index
    %c0_143 = arith.constant 0 : index
    %143 = vector.load %arg6[%c1_141, %c0_142, %c0_143] : memref<9x8x8xf32, #tpu.memory_space<vmem>>, vector<1x8x8xf32>
    %144 = vector.shape_cast %143 : vector<1x8x8xf32> to vector<8x8xf32>
    %cst_144 = arith.constant dense<0.000000e+00> : vector<128x8xf32>
    %145 = tpu.matmul %142, %144, %cst_144 {dimension_numbers = #tpu.dot_dimension_numbers<[1], [0], [0], [1], [0, 0, 1, 1], [], []>} : vector<128x8xf32>, vector<8x8xf32>, vector<128x8xf32> -> vector<128x8xf32>
    %146 = arith.addf %140, %145 : vector<128x8xf32>
    %c0_145 = arith.constant 0 : index
    %c2_146 = arith.constant 2 : index
    %c0_147 = arith.constant 0 : index
    %147 = vector.load %arg10[%c0_145, %c2_146, %c0_147] : memref<10x18x8xf32, #tpu.memory_space<vmem>>, vector<8x16x8xf32>
    %148 = vector.shape_cast %147 : vector<8x16x8xf32> to vector<128x8xf32>
    %c2_148 = arith.constant 2 : index
    %c0_149 = arith.constant 0 : index
    %c0_150 = arith.constant 0 : index
    %149 = vector.load %arg6[%c2_148, %c0_149, %c0_150] : memref<9x8x8xf32, #tpu.memory_space<vmem>>, vector<1x8x8xf32>
    %150 = vector.shape_cast %149 : vector<1x8x8xf32> to vector<8x8xf32>
    %cst_151 = arith.constant dense<0.000000e+00> : vector<128x8xf32>
    %151 = tpu.matmul %148, %150, %cst_151 {dimension_numbers = #tpu.dot_dimension_numbers<[1], [0], [0], [1], [0, 0, 1, 1], [], []>} : vector<128x8xf32>, vector<8x8xf32>, vector<128x8xf32> -> vector<128x8xf32>
    %152 = arith.addf %146, %151 : vector<128x8xf32>
    %c0_152 = arith.constant 0 : index
    %c0_153 = arith.constant 0 : index
    %153 = vector.load %arg11[%c0_152, %c0_153] : memref<160x8xf32, #tpu.memory_space<vmem>>, vector<128x8xf32>
    tpu.vector_store %arg11[%c0_152, %c0_153], %152 {strides = array<i32>} : memref<160x8xf32, #tpu.memory_space<vmem>>, vector<128x8xf32>,
    %c1_154 = arith.constant 1 : index
    %c0_155 = arith.constant 0 : index
    %c0_156 = arith.constant 0 : index
    %154 = vector.load %arg10[%c1_154, %c0_155, %c0_156] : memref<10x18x8xf32, #tpu.memory_space<vmem>>, vector<8x16x8xf32>
    %155 = vector.shape_cast %154 : vector<8x16x8xf32> to vector<128x8xf32>
    %c3_157 = arith.constant 3 : index
    %c0_158 = arith.constant 0 : index
    %c0_159 = arith.constant 0 : index
    %156 = vector.load %arg6[%c3_157, %c0_158, %c0_159] : memref<9x8x8xf32, #tpu.memory_space<vmem>>, vector<1x8x8xf32>
    %157 = vector.shape_cast %156 : vector<1x8x8xf32> to vector<8x8xf32>
    %cst_160 = arith.constant dense<0.000000e+00> : vector<128x8xf32>
    %158 = tpu.matmul %155, %157, %cst_160 {dimension_numbers = #tpu.dot_dimension_numbers<[1], [0], [0], [1], [0, 0, 1, 1], [], []>} : vector<128x8xf32>, vector<8x8xf32>, vector<128x8xf32> -> vector<128x8xf32>
    %c1_161 = arith.constant 1 : index
    %c1_162 = arith.constant 1 : index
    %c0_163 = arith.constant 0 : index
    %159 = vector.load %arg10[%c1_161, %c1_162, %c0_163] : memref<10x18x8xf32, #tpu.memory_space<vmem>>, vector<8x16x8xf32>
    %160 = vector.shape_cast %159 : vector<8x16x8xf32> to vector<128x8xf32>
    %c4_164 = arith.constant 4 : index
    %c0_165 = arith.constant 0 : index
    %c0_166 = arith.constant 0 : index
    %161 = vector.load %arg6[%c4_164, %c0_165, %c0_166] : memref<9x8x8xf32, #tpu.memory_space<vmem>>, vector<1x8x8xf32>
    %162 = vector.shape_cast %161 : vector<1x8x8xf32> to vector<8x8xf32>
    %cst_167 = arith.constant dense<0.000000e+00> : vector<128x8xf32>
    %163 = tpu.matmul %160, %162, %cst_167 {dimension_numbers = #tpu.dot_dimension_numbers<[1], [0], [0], [1], [0, 0, 1, 1], [], []>} : vector<128x8xf32>, vector<8x8xf32>, vector<128x8xf32> -> vector<128x8xf32>
    %164 = arith.addf %158, %163 : vector<128x8xf32>
    %c1_168 = arith.constant 1 : index
    %c2_169 = arith.constant 2 : index
    %c0_170 = arith.constant 0 : index
    %165 = vector.load %arg10[%c1_168, %c2_169, %c0_170] : memref<10x18x8xf32, #tpu.memory_space<vmem>>, vector<8x16x8xf32>
    %166 = vector.shape_cast %165 : vector<8x16x8xf32> to vector<128x8xf32>
    %c5_171 = arith.constant 5 : index
    %c0_172 = arith.constant 0 : index
    %c0_173 = arith.constant 0 : index
    %167 = vector.load %arg6[%c5_171, %c0_172, %c0_173] : memref<9x8x8xf32, #tpu.memory_space<vmem>>, vector<1x8x8xf32>
    %168 = vector.shape_cast %167 : vector<1x8x8xf32> to vector<8x8xf32>
    %cst_174 = arith.constant dense<0.000000e+00> : vector<128x8xf32>
    %169 = tpu.matmul %166, %168, %cst_174 {dimension_numbers = #tpu.dot_dimension_numbers<[1], [0], [0], [1], [0, 0, 1, 1], [], []>} : vector<128x8xf32>, vector<8x8xf32>, vector<128x8xf32> -> vector<128x8xf32>
    %170 = arith.addf %164, %169 : vector<128x8xf32>
    %c0_175 = arith.constant 0 : index
    %c0_176 = arith.constant 0 : index
    %171 = vector.load %arg11[%c0_175, %c0_176] : memref<160x8xf32, #tpu.memory_space<vmem>>, vector<128x8xf32>
    %172 = arith.addf %171, %170 : vector<128x8xf32>
    %c0_177 = arith.constant 0 : index
    %c0_178 = arith.constant 0 : index
    %173 = vector.load %arg11[%c0_177, %c0_178] : memref<160x8xf32, #tpu.memory_space<vmem>>, vector<128x8xf32>
    tpu.vector_store %arg11[%c0_177, %c0_178], %172 {strides = array<i32>} : memref<160x8xf32, #tpu.memory_space<vmem>>, vector<128x8xf32>,
    %c2_179 = arith.constant 2 : index
    %c0_180 = arith.constant 0 : index
    %c0_181 = arith.constant 0 : index
    %174 = vector.load %arg10[%c2_179, %c0_180, %c0_181] : memref<10x18x8xf32, #tpu.memory_space<vmem>>, vector<8x16x8xf32>
    %175 = vector.shape_cast %174 : vector<8x16x8xf32> to vector<128x8xf32>
    %c6_182 = arith.constant 6 : index
    %c0_183 = arith.constant 0 : index
    %c0_184 = arith.constant 0 : index
    %176 = vector.load %arg6[%c6_182, %c0_183, %c0_184] : memref<9x8x8xf32, #tpu.memory_space<vmem>>, vector<1x8x8xf32>
    %177 = vector.shape_cast %176 : vector<1x8x8xf32> to vector<8x8xf32>
    %cst_185 = arith.constant dense<0.000000e+00> : vector<128x8xf32>
    %178 = tpu.matmul %175, %177, %cst_185 {dimension_numbers = #tpu.dot_dimension_numbers<[1], [0], [0], [1], [0, 0, 1, 1], [], []>} : vector<128x8xf32>, vector<8x8xf32>, vector<128x8xf32> -> vector<128x8xf32>
    %c2_186 = arith.constant 2 : index
    %c1_187 = arith.constant 1 : index
    %c0_188 = arith.constant 0 : index
    %179 = vector.load %arg10[%c2_186, %c1_187, %c0_188] : memref<10x18x8xf32, #tpu.memory_space<vmem>>, vector<8x16x8xf32>
    %180 = vector.shape_cast %179 : vector<8x16x8xf32> to vector<128x8xf32>
    %c7_189 = arith.constant 7 : index
    %c0_190 = arith.constant 0 : index
    %c0_191 = arith.constant 0 : index
    %181 = vector.load %arg6[%c7_189, %c0_190, %c0_191] : memref<9x8x8xf32, #tpu.memory_space<vmem>>, vector<1x8x8xf32>
    %182 = vector.shape_cast %181 : vector<1x8x8xf32> to vector<8x8xf32>
    %cst_192 = arith.constant dense<0.000000e+00> : vector<128x8xf32>
    %183 = tpu.matmul %180, %182, %cst_192 {dimension_numbers = #tpu.dot_dimension_numbers<[1], [0], [0], [1], [0, 0, 1, 1], [], []>} : vector<128x8xf32>, vector<8x8xf32>, vector<128x8xf32> -> vector<128x8xf32>
    %184 = arith.addf %178, %183 : vector<128x8xf32>
    %c2_193 = arith.constant 2 : index
    %c2_194 = arith.constant 2 : index
    %c0_195 = arith.constant 0 : index
    %185 = vector.load %arg10[%c2_193, %c2_194, %c0_195] : memref<10x18x8xf32, #tpu.memory_space<vmem>>, vector<8x16x8xf32>
    %186 = vector.shape_cast %185 : vector<8x16x8xf32> to vector<128x8xf32>
    %c8_196 = arith.constant 8 : index
    %c0_197 = arith.constant 0 : index
    %c0_198 = arith.constant 0 : index
    %187 = vector.load %arg6[%c8_196, %c0_197, %c0_198] : memref<9x8x8xf32, #tpu.memory_space<vmem>>, vector<1x8x8xf32>
    %188 = vector.shape_cast %187 : vector<1x8x8xf32> to vector<8x8xf32>
    %cst_199 = arith.constant dense<0.000000e+00> : vector<128x8xf32>
    %189 = tpu.matmul %186, %188, %cst_199 {dimension_numbers = #tpu.dot_dimension_numbers<[1], [0], [0], [1], [0, 0, 1, 1], [], []>} : vector<128x8xf32>, vector<8x8xf32>, vector<128x8xf32> -> vector<128x8xf32>
    %190 = arith.addf %184, %189 : vector<128x8xf32>
    %c0_200 = arith.constant 0 : index
    %c0_201 = arith.constant 0 : index
    %191 = vector.load %arg11[%c0_200, %c0_201] : memref<160x8xf32, #tpu.memory_space<vmem>>, vector<128x8xf32>
    %192 = arith.addf %191, %190 : vector<128x8xf32>
    %c0_202 = arith.constant 0 : index
    %c0_203 = arith.constant 0 : index
    %193 = vector.load %arg11[%c0_202, %c0_203] : memref<160x8xf32, #tpu.memory_space<vmem>>, vector<128x8xf32>
    tpu.vector_store %arg11[%c0_202, %c0_203], %192 {strides = array<i32>} : memref<160x8xf32, #tpu.memory_space<vmem>>, vector<128x8xf32>,
    %c0_204 = arith.constant 0 : index
    %c0_205 = arith.constant 0 : index
    %194 = vector.load %arg11[%c0_204, %c0_205] : memref<160x8xf32, #tpu.memory_space<vmem>>, vector<128x8xf32>
    %c0_206 = arith.constant 0 : index
    %c0_207 = arith.constant 0 : index
    %195 = vector.load %arg7[%c0_206, %c0_207] : memref<1x8xf32, #tpu.memory_space<vmem>>, vector<1x8xf32>
    %196 = vector.broadcast %195 : vector<1x8xf32> to vector<128x8xf32>
    %197 = arith.addf %194, %196 : vector<128x8xf32>
    %cst_208 = arith.constant 0.000000e+00 : f32
    %198 = vector.broadcast %cst_208 : f32 to vector<128x8xf32>
    %199 = arith.maximumf %197, %198 : vector<128x8xf32>
    %200 = vector.shape_cast %199 : vector<128x8xf32> to vector<1x8x16x8xf32>
    %c0_209 = arith.constant 0 : index
    %c0_210 = arith.constant 0 : index
    %c0_211 = arith.constant 0 : index
    %c0_212 = arith.constant 0 : index
    %201 = vector.load %arg8[%c0_209, %c0_210, %c0_211, %c0_212] : memref<1x8x16x8xf32, #tpu.memory_space<vmem>>, vector<1x8x16x8xf32>
    tpu.vector_store %arg8[%c0_209, %c0_210, %c0_211, %c0_212], %200 {strides = array<i32>} : memref<1x8x16x8xf32, #tpu.memory_space<vmem>>, vector<1x8x16x8xf32>,
    return
  }
  func.func @transform_0(%arg0: i32, %arg1: i32) -> (i32, i32, i32, i32) {
    %c2_i32 = arith.constant 2 : i32
    %0 = arith.muli %arg0, %c2_i32 : i32
    %1 = arith.addi %0, %arg1 : i32
    %c0_i32 = arith.constant 0 : i32
    %c0_i32_0 = arith.constant 0 : i32
    %c0_i32_1 = arith.constant 0 : i32
    %c0_i32_2 = arith.constant 0 : i32
    return %1, %c0_i32, %c0_i32_0, %c0_i32_1 : i32, i32, i32, i32
  }
  func.func @transform_1(%arg0: i32, %arg1: i32) -> (i32, i32, i32, i32) {
    %c2_i32 = arith.constant 2 : i32
    %0 = arith.muli %arg0, %c2_i32 : i32
    %1 = arith.addi %0, %arg1 : i32
    %c0_i32 = arith.constant 0 : i32
    %c0_i32_0 = arith.constant 0 : i32
    %c0_i32_1 = arith.constant 0 : i32
    %c0_i32_2 = arith.constant 0 : i32
    return %1, %c0_i32, %c0_i32_0, %c0_i32_1 : i32, i32, i32, i32
  }
  func.func @transform_2(%arg0: i32, %arg1: i32) -> (i32, i32, i32) {
    %c0_i32 = arith.constant 0 : i32
    %c0_i32_0 = arith.constant 0 : i32
    %c0_i32_1 = arith.constant 0 : i32
    %c0_i32_2 = arith.constant 0 : i32
    return %c0_i32, %c0_i32_0, %c0_i32_1 : i32, i32, i32
  }
  func.func @transform_3(%arg0: i32, %arg1: i32) -> (i32, i32) {
    %c0_i32 = arith.constant 0 : i32
    %c0_i32_0 = arith.constant 0 : i32
    %c0_i32_1 = arith.constant 0 : i32
    return %c0_i32, %c0_i32_0 : i32, i32
  }
  func.func @transform_4(%arg0: i32, %arg1: i32) -> (i32, i32, i32) {
    %c0_i32 = arith.constant 0 : i32
    %c0_i32_0 = arith.constant 0 : i32
    %c0_i32_1 = arith.constant 0 : i32
    %c0_i32_2 = arith.constant 0 : i32
    return %c0_i32, %c0_i32_0, %c0_i32_1 : i32, i32, i32
  }
  func.func @transform_5(%arg0: i32, %arg1: i32) -> (i32, i32) {
    %c0_i32 = arith.constant 0 : i32
    %c0_i32_0 = arith.constant 0 : i32
    %c0_i32_1 = arith.constant 0 : i32
    return %c0_i32, %c0_i32_0 : i32, i32
  }
  func.func @transform_6(%arg0: i32, %arg1: i32) -> (i32, i32, i32, i32) {
    %c0_i32 = arith.constant 0 : i32
    %c0_i32_0 = arith.constant 0 : i32
    %c0_i32_1 = arith.constant 0 : i32
    return %arg0, %arg1, %c0_i32, %c0_i32_0 : i32, i32, i32, i32
  }
}

</mosaic_0001>

<bundles_post_ra>
// kernel: decoder_block.1
= control target key start
LH: loop header
LB: loop body
LE: loop exit
PB: predicated region body
PF: predicated region fallthrough
CT: control target
= control target key end

     0   :  { %s5983_s21 = smov 0   ;;  %s5985_s22 = smov 0   ;;  %s8304_s0 = inlined_call_operand.vmem [shape: f32[4,6,18,4], index: 0, kind: input, shape index: {}]   ;;  %s8305_s1 = inlined_call_operand.vmem [shape: f32[4,12,18,4], index: 1, kind: input, shape index: {}]   ;;  %s8306_s2 = inlined_call_operand.vmem [shape: f32[9,8,8], index: 2, kind: input, shape index: {}]   ;;  %s8307_s3 = inlined_call_operand.vmem [shape: f32[1,8], index: 3, kind: input, shape index: {}]   ;;  %s8308_s4 = inlined_call_operand.vmem [shape: f32[9,8,8], index: 4, kind: input, shape index: {}]   ;;  %s8309_s5 = inlined_call_operand.vmem [shape: f32[1,8], index: 5, kind: input, shape index: {}]   ;;  %s8310_s6 = inlined_call_operand.vmem [shape: f32[2,16,16,8], index: 6, kind: output, shape index: {}]  }
   0x1   :  { %s5987_s23 = smov 0   ;;  %s5989_s24 = smov 0  }
   0x2   :  { %s5991_s25 = smov 0  }
   0x3 LB: > { %s25_s26 = sadd.s32 1, %s5935_s23  ;;  %s28_s27 = sadd.s32 1, %s5939_s24  ;;  %s5943_s25 = sphi %s5991_s25, %s16_s25   ;;  %s5939_s24 = sphi %s5989_s24, %s8494_s24   ;;  %s5935_s23 = sphi %s5987_s23, %s8493_s23   ;;  %s5931_s22 = sphi %s5985_s22, %s8492_s22   ;;  %s5927_s21 = sphi %s5983_s21, %s8491_s21  }
   0x4   : > { %p26_p0 = scmp.ge.s32.totalorder %s25_s26, 2  ;;  %p5184_p1 = scmp.ge.s32.totalorder %s5943_s25, 1 }
   0x5   : > { %p252_p2 = scmp.lt.s32.totalorder %s5943_s25, 5 }
   0x6   : > { %s8496_s26 = smov (%p26_p0, %s25_s26), 0  ;;  %s8498_s27 = smov (!%p26_p0, %s28_s27), %s5939_s24 }
   0x7   : > { %p253_p3 = pnand %p5184_p1, %p252_p2  ;;  %p30_p4 = scmp.ge.s32.totalorder %s8498_s27, 2 }
   0x9   : > { %s8500_s27 = smov (%p30_p4, %s8498_s27), 0  ;;  %256 = sbr.rel (%p253_p3) target bundleno = 1585 (0x631), region = 44 }
   0xe   : > { %v381_v0 = vld [vmem:[%s8306_s2] sm:$0xff]  ;;  %vm484_vm0 = vcmask 1043456   ;;  %s5185_s30 = sshll.u32 %s5931_s22, 1  ;;  %s5189_s7 = sshll.u32 %s5927_s21, 3  ;;  %vm343_vm1 = vcmask 31744   ;;  %v5235_v8 = vld [vmem:[%s8306_s2 + $0x8] sm:$0xff] }
   0xf   : > { %v423_v1 = vrot.slane %v381_v0, 4  ;;  %s297_s8 = sadd.s32 %s5927_s21, %s5185_s30  ;;  %p315_p5 = scmp.lt.s32.totalorder %s5931_s22, 1  ;;  %v746_v10 = vrot.slane %v5235_v8, 4  ;;  %5857 = vmatpush.msk.msra.mxu3 %vm484_vm0, %v5235_v8  ;;  %vm346_vm2 = vcmask 25600   ;;  %v6203_v55 = vld [vmem:[%s8306_s2 + $0x10] sm:$0xff]  ;;  %vm1387_vm3 = vcmask 64512  }
  0x10   : > { %p298_p6 = scmp.lt.s32.totalorder %s297_s8, 3  ;;  %p317_p7 = scmp.lt.s32.totalorder %s5189_s7, 15  ;;  %v1088_v58 = vrot.slane %v6203_v55, 4  ;;  %vm3628_vm4 = vcmask 57344  }
  0x11   : > { %5855 = vmatpush.msk.msra.mxu1 %vm484_vm0, %v423_v1  ;;  %s8502_s22 = smov (!%p315_p5, %s5931_s22), 1  ;;  %5193 = vmatpush.msk.msra.mxu0 %vm484_vm0, %v423_v1  ;;  %p5699_p8 = scmp.ne.s32.totalorder %s5927_s21, 0 }
  0x12   : > { %s8504_s8 = smov (!%p298_p6, %s297_s8), 3  ;;  %s8506_s7 = smov (!%p317_p7, %s5189_s7), 15  ;;  %5856 = vmatpush.msk.msra.mxu2 %vm484_vm0, %v746_v10 }
  0x13   : > { %5214 = vmatpush.msk.msrb.mxu1 %vm484_vm0, %v381_v0  ;;  %s5859_s9 = smul.u32 288, %s8504_s8  ;;  %s5191_s10 = sshll.u32 %s8502_s22, 5  ;;  %5279 = vmatpush.msk.msrb.mxu0 %vm484_vm0, %v1088_v58 }
  0x14   : > { %s5190_s11 = sshll.u32 %s8506_s7, 1  ;;  %s5858_s20 = smul.u32 144, %s8504_s8 }
  0x15   : > { %s6026_s14 = scalar_lea.vmem %s8305_s1, %s5859_s9  ;;  %s321_s15 = sadd.s32 %s5191_s10, %s5190_s11 }
  0x16   : > { %v6029_v2 = vld [vmem:[%s6026_s14 + $0xa8] sm:$0xff]  ;;  %s5192_s16 = sshll.u32 %s321_s15, 3  ;;  %s6041_s29 = scalar_lea.vmem %s8304_s0, %s5858_s20  ;;  %v6044_v3 = vld [vmem:[%s6026_s14 + $0xb0] sm:$0xff]  ;;  %v402_v5 = vld [vmem:[%s6026_s14] sm:$0xff] }
  0x17   : > { %5208 = vmatmul.msk.f32.vlgmr.msra.gmra.mxu1 %vm343_vm1, %v6029_v2  ;;  %s6036_s19 = scalar_lea.vmem %s8310_s6, %s5192_s16  ;;  %v325_v4 = vld [vmem:[%s6041_s29] sm:$0xff]  ;;  %5194 = vmatmul.msk.f32.vlgmr.msra.gmra.mxu0 %vm343_vm1, %v402_v5  ;;  %v326_v7 = vld [vmem:[%s6041_s29 + $0x8] sm:$0xff]  ;;  %v6076_v14 = vld [vmem:[%s6026_s14 + $0x18] sm:$0xff] }
  0x18   : > { %344 = vst.msk [vmem:[#allocation2] sm:$0xff] %vm343_vm1, %v325_v4  ;;  %v6054_v6 = vld [vmem:[%s6026_s14 + $0xc0] sm:$0xff]  ;;  %v403_v9 = vld [vmem:[%s6026_s14 + $0x8] sm:$0xff]  ;;  %5236 = vmatpush.msk.msra.mxu1 %vm484_vm0, %v746_v10  ;;  %v327_v15 = vld [vmem:[%s6041_s29 + $0x10] sm:$0x3] }
  0x19   : > { %348 = vst.msk [vmem:[#allocation2 + $0x18] sm:$0xff] %vm343_vm1, %v325_v4  ;;  %v6070_v11 = vld [vmem:[%s6026_s14 + $0xc8] sm:$0xff]  ;;  %v727_v12 = vld [vmem:[%s6026_s14 + $0x19] sm:$0xff]  ;;  %v729_v23 = vld [vmem:[%s6026_s14 + $0x31] sm:$0xff] }
  0x1a   : > { %345 = vst.msk [vmem:[#allocation2 + $0x8] sm:$0xff] %vm343_vm1, %v326_v7  ;;  %5239 = vmatmul.msk.f32.vlgmr.msra.gmra.mxu2 %vm343_vm1, %v727_v12  ;;  %v6086_v16 = vld [vmem:[%s6026_s14 + $0xd8] sm:$0xff]  ;;  %v728_v17 = vld [vmem:[%s6026_s14 + $0x21] sm:$0xff]  ;;  %v6111_v24 = vld [vmem:[%s6026_s14 + $0x30] sm:$0xff] }
  0x1b   : > { %349 = vst.msk [vmem:[#allocation2 + $0x20] sm:$0xff] %vm343_vm1, %v326_v7  ;;  %v6092_v18 = vld [vmem:[%s6026_s14 + $0x20] sm:$0xff]  ;;  %v328_v20 = vld [vmem:[%s6041_s29 + $0x18] sm:$0xff]  ;;  %v330_v25 = vld [vmem:[%s6041_s29 + $0x28] sm:$0x3] }
  0x1c   : > { %350 = vst.msk [vmem:[#allocation2 + $0x28] sm:$0x3] %vm346_vm2, %v327_v15  ;;  %v329_v21 = vld [vmem:[%s6041_s29 + $0x20] sm:$0xff]  ;;  %v6123_v29 = vld [vmem:[%s6026_s14 + $0x38] sm:$0xff]  ;;  %v731_v32 = vld [vmem:[%s6026_s14 + $0x49] sm:$0xff] }
  0x1d   : > { %347 = vst.msk [vmem:[#allocation2 + $0x10] sm:$0x3] %vm346_vm2, %v327_v15  ;;  %v6104_v22 = vld [vmem:[%s6026_s14 + $0xe0] sm:$0xff]  ;;  %v6133_v34 = vld [vmem:[%s6026_s14 + $0x48] sm:$0xff]  ;;  %v732_v36 = vld [vmem:[%s6026_s14 + $0x51] sm:$0xff] }
  0x1e   : > { %351 = vst.msk [vmem:[#allocation2 + $0x30] sm:$0xff] %vm343_vm1, %v328_v20  ;;  %v730_v28 = vld [vmem:[%s6026_s14 + $0x39] sm:$0xff]  ;;  %v6145_v38 = vld [vmem:[%s6026_s14 + $0x50] sm:$0xff]  ;;  %v733_v42 = vld [vmem:[%s6026_s14 + $0x61] sm:$0xff] }
  0x1f   : > { %5209 = vmatmul.msk.f32.gmra.mxu1 %vm343_vm1, %v6044_v3  ;;  %5195 = vmatmul.msk.f32.gmra.mxu0 %vm343_vm1, %v403_v9  ;;  %352 = vst.msk [vmem:[#allocation2 + $0x38] sm:$0xff] %vm343_vm1, %v329_v21  ;;  %v382_v27 = vld [vmem:[#allocation2] sm:$0xff]  ;;  %v331_v39 = vld [vmem:[%s6041_s29 + $0x30] sm:$0xff]  ;;  %v332_v40 = vld [vmem:[%s6041_s29 + $0x38] sm:$0xff] }
  0x20   : > { %354 = vst.msk [vmem:[#allocation2 + $0x48] sm:$0xff] %vm343_vm1, %v328_v20  ;;  %v6139_v35 = vld [vmem:[#allocation2 + $0x18] sm:$0xff]  ;;  %v6163_v43 = vld [vmem:[%s6026_s14 + $0x60] sm:$0xff]  ;;  %v734_v47 = vld [vmem:[%s6026_s14 + $0x69] sm:$0xff] }
  0x21   : > { %355 = vst.msk [vmem:[#allocation2 + $0x50] sm:$0xff] %vm343_vm1, %v329_v21  ;;  %v383_v31 = vld [vmem:[#allocation2 + $0x8] sm:$0xff]  ;;  %v333_v44 = vld [vmem:[%s6041_s29 + $0x40] sm:$0x3]  ;;  %v6194_v54 = vld [vmem:[%s6026_s14 + $0x78] sm:$0xff] }
  0x22   : > { %v707_v13 = vld [vmem:[#allocation2 + $0x19] sm:$0xff]  ;;  %5240 = vmatmul.msk.f32.gmra.mxu2 %vm343_vm1, %v728_v17  ;;  %353 = vst.msk [vmem:[#allocation2 + $0x40] sm:$0x3] %vm346_vm2, %v330_v25  ;;  %v6178_v48 = vld [vmem:[%s6026_s14 + $0x68] sm:$0xff]  ;;  %v335_v60 = vld [vmem:[%s6041_s29 + $0x50] sm:$0xff] }
  0x23   : > { %5260 = vmatmul.msk.f32.vlgmr.msra.gmra.mxu3 %vm343_vm1, %v707_v13  ;;  %v708_v19 = vld [vmem:[#allocation2 + $0x21] sm:$0xff]  ;;  %356 = vst.msk [vmem:[#allocation2 + $0x58] sm:$0x3] %vm346_vm2, %v330_v25  ;;  %v735_v51 = vld [vmem:[%s6026_s14 + $0x79] sm:$0xff]  ;;  %v737_v63 = vld [vmem:[%s6026_s14 + $0x91] sm:$0xff] }
  0x24   : > { %357 = vst.msk [vmem:[#allocation2 + $0x60] sm:$0xff] %vm343_vm1, %v331_v39  ;;  %v6156_v41 = vld [vmem:[#allocation2 + $0x20] sm:$0xff]  ;;  %v334_v59 = vld [vmem:[%s6041_s29 + $0x48] sm:$0xff]  ;;  %v336_v0 = vld [vmem:[%s6041_s29 + $0x58] sm:$0x3] }
  0x25   : > { %358 = vst.msk [vmem:[#allocation2 + $0x68] sm:$0xff] %vm343_vm1, %v332_v40  ;;  %v6172_v46 = vld [vmem:[#allocation2 + $0x30] sm:$0xff]  ;;  %v736_v56 = vld [vmem:[%s6026_s14 + $0x81] sm:$0xff]  ;;  %v738_v7 = vld [vmem:[%s6026_s14 + $0x99] sm:$0xff] }
  0x26   : > { %v709_v26 = vld [vmem:[#allocation2 + $0x31] sm:$0xff]  ;;  %360 = vst.msk [vmem:[#allocation2 + $0x78] sm:$0xff] %vm343_vm1, %v331_v39  ;;  %v6218_v62 = vld [vmem:[%s6026_s14 + $0x80] sm:$0xff]  ;;  %v739_v12 = vld [vmem:[%s6026_s14 + $0xa9] sm:$0xff] }
  0x27   : > { %5210 = vmatmul.msk.f32.gmra.mxu1 %vm343_vm1, %v6054_v6  ;;  %5196 = vmatmul.msk.f32.gmra.mxu0 %vm343_vm1, %v6076_v14  ;;  %361 = vst.msk [vmem:[#allocation2 + $0x80] sm:$0xff] %vm343_vm1, %v332_v40  ;;  %v6184_v50 = vld [vmem:[#allocation2 + $0x38] sm:$0xff]  ;;  %v6191_v53 = vld [vmem:[#allocation2 + $0x48] sm:$0xff]  ;;  %v6234_v5 = vld [vmem:[%s6026_s14 + $0x90] sm:$0xff] }
  0x28   : > { %v711_v33 = vld [vmem:[#allocation2 + $0x49] sm:$0xff]  ;;  %359 = vst.msk [vmem:[#allocation2 + $0x70] sm:$0x3] %vm346_vm2, %v333_v44  ;;  %v6246_v10 = vld [vmem:[%s6026_s14 + $0x98] sm:$0xff]  ;;  %v337_v21 = vld [vmem:[%s6041_s29 + $0x60] sm:$0xff] }
  0x29   : > { %v710_v30 = vld [vmem:[#allocation2 + $0x39] sm:$0xff]  ;;  %362 = vst.msk [vmem:[#allocation2 + $0x88] sm:$0x3] %vm346_vm2, %v333_v44  ;;  %v6215_v61 = vld [vmem:[#allocation2 + $0x50] sm:$0xff] }
  0x2a   : > { %5241 = vmatmul.msk.f32.gmra.mxu2 %vm343_vm1, %v729_v23  ;;  %v712_v37 = vld [vmem:[#allocation2 + $0x51] sm:$0xff]  ;;  %363 = vst.msk [vmem:[#allocation2 + $0x90] sm:$0xff] %vm343_vm1, %v334_v59  ;;  %v338_v23 = vld [vmem:[%s6041_s29 + $0x68] sm:$0xff]  ;;  %v743_v40 = vld [vmem:[%s6026_s14 + $0xd9] sm:$0xff] }
  0x2b   : > { %5261 = vmatmul.msk.f32.gmra.mxu3 %vm343_vm1, %v708_v19  ;;  %364 = vst.msk [vmem:[#allocation2 + $0x98] sm:$0xff] %vm343_vm1, %v335_v60  ;;  %v6231_v4 = vld [vmem:[#allocation2 + $0x60] sm:$0xff]  ;;  %v740_v19 = vld [vmem:[%s6026_s14 + $0xb1] sm:$0xff] }
  0x2c   : > { %v713_v45 = vld [vmem:[#allocation2 + $0x61] sm:$0xff]  ;;  %366 = vst.msk [vmem:[#allocation2 + $0xa8] sm:$0xff] %vm343_vm1, %v334_v59 }
  0x2d   : > { %367 = vst.msk [vmem:[#allocation2 + $0xb0] sm:$0xff] %vm343_vm1, %v335_v60  ;;  %v6243_v9 = vld [vmem:[#allocation2 + $0x68] sm:$0xff]  ;;  %v6257_v17 = vld [vmem:[#allocation2 + $0x78] sm:$0xff] }
  0x2e   : > { %v715_v52 = vld [vmem:[#allocation2 + $0x79] sm:$0xff]  ;;  %365 = vst.msk [vmem:[#allocation2 + $0xa0] sm:$0x3] %vm346_vm2, %v336_v0 }
  0x2f   : > { %5211 = vmatmul.msk.f32.gmra.mxu1 %vm343_vm1, %v6070_v11  ;;  %5197 = vmatmul.msk.f32.gmra.mxu0 %vm343_vm1, %v6092_v18  ;;  %v714_v49 = vld [vmem:[#allocation2 + $0x69] sm:$0xff]  ;;  %368 = vst.msk [vmem:[#allocation2 + $0xb8] sm:$0x3] %vm346_vm2, %v336_v0 }
  0x30   : > { %v716_v57 = vld [vmem:[#allocation2 + $0x81] sm:$0xff]  ;;  %369 = vst.msk [vmem:[#allocation2 + $0xc0] sm:$0xff] %vm343_vm1, %v337_v21 }
  0x31   : > { %370 = vst.msk [vmem:[#allocation2 + $0xc8] sm:$0xff] %vm343_vm1, %v338_v23 }
  0x32   : > { %5242 = vmatmul.msk.f32.gmra.mxu2 %vm343_vm1, %v730_v28  ;;  %v717_v1 = vld [vmem:[#allocation2 + $0x91] sm:$0xff]  ;;  %372 = vst.msk [vmem:[#allocation2 + $0xd8] sm:$0xff] %vm343_vm1, %v337_v21 }
  0x33   : > { %5262 = vmatmul.msk.f32.gmra.mxu3 %vm343_vm1, %v709_v26  ;;  %v6271_v26 = vld [vmem:[#allocation2 + $0x80] sm:$0xff]  ;;  %373 = vst.msk [vmem:[#allocation2 + $0xe0] sm:$0xff] %vm343_vm1, %v338_v23  ;;  %v339_v28 = vld [vmem:[%s6041_s29 + $0x70] sm:$0x3]  ;;  %v6293_v39 = vld [vmem:[#allocation2 + $0x98] sm:$0xff] }
  0x34   : > { %v719_v13 = vld [vmem:[#allocation2 + $0xa9] sm:$0xff]  ;;  %371 = vst.msk [vmem:[#allocation2 + $0xd0] sm:$0x3] %vm346_vm2, %v339_v28 }
  0x35   : > { %374 = vst.msk [vmem:[#allocation2 + $0xe8] sm:$0x3] %vm346_vm2, %v339_v28 }
  0x36   : > { %v720_v20 = vld [vmem:[#allocation2 + $0xb1] sm:$0xff] }
  0x37   : > { %5212 = vmatmul.msk.f32.gmra.mxu1 %vm343_vm1, %v6086_v16  ;;  %5198 = vmatmul.msk.f32.gmra.mxu0 %vm343_vm1, %v6111_v24 }
  0x3a   : > { %5243 = vmatmul.msk.f32.gmra.mxu2 %vm343_vm1, %v731_v32  ;;  %v6284_v32 = vld [vmem:[#allocation2 + $0x90] sm:$0xff] }
  0x3b   : > { %5263 = vmatmul.msk.f32.gmra.mxu3 %vm343_vm1, %v710_v30  ;;  %v721_v30 = vld [vmem:[#allocation2 + $0xc1] sm:$0xff] }
  0x3f   : > { %5213 = vmatmul.msk.f32.gmra.mxu1 %vm343_vm1, %v6104_v22  ;;  %5199 = vmatmul.msk.f32.gmra.mxu0 %vm343_vm1, %v6123_v29 }
  0x42   : > { %5244 = vmatmul.msk.f32.gmra.mxu2 %vm343_vm1, %v732_v36  ;;  %v722_v36 = vld [vmem:[#allocation2 + $0xc9] sm:$0xff] }
  0x43   : > { %5264 = vmatmul.msk.f32.gmra.mxu3 %vm343_vm1, %v711_v33  ;;  %v742_v33 = vld [vmem:[%s6026_s14 + $0xc9] sm:$0xff] }
  0x47   : > { %5215 = vmatmul.msk.f32.vlgmr.msrb.gmra.mxu1 %vm343_vm1, %v382_v27  ;;  %5200 = vmatmul.msk.f32.gmra.mxu0 %vm343_vm1, %v6133_v34  ;;  %v741_v27 = vld [vmem:[%s6026_s14 + $0xc1] sm:$0xff] }
  0x48   : > { %5257 = vmatpush.msk.msrb.mxu1 %vm484_vm0, %v5235_v8  ;;  %v718_v8 = vld [vmem:[#allocation2 + $0x99] sm:$0xff] }
  0x4a   : > { %5245 = vmatmul.msk.f32.gmra.mxu2 %vm343_vm1, %v733_v42  ;;  %v723_v42 = vld [vmem:[#allocation2 + $0xd9] sm:$0xff] }
  0x4b   : > { %5265 = vmatmul.msk.f32.gmra.mxu3 %vm343_vm1, %v712_v37 }
  0x4f   : > { %5216 = vmatmul.msk.f32.gmra.mxu1 %vm343_vm1, %v383_v31  ;;  %5201 = vmatmul.msk.f32.gmra.mxu0 %vm343_vm1, %v6145_v38 }
  0x52   : > { %5246 = vmatmul.msk.f32.gmra.mxu2 %vm343_vm1, %v734_v47 }
  0x53   : > { %5266 = vmatmul.msk.f32.gmra.mxu3 %vm343_vm1, %v713_v45  ;;  %v6302_v45 = vld [vmem:[#allocation2 + $0xa8] sm:$0xff] }
  0x57   : > { %5217 = vmatmul.msk.f32.gmra.mxu1 %vm343_vm1, %v6139_v35  ;;  %5202 = vmatmul.msk.f32.gmra.mxu0 %vm343_vm1, %v6163_v43 }
  0x5a   : > { %5247 = vmatmul.msk.f32.gmra.mxu2 %vm343_vm1, %v735_v51  ;;  %v744_v51 = vld [vmem:[%s6026_s14 + $0xe1] sm:$0xff] }
  0x5b   : > { %5267 = vmatmul.msk.f32.gmra.mxu3 %vm343_vm1, %v714_v49 }
  0x5f   : > { %5218 = vmatmul.msk.f32.gmra.mxu1 %vm343_vm1, %v6156_v41  ;;  %5203 = vmatmul.msk.f32.gmra.mxu0 %vm343_vm1, %v6178_v48 }
  0x62   : > { %5248 = vmatmul.msk.f32.gmra.mxu2 %vm343_vm1, %v736_v56 }
  0x63   : > { %5268 = vmatmul.msk.f32.gmra.mxu3 %vm343_vm1, %v715_v52  ;;  %v724_v52 = vld [vmem:[#allocation2 + $0xe1] sm:$0xff] }
  0x67   : > { %5219 = vmatmul.msk.f32.gmra.mxu1 %vm343_vm1, %v6172_v46  ;;  %5204 = vmatmul.msk.f32.gmra.mxu0 %vm343_vm1, %v6194_v54 }
  0x6a   : > { %5249 = vmatmul.msk.f32.gmra.mxu2 %vm343_vm1, %v737_v63  ;;  %v6325_v63 = vld [vmem:[#allocation2 + $0xc0] sm:$0xff] }
  0x6b   : > { %5269 = vmatmul.msk.f32.gmra.mxu3 %vm343_vm1, %v716_v57  ;;  %v6315_v57 = vld [vmem:[#allocation2 + $0xb0] sm:$0xff] }
  0x6f   : > { %5220 = vmatmul.msk.f32.gmra.mxu1 %vm343_vm1, %v6184_v50  ;;  %5205 = vmatmul.msk.f32.gmra.mxu0 %vm343_vm1, %v6218_v62 }
  0x72   : > { %5250 = vmatmul.msk.f32.gmra.mxu2 %vm343_vm1, %v738_v7 }
  0x73   : > { %5270 = vmatmul.msk.f32.gmra.mxu3 %vm343_vm1, %v717_v1 }
  0x77   : > { %5221 = vmatmul.msk.f32.gmra.mxu1 %vm343_vm1, %v6191_v53  ;;  %5206 = vmatmul.msk.f32.gmra.mxu0 %vm343_vm1, %v6234_v5 }
  0x7a   : > { %5251 = vmatmul.msk.f32.gmra.mxu2 %vm343_vm1, %v739_v12 }
  0x7b   : > { %5271 = vmatmul.msk.f32.gmra.mxu3 %vm343_vm1, %v718_v8  ;;  %v6335_v8 = vld [vmem:[#allocation2 + $0xc8] sm:$0xff] }
  0x7f   : > { %5222 = vmatmul.msk.f32.gmra.mxu1 %vm343_vm1, %v6215_v61  ;;  %5207 = vmatmul.msk.f32.gmra.mxu0 %vm343_vm1, %v6246_v10 }
  0x82   : > { %5252 = vmatmul.msk.f32.gmra.mxu2 %vm343_vm1, %v740_v19 }
  0x83   : > { %5272 = vmatmul.msk.f32.gmra.mxu3 %vm343_vm1, %v719_v13 }
  0x87   : > { %5223 = vmatmul.msk.f32.gmra.mxu1 %vm343_vm1, %v6231_v4 }
  0x8a   : > { %5253 = vmatmul.msk.f32.gmra.mxu2 %vm343_vm1, %v741_v27 }
  0x8b   : > { %5273 = vmatmul.msk.f32.gmra.mxu3 %vm343_vm1, %v720_v20  ;;  %v6345_v20 = vld [vmem:[#allocation2 + $0xd8] sm:$0xff] }
  0x8f   : > { %5224 = vmatmul.msk.f32.gmra.mxu1 %vm343_vm1, %v6243_v9 }
  0x92   : > { %5254 = vmatmul.msk.f32.gmra.mxu2 %vm343_vm1, %v742_v33  ;;  %v5321_v33 = vld [vmem:[%s8306_s2 + $0x18] sm:$0xff] }
  0x93   : > { %5274 = vmatmul.msk.f32.gmra.mxu3 %vm343_vm1, %v721_v30  ;;  %v6357_v30 = vld [vmem:[#allocation2 + $0xe0] sm:$0xff] }
  0x94   : > { %v6255_v15 = vpop.f32.mrf.mxu1  ;;  %v6349_v21 = vpop.f32.mrf.mxu0  ;;  %5363 = vmatpush.msk.msrb.mxu3 %vm484_vm0, %v5321_v33 }
  0x95   : > { %8331 = vst [vmem:[#allocation5_spill] sm:$0xff] %v6255_v15  ;;  %v1047_v15 = vld [vmem:[#allocation2 + $0x2] sm:$0xff] }
  0x97   : > { %5225 = vmatmul.msk.f32.gmra.mxu1 %vm343_vm1, %v6257_v17 }
  0x9a   : > { %5255 = vmatmul.msk.f32.gmra.mxu2 %vm343_vm1, %v743_v40 }
  0x9b   : > { %5275 = vmatmul.msk.f32.gmra.mxu3 %vm343_vm1, %v722_v36  ;;  %v1453_v36 = vrot.slane %v5321_v33, 4 }
  0x9c   : > { %v6269_v25 = vpop.f32.mrf.mxu1  ;;  %v6370_v40 = vpop.f32.mrf.mxu0 }
  0x9d   : > { %8332 = vst [vmem:[#allocation6_spill] sm:$0xff] %v6269_v25  ;;  %v6304_v47 = vpop.f32.mrf.mxu2  ;;  %5342 = vmatpush.msk.msrb.mxu2 %vm484_vm0, %v1453_v36 }
  0x9f   : > { %5226 = vmatmul.msk.f32.gmra.mxu1 %vm343_vm1, %v6271_v26 }
  0xa2   : > { %5256 = vmatmul.msk.f32.gmra.mxu2 %vm343_vm1, %v744_v51  ;;  %v725_v51 = vld [vmem:[%s6026_s14 + $0x1] sm:$0xff] }
  0xa3   : > { %5276 = vmatmul.msk.f32.gmra.mxu3 %vm343_vm1, %v723_v42 }
  0xa4   : > { %v6282_v31 = vpop.f32.mrf.mxu1 }
  0xa5   : > { %8333 = vst [vmem:[#allocation7_spill] sm:$0xff] %v6282_v31  ;;  %v6317_v58 = vpop.f32.mrf.mxu2  ;;  %v6430_v31 = vld [vmem:[%s6026_s14 + $0x22] sm:$0xff] }
  0xa6   : > { %v6306_v49 = vpop.f32.mrf.mxu3 }
  0xa7   : > { %5227 = vmatmul.msk.f32.gmra.mxu1 %vm343_vm1, %v6284_v32 }
  0xaa   : > { %5343 = vmatmul.msk.f32.vlgmr.msrb.gmra.mxu2 %vm343_vm1, %v6076_v14  ;;  %v5384_v14 = vld [vmem:[%s8306_s2 + $0x20] sm:$0xff] }
  0xab   : > { %5277 = vmatmul.msk.f32.gmra.mxu3 %vm343_vm1, %v724_v52 }
  0xac   : > { %v6291_v37 = vpop.f32.mrf.mxu1 }
  0xad   : > { %8334 = vst [vmem:[#allocation8_spill] sm:$0xff] %v6291_v37  ;;  %v6329_v0 = vpop.f32.mrf.mxu2 }
  0xae   : > { %v6319_v59 = vpop.f32.mrf.mxu3 }
  0xaf   : > { %5228 = vmatmul.msk.f32.gmra.mxu1 %vm343_vm1, %v6293_v39 }
  0xb2   : > { %5344 = vmatmul.msk.f32.gmra.mxu2 %vm343_vm1, %v6092_v18 }
  0xb3   : > { %5364 = vmatmul.msk.f32.vlgmr.msrb.gmra.mxu3 %vm343_vm1, %v6139_v35  ;;  %v1775_v35 = vrot.slane %v5384_v14, 4 }
  0xb4   : > { %v6300_v44 = vpop.f32.mrf.mxu1 }
  0xb5   : > { %8335 = vst [vmem:[#allocation9_spill] sm:$0xff] %v6300_v44  ;;  %v6339_v12 = vpop.f32.mrf.mxu2  ;;  %5405 = vmatpush.msk.msra.mxu0 %vm484_vm0, %v1775_v35  ;;  %v1068_v44 = vld [vmem:[%s6026_s14 + $0xa] sm:$0xff]  ;;  %v6411_v35 = vld [vmem:[%s6026_s14 + $0x1a] sm:$0xff] }
  0xb6   : > { %v6331_v1 = vpop.f32.mrf.mxu3 }
  0xb7   : > { %5229 = vmatmul.msk.f32.gmra.mxu1 %vm343_vm1, %v6302_v45 }
  0xba   : > { %5345 = vmatmul.msk.f32.gmra.mxu2 %vm343_vm1, %v6111_v24 }
  0xbb   : > { %5365 = vmatmul.msk.f32.gmra.mxu3 %vm343_vm1, %v6156_v41  ;;  %v705_v41 = vld [vmem:[#allocation2 + $0x1] sm:$0xff] }
  0xbc   : > { %v6313_v56 = vpop.f32.mrf.mxu1 }
  0xbd   : > { %8336 = vst [vmem:[#allocation10_spill] sm:$0xff] %v6313_v56  ;;  %v6351_v23 = vpop.f32.mrf.mxu2  ;;  %v1067_v56 = vld [vmem:[%s6026_s14 + $0x2] sm:$0xff] }
  0xbe   : > { %v6341_v13 = vpop.f32.mrf.mxu3  ;;  %5280 = vmatmul.msk.f32.vlgmr.msrb.gmra.mxu0 %vm343_vm1, %v1067_v56  ;;  %v726_v56 = vld [vmem:[%s6026_s14 + $0x9] sm:$0xff] }
  0xbf   : > { %5230 = vmatmul.msk.f32.gmra.mxu1 %vm343_vm1, %v6315_v57 }
  0xc2   : > { %5346 = vmatmul.msk.f32.gmra.mxu2 %vm343_vm1, %v6123_v29 }
  0xc3   : > { %5366 = vmatmul.msk.f32.gmra.mxu3 %vm343_vm1, %v6172_v46 }
  0xc4   : > { %v6323_v60 = vpop.f32.mrf.mxu1 }
  0xc5   : > { %v6375_v52 = vpop.f32.mrf.mxu2 }
  0xc6   : > { %v6353_v27 = vpop.f32.mrf.mxu3  ;;  %5281 = vmatmul.msk.f32.gmra.mxu0 %vm343_vm1, %v1068_v44 }
  0xc7   : > { %5231 = vmatmul.msk.f32.gmra.mxu1 %vm343_vm1, %v6325_v63 }
  0xca   : > { %5347 = vmatmul.msk.f32.gmra.mxu2 %vm343_vm1, %v6133_v34 }
  0xcb   : > { %5367 = vmatmul.msk.f32.gmra.mxu3 %vm343_vm1, %v6184_v50 }
  0xcc   : > { %v6333_v7 = vpop.f32.mrf.mxu1 }
  0xcd   : > { %v6399_v37 = vpop.f32.mrf.mxu2 }
  0xce   : > { %v6377_v33 = vpop.f32.mrf.mxu3  ;;  %8337 = vst [vmem:[#allocation11_spill] sm:$0xff] %v6399_v37  ;;  %5282 = vmatmul.msk.f32.gmra.mxu0 %vm343_vm1, %v6411_v35  ;;  %v6564_v37 = vld [vmem:[%s6026_s14 + $0x7a] sm:$0xff] }
  0xcf   : > { %5232 = vmatmul.msk.f32.gmra.mxu1 %vm343_vm1, %v6335_v8  ;;  %8361 = vst [vmem:[#allocation35_spill] sm:$0xff] %v6564_v37 }
  0xd2   : > { %5348 = vmatmul.msk.f32.gmra.mxu2 %vm343_vm1, %v6145_v38 }
  0xd3   : > { %5368 = vmatmul.msk.f32.gmra.mxu3 %vm343_vm1, %v6191_v53 }
  0xd4   : > { %v6343_v19 = vpop.f32.mrf.mxu1 }
  0xd5   : > { %v6421_v46 = vpop.f32.mrf.mxu2 }
  0xd6   : > { %8339 = vst [vmem:[#allocation13_spill] sm:$0xff] %v6421_v46  ;;  %5283 = vmatmul.msk.f32.gmra.mxu0 %vm343_vm1, %v6430_v31 }
  0xd7   : > { %5233 = vmatmul.msk.f32.gmra.mxu1 %vm343_vm1, %v6345_v20 }
  0xda   : > { %5349 = vmatmul.msk.f32.gmra.mxu2 %vm343_vm1, %v6163_v43 }
  0xdb   : > { %5369 = vmatmul.msk.f32.gmra.mxu3 %vm343_vm1, %v6215_v61  ;;  %v6477_v61 = vld [vmem:[#allocation2 + $0x1a] sm:$0xff] }
  0xdc   : > { %v6355_v28 = vpop.f32.mrf.mxu1 }
  0xdd   : > { %v6441_v29 = vpop.f32.mrf.mxu2 }
  0xde   : > { %8341 = vst [vmem:[#allocation15_spill] sm:$0xff] %v6441_v29 }
  0xdf   : > { %5234 = vmatmul.msk.f32.gmra.mxu1 %vm343_vm1, %v6357_v30 }
  0xe2   : > { %5350 = vmatmul.msk.f32.gmra.mxu2 %vm343_vm1, %v6178_v48 }
  0xe3   : > { %5370 = vmatmul.msk.f32.gmra.mxu3 %vm343_vm1, %v6231_v4  ;;  %v6498_v4 = vld [vmem:[#allocation2 + $0x22] sm:$0xff] }
  0xe4   : > { %v6372_v42 = vpop.f32.mrf.mxu1 }
  0xe5   : > { %v6461_v29 = vpop.f32.mrf.mxu2 }
  0xe6   : > { %8345 = vst [vmem:[#allocation19_spill] sm:$0xff] %v6461_v29 }
  0xe7   : > { %5237 = vmatmul.msk.f32.vlgmr.msra.gmra.mxu1 %vm343_vm1, %v725_v51  ;;  %v6395_v51 = vpop.f32.mrf.mxu0 }
  0xe8   : > { %5300 = vmatpush.msk.msra.mxu1 %vm484_vm0, %v6203_v55  ;;  %v6401_v55 = vpop.f32.mrf.mxu3 }
  0xe9   : > { %8338 = vst [vmem:[#allocation12_spill] sm:$0xff] %v6401_v55  ;;  %v6543_v55 = vld [vmem:[%s6026_s14 + $0x6a] sm:$0xff] }
  0xea   : > { %5351 = vmatmul.msk.f32.gmra.mxu2 %vm343_vm1, %v6194_v54 }
  0xeb   : > { %5371 = vmatmul.msk.f32.gmra.mxu3 %vm343_vm1, %v6243_v9 }
  0xec   : > { %v6392_v36 = vpop.f32.mrf.mxu1 }
  0xef   : > { %5238 = vmatmul.msk.f32.gmra.mxu1 %vm343_vm1, %v726_v56  ;;  %v6416_v56 = vpop.f32.mrf.mxu0 }
  0xf0   : > { %v6423_v24 = vpop.f32.mrf.mxu3 }
  0xf1   : > { %8340 = vst [vmem:[#allocation14_spill] sm:$0xff] %v6423_v24 }
  0xf2   : > { %5352 = vmatmul.msk.f32.gmra.mxu2 %vm343_vm1, %v6218_v62 }
  0xf3   : > { %5372 = vmatmul.msk.f32.gmra.mxu3 %vm343_vm1, %v6257_v17 }
  0xf4   : > { %v6408_v18 = vpop.f32.mrf.mxu1 }
  0xf7   : > { %5258 = vmatmul.msk.f32.vlgmr.msrb.gmra.mxu1 %vm343_vm1, %v705_v41  ;;  %v706_v41 = vld [vmem:[#allocation2 + $0x9] sm:$0xff]  ;;  %v6439_v50 = vpop.f32.mrf.mxu0 }
  0xf8   : > { %5426 = vmatpush.msk.msrb.mxu1 %vm484_vm0, %v5384_v14  ;;  %v6443_v14 = vpop.f32.mrf.mxu3 }
  0xf9   : > { %8342 = vst [vmem:[#allocation16_spill] sm:$0xff] %v6443_v14  ;;  %v1048_v14 = vld [vmem:[#allocation2 + $0xa] sm:$0xff] }
  0xfa   : > { %5353 = vmatmul.msk.f32.gmra.mxu2 %vm343_vm1, %v6234_v5 }
  0xfb   : > { %5373 = vmatmul.msk.f32.gmra.mxu3 %vm343_vm1, %v6271_v26 }
  0xfc   : > { %v6427_v44 = vpop.f32.mrf.mxu1 }
  0xff   : > { %5259 = vmatmul.msk.f32.gmra.mxu1 %vm343_vm1, %v706_v41  ;;  %v6448_v41 = vld [vmem:[%s6026_s14 + $0x32] sm:$0xff]  ;;  %v6457_v34 = vpop.f32.mrf.mxu0 }
 0x100   : > { %5284 = vmatmul.msk.f32.gmra.mxu0 %vm343_vm1, %v6448_v41  ;;  %v6463_v24 = vpop.f32.mrf.mxu3 }
 0x101   : > { %8346 = vst [vmem:[#allocation20_spill] sm:$0xff] %v6463_v24  ;;  %v6482_v24 = vld [vmem:[%s6026_s14 + $0x4a] sm:$0xff] }
 0x102   : > { %5354 = vmatmul.msk.f32.gmra.mxu2 %vm343_vm1, %v6246_v10 }
 0x103   : > { %5374 = vmatmul.msk.f32.gmra.mxu3 %vm343_vm1, %v6284_v32  ;;  %v6576_v32 = vld [vmem:[#allocation2 + $0x52] sm:$0xff] }
 0x104   : > { %v6445_v25 = vpop.f32.mrf.mxu1 }
 0x105   : > { %8343 = vst [vmem:[#allocation17_spill] sm:$0xff] %v6445_v25 }
 0x107   : > { %5301 = vmatmul.msk.f32.vlgmr.msra.gmra.mxu1 %vm343_vm1, %v1047_v15  ;;  %v6466_v15 = vld [vmem:[%s6026_s14 + $0x3a] sm:$0xff]  ;;  %v6479_v29 = vpop.f32.mrf.mxu0 }
 0x108   : > { %5285 = vmatmul.msk.f32.gmra.mxu0 %vm343_vm1, %v6466_v15  ;;  %v6488_v46 = vpop.f32.mrf.mxu3 }
 0x109   : > { %8349 = vst [vmem:[#allocation23_spill] sm:$0xff] %v6488_v46 }
 0x10a   : > { %5355 = vmatmul.msk.f32.gmra.mxu2 %vm343_vm1, %v6029_v2 }
 0x10b   : > { %5375 = vmatmul.msk.f32.gmra.mxu3 %vm343_vm1, %v6293_v39  ;;  %v6597_v39 = vld [vmem:[#allocation2 + $0x62] sm:$0xff] }
 0x10c   : > { %v6459_v53 = vpop.f32.mrf.mxu1 }
 0x10d   : > { %8344 = vst [vmem:[#allocation18_spill] sm:$0xff] %v6459_v53  ;;  %v6522_v53 = vld [vmem:[%s6026_s14 + $0x62] sm:$0xff] }
 0x10f   : > { %5302 = vmatmul.msk.f32.gmra.mxu1 %vm343_vm1, %v1048_v14  ;;  %v6486_v14 = vpop.f32.mrf.mxu2  ;;  %v6507_v46 = vpop.f32.mrf.mxu0 }
 0x110   : > { %8348 = vst [vmem:[#allocation22_spill] sm:$0xff] %v6486_v14  ;;  %5286 = vmatmul.msk.f32.gmra.mxu0 %vm343_vm1, %v6482_v24  ;;  %v6513_v48 = vpop.f32.mrf.mxu3 }
 0x111   : > { %8352 = vst [vmem:[#allocation26_spill] sm:$0xff] %v6513_v48 }
 0x112   : > { %5356 = vmatmul.msk.f32.gmra.mxu2 %vm343_vm1, %v6044_v3 }
 0x113   : > { %5376 = vmatmul.msk.f32.gmra.mxu3 %vm343_vm1, %v6302_v45 }
 0x114   : > { %v6475_v38 = vpop.f32.mrf.mxu1 }
 0x115   : > { %8347 = vst [vmem:[#allocation21_spill] sm:$0xff] %v6475_v38  ;;  %v6501_v38 = vld [vmem:[%s6026_s14 + $0x52] sm:$0xff] }
 0x117   : > { %5303 = vmatmul.msk.f32.gmra.mxu1 %vm343_vm1, %v6477_v61  ;;  %v6511_v9 = vpop.f32.mrf.mxu2  ;;  %v6532_v54 = vpop.f32.mrf.mxu0 }
 0x118   : > { %5287 = vmatmul.msk.f32.gmra.mxu0 %vm343_vm1, %v6501_v38  ;;  %8351 = vst [vmem:[#allocation25_spill] sm:$0xff] %v6511_v9  ;;  %v6536_v48 = vpop.f32.mrf.mxu3 }
 0x119   : > { %8355 = vst [vmem:[#allocation29_spill] sm:$0xff] %v6536_v48  ;;  %v6557_v48 = vld [vmem:[#allocation2 + $0x4a] sm:$0xff] }
 0x11a   : > { %5357 = vmatmul.msk.f32.gmra.mxu2 %vm343_vm1, %v6054_v6 }
 0x11b   : > { %5377 = vmatmul.msk.f32.gmra.mxu3 %vm343_vm1, %v6315_v57 }
 0x11c   : > { %v6496_v43 = vpop.f32.mrf.mxu1 }
 0x11d   : > { %8350 = vst [vmem:[#allocation24_spill] sm:$0xff] %v6496_v43  ;;  %v6519_v43 = vld [vmem:[#allocation2 + $0x32] sm:$0xff] }
 0x11f   : > { %5304 = vmatmul.msk.f32.gmra.mxu1 %vm343_vm1, %v6498_v4  ;;  %v6534_v17 = vpop.f32.mrf.mxu2  ;;  %v6553_v62 = vpop.f32.mrf.mxu0 }
 0x120   : > { %5288 = vmatmul.msk.f32.gmra.mxu0 %vm343_vm1, %v6522_v53  ;;  %8354 = vst [vmem:[#allocation28_spill] sm:$0xff] %v6534_v17 }
 0x121   : > { %8357 = vst [vmem:[#allocation31_spill] sm:$0xff] %v6553_v62 }
 0x122   : > { %5358 = vmatmul.msk.f32.gmra.mxu2 %vm343_vm1, %v6070_v11 }
 0x123   : > { %5378 = vmatmul.msk.f32.gmra.mxu3 %vm343_vm1, %v6325_v63 }
 0x124   : > { %v6517_v14 = vpop.f32.mrf.mxu1 }
 0x125   : > { %8353 = vst [vmem:[#allocation27_spill] sm:$0xff] %v6517_v14  ;;  %v6540_v14 = vld [vmem:[#allocation2 + $0x3a] sm:$0xff] }
 0x127   : > { %5305 = vmatmul.msk.f32.gmra.mxu1 %vm343_vm1, %v6519_v43  ;;  %v6559_v17 = vpop.f32.mrf.mxu2 }
 0x128   : > { %5289 = vmatmul.msk.f32.gmra.mxu0 %vm343_vm1, %v6543_v55  ;;  %8359 = vst [vmem:[#allocation33_spill] sm:$0xff] %v6559_v17  ;;  %v6581_v17 = vld [vmem:[%s6026_s14 + $0x82] sm:$0xff] }
 0x129   : > { %8364 = vst [vmem:[#allocation38_spill] sm:$0xff] %v6581_v17 }
 0x12a   : > { %5359 = vmatmul.msk.f32.gmra.mxu2 %vm343_vm1, %v6086_v16  ;;  %v340_v16 = vld [vmem:[%s6041_s29 + $0x78] sm:$0xff] }
 0x12b   : > { %5379 = vmatmul.msk.f32.gmra.mxu3 %vm343_vm1, %v6335_v8  ;;  %v6673_v8 = vld [vmem:[#allocation2 + $0x92] sm:$0xff]  ;;  %375 = vst.msk [vmem:[#allocation2 + $0xf0] sm:$0xff] %vm343_vm1, %v340_v16 }
 0x12c   : > { %v6538_v9 = vpop.f32.mrf.mxu1  ;;  %8386 = vst [vmem:[#allocation60_spill] sm:$0xff] %v6673_v8 }
 0x12d   : > { %8356 = vst [vmem:[#allocation30_spill] sm:$0xff] %v6538_v9  ;;  %v6561_v9 = vpop.f32.mrf.mxu3 }
 0x12e   : > { %8360 = vst [vmem:[#allocation34_spill] sm:$0xff] %v6561_v9  ;;  %v6578_v9 = vpop.f32.mrf.mxu0 }
 0x12f   : > { %5306 = vmatmul.msk.f32.gmra.mxu1 %vm343_vm1, %v6540_v14  ;;  %8363 = vst [vmem:[#allocation37_spill] sm:$0xff] %v6578_v9  ;;  %v6621_v9 = vld [vmem:[%s6026_s14 + $0x9a] sm:$0xff] }
 0x130   : > { %5290 = vmatmul.msk.f32.gmra.mxu0 %vm343_vm1, %v6564_v37  ;;  %8373 = vst [vmem:[#allocation47_spill] sm:$0xff] %v6621_v9 }
 0x131   : > { %378 = vst.msk [vmem:[#allocation2 + $0x108] sm:$0xff] %vm343_vm1, %v340_v16 }
 0x132   : > { %5360 = vmatmul.msk.f32.gmra.mxu2 %vm343_vm1, %v6104_v22  ;;  %v5340_v22 = vld [vmem:[%s6026_s14 + $0xf0] sm:$0xff] }
 0x133   : > { %5380 = vmatmul.msk.f32.gmra.mxu3 %vm343_vm1, %v6345_v20 }
 0x134   : > { %v6555_v26 = vpop.f32.mrf.mxu1 }
 0x135   : > { %8358 = vst [vmem:[#allocation32_spill] sm:$0xff] %v6555_v26  ;;  %v6585_v26 = vpop.f32.mrf.mxu2  ;;  %v6587_v62 = vpop.f32.mrf.mxu3 }
 0x136   : > { %8365 = vst [vmem:[#allocation39_spill] sm:$0xff] %v6585_v26 }
 0x137   : > { %5307 = vmatmul.msk.f32.gmra.mxu1 %vm343_vm1, %v6557_v48  ;;  %8366 = vst [vmem:[#allocation40_spill] sm:$0xff] %v6587_v62  ;;  %v6606_v62 = vpop.f32.mrf.mxu0 }
 0x138   : > { %5291 = vmatmul.msk.f32.gmra.mxu0 %vm343_vm1, %v6581_v17  ;;  %8369 = vst [vmem:[#allocation43_spill] sm:$0xff] %v6606_v62  ;;  %v6642_v62 = vld [vmem:[%s6026_s14 + $0xaa] sm:$0xff]  ;;  %v6715_v17 = vld [vmem:[%s6026_s14 + $0xda] sm:$0xff] }
 0x139   : > { %8379 = vst [vmem:[#allocation53_spill] sm:$0xff] %v6642_v62 }
 0x13a   : > { %5361 = vmatmul.msk.f32.gmra.mxu2 %vm343_vm1, %v5340_v22  ;;  %8393 = vst [vmem:[#allocation67_spill] sm:$0xff] %v6715_v17 }
 0x13b   : > { %5381 = vmatmul.msk.f32.gmra.mxu3 %vm343_vm1, %v6357_v30  ;;  %v1429_v30 = vld [vmem:[#allocation2 + $0xf0] sm:$0xff] }
 0x13c   : > { %v6574_v5 = vpop.f32.mrf.mxu1 }
 0x13d   : > { %8362 = vst [vmem:[#allocation36_spill] sm:$0xff] %v6574_v5  ;;  %v6600_v5 = vld [vmem:[%s6026_s14 + $0x92] sm:$0xff]  ;;  %v6610_v45 = vpop.f32.mrf.mxu2  ;;  %v6612_v2 = vpop.f32.mrf.mxu3 }
 0x13e   : > { %8368 = vst [vmem:[#allocation42_spill] sm:$0xff] %v6600_v5 }
 0x13f   : > { %5308 = vmatmul.msk.f32.gmra.mxu1 %vm343_vm1, %v6576_v32  ;;  %8370 = vst [vmem:[#allocation44_spill] sm:$0xff] %v6610_v45  ;;  %v6631_v3 = vpop.f32.mrf.mxu0 }
 0x140   : > { %5292 = vmatmul.msk.f32.gmra.mxu0 %vm343_vm1, %v6600_v5  ;;  %8371 = vst [vmem:[#allocation45_spill] sm:$0xff] %v6612_v2  ;;  %v6696_v5 = vld [vmem:[%s6026_s14 + $0xca] sm:$0xff] }
 0x141   : > { %8374 = vst [vmem:[#allocation48_spill] sm:$0xff] %v6631_v3  ;;  %v6663_v3 = vld [vmem:[%s6026_s14 + $0xb2] sm:$0xff] }
 0x142   : > { %8385 = vst [vmem:[#allocation59_spill] sm:$0xff] %v6663_v3 }
 0x143   : > { %8390 = vst [vmem:[#allocation64_spill] sm:$0xff] %v6696_v5  ;;  %5382 = vmatmul.msk.f32.gmra.mxu3 %vm343_vm1, %v1429_v30 }
 0x144   : > { %v6595_v10 = vpop.f32.mrf.mxu1 }
 0x145   : > { %8367 = vst [vmem:[#allocation41_spill] sm:$0xff] %v6595_v10  ;;  %v6618_v10 = vld [vmem:[#allocation2 + $0x6a] sm:$0xff]  ;;  %v6633_v57 = vpop.f32.mrf.mxu2  ;;  %v6635_v2 = vpop.f32.mrf.mxu3 }
 0x146   : > { %8375 = vst [vmem:[#allocation49_spill] sm:$0xff] %v6633_v57 }
 0x147   : > { %5309 = vmatmul.msk.f32.gmra.mxu1 %vm343_vm1, %v6597_v39  ;;  %8376 = vst [vmem:[#allocation50_spill] sm:$0xff] %v6635_v2  ;;  %v6652_v6 = vpop.f32.mrf.mxu0  ;;  %v6656_v2 = vld [vmem:[#allocation2 + $0x82] sm:$0xff] }
 0x148   : > { %5293 = vmatmul.msk.f32.gmra.mxu0 %vm343_vm1, %v6621_v9  ;;  %8380 = vst [vmem:[#allocation54_spill] sm:$0xff] %v6652_v6  ;;  %v6676_v6 = vld [vmem:[%s6026_s14 + $0xc2] sm:$0xff] }
 0x149   : > { %8382 = vst [vmem:[#allocation56_spill] sm:$0xff] %v6656_v2 }
 0x14a   : > { %8387 = vst [vmem:[#allocation61_spill] sm:$0xff] %v6676_v6 }
 0x14c   : > { %v6616_v26 = vpop.f32.mrf.mxu1 }
 0x14d   : > { %8372 = vst [vmem:[#allocation46_spill] sm:$0xff] %v6616_v26  ;;  %v6639_v26 = vld [vmem:[#allocation2 + $0x7a] sm:$0xff]  ;;  %v6658_v57 = vpop.f32.mrf.mxu2 }
 0x14e   : > { %8378 = vst [vmem:[#allocation52_spill] sm:$0xff] %v6639_v26 }
 0x14f   : > { %5310 = vmatmul.msk.f32.gmra.mxu1 %vm343_vm1, %v6618_v10  ;;  %8383 = vst [vmem:[#allocation57_spill] sm:$0xff] %v6658_v57  ;;  %v1168_v57 = vpop.f32.mrf.mxu0 }
 0x150   : > { %5294 = vmatmul.msk.f32.gmra.mxu0 %vm343_vm1, %v6642_v62  ;;  %v6691_v62 = vld [vmem:[#allocation2 + $0x9a] sm:$0xff] }
 0x151   : > { %8389 = vst [vmem:[#allocation63_spill] sm:$0xff] %v6691_v62 }
 0x154   : > { %v6637_v45 = vpop.f32.mrf.mxu1 }
 0x155   : > { %8377 = vst [vmem:[#allocation51_spill] sm:$0xff] %v6637_v45  ;;  %v6660_v45 = vpop.f32.mrf.mxu3 }
 0x156   : > { %8384 = vst [vmem:[#allocation58_spill] sm:$0xff] %v6660_v45 }
 0x157   : > { %5311 = vmatmul.msk.f32.gmra.mxu1 %vm343_vm1, %v6639_v26  ;;  %v6693_v9 = vpop.f32.mrf.mxu0 }
 0x158   : > { %5295 = vmatmul.msk.f32.gmra.mxu0 %vm343_vm1, %v6663_v3 }
 0x15c   : > { %v6654_v63 = vpop.f32.mrf.mxu1 }
 0x15d   : > { %8381 = vst [vmem:[#allocation55_spill] sm:$0xff] %v6654_v63  ;;  %v1533_v63 = vpop.f32.mrf.mxu2  ;;  %v1672_v45 = vpop.f32.mrf.mxu3 }
 0x15e   : > { %v6685_v20 = vadd.f32 %v1672_v45, %v1533_v63  ;;  %v341_v45 = vld [vmem:[%s6041_s29 + $0x80] sm:$0xff] }
 0x15f   : > { %5312 = vmatmul.msk.f32.gmra.mxu1 %vm343_vm1, %v6656_v2  ;;  %376 = vst.msk [vmem:[#allocation2 + $0xf8] sm:$0xff] %vm343_vm1, %v341_v45 }
 0x160   : > { %5296 = vmatmul.msk.f32.gmra.mxu0 %vm343_vm1, %v6676_v6  ;;  %8388 = vst [vmem:[#allocation62_spill] sm:$0xff] %v6685_v20  ;;  %v6710_v20 = vld [vmem:[#allocation2 + $0xaa] sm:$0xff] }
 0x161   : > { %379 = vst.msk [vmem:[#allocation2 + $0x110] sm:$0xff] %vm343_vm1, %v341_v45  ;;  %v6726_v45 = vld [vmem:[#allocation2 + $0xb2] sm:$0xff] }
 0x162   : > { %8392 = vst [vmem:[#allocation66_spill] sm:$0xff] %v6710_v20 }
 0x163   : > { %8395 = vst [vmem:[#allocation69_spill] sm:$0xff] %v6726_v45 }
 0x164   : > { %v826_v11 = vpop.f32.mrf.mxu1 }
 0x165   : > { %v1536_v6 = vpop.f32.mrf.mxu2 }
 0x167   : > { %5313 = vmatmul.msk.f32.gmra.mxu1 %vm343_vm1, %v6673_v8  ;;  %v1675_v8 = vpop.f32.mrf.mxu3 }
 0x168   : > { %5297 = vmatmul.msk.f32.gmra.mxu0 %vm343_vm1, %v6696_v5  ;;  %v6704_v63 = vadd.f32 %v1675_v8, %v1536_v6  ;;  %v5341_v6 = vld [vmem:[%s6026_s14 + $0xf8] sm:$0xff] }
 0x169   : > { %v1430_v8 = vld [vmem:[#allocation2 + $0xf8] sm:$0xff]  ;;  %5362 = vmatmul.msk.f32.gmra.mxu2 %vm343_vm1, %v5341_v6 }
 0x16a   : > { %8391 = vst [vmem:[#allocation65_spill] sm:$0xff] %v6704_v63  ;;  %5383 = vmatmul.msk.f32.gmra.mxu3 %vm343_vm1, %v1430_v8  ;;  %v6750_v8 = vld [vmem:[#allocation2 + $0xc2] sm:$0xff] }
 0x16c   : > { %v829_v3 = vpop.f32.mrf.mxu1 }
 0x16d   : > { %v1539_v5 = vpop.f32.mrf.mxu2 }
 0x16f   : > { %5314 = vmatmul.msk.f32.gmra.mxu1 %vm343_vm1, %v6691_v62  ;;  %v6712_v62 = vpop.f32.mrf.mxu0  ;;  %v1678_v2 = vpop.f32.mrf.mxu3 }
 0x170   : > { %5298 = vmatmul.msk.f32.gmra.mxu0 %vm343_vm1, %v6715_v17  ;;  %v6722_v22 = vadd.f32 %v1678_v2, %v1539_v5  ;;  %v6734_v17 = vld [vmem:[%s6026_s14 + $0xe2] sm:$0xff] }
 0x171   : > { %8396 = vst [vmem:[#allocation70_spill] sm:$0xff] %v6734_v17 }
 0x172   : > { %8394 = vst [vmem:[#allocation68_spill] sm:$0xff] %v6722_v22 }
 0x174   : > { %v965_v16 = vpop.f32.mrf.mxu1 }
 0x175   : > { %v1542_v26 = vpop.f32.mrf.mxu2  ;;  %v966_v5 = vadd.f32 %v965_v16, %v826_v11 }
 0x177   : > { %5315 = vmatmul.msk.f32.gmra.mxu1 %vm343_vm1, %v6710_v20  ;;  %v6728_v63 = vpop.f32.mrf.mxu0  ;;  %v1681_v37 = vpop.f32.mrf.mxu3  ;;  %v5447_v20 = vld [vmem:[%s8306_s2 + $0x28] sm:$0xff] }
 0x178   : > { %v2117_v25 = vrot.slane %v5447_v20, 4  ;;  %5489 = vmatpush.msk.msra.mxu3 %vm484_vm0, %v5447_v20  ;;  %5299 = vmatmul.msk.f32.gmra.mxu0 %vm343_vm1, %v6734_v17  ;;  %v6742_v2 = vadd.f32 %v1681_v37, %v1542_v26  ;;  %v644_v20 = vadd.f32 %v6323_v60, %v6349_v21  ;;  %v5385_v37 = vld [vmem:[%s6026_s14 + $0x19] sm:$0xff]  ;;  %v5510_v21 = vld [vmem:[%s8306_s2 + $0x30] sm:$0xff] }
 0x179   : > { %5490 = vmatmul.msk.f32.vlgmr.msra.gmra.mxu3 %vm343_vm1, %v6477_v61  ;;  %v2521_v61 = vrot.slane %v5510_v21, 4  ;;  %5552 = vmatpush.msk.msra.mxu1 %vm484_vm0, %v5510_v21  ;;  %v6815_v21 = vld [vmem:[#allocation2 + $0xe2] sm:$0xff] }
 0x17a   : > { %5468 = vmatpush.msk.msra.mxu2 %vm484_vm0, %v2117_v25  ;;  %v1025_v17 = vadd.f32 %v966_v5, %v644_v20  ;;  %v5386_v20 = vld [vmem:[%s6026_s14 + $0x21] sm:$0xff] }
 0x17b   : > { %5469 = vmatmul.msk.f32.vlgmr.msra.gmra.mxu2 %vm343_vm1, %v6411_v35  ;;  %5531 = vmatpush.msk.msrb.mxu0 %vm484_vm0, %v2521_v61 }
 0x17c   : > { %v968_v30 = vpop.f32.mrf.mxu1 }
 0x17d   : > { %v1545_v25 = vpop.f32.mrf.mxu2  ;;  %v969_v35 = vadd.f32 %v968_v30, %v829_v3 }
 0x17f   : > { %5316 = vmatmul.msk.f32.gmra.mxu1 %vm343_vm1, %v6726_v45  ;;  %v6752_v22 = vpop.f32.mrf.mxu0  ;;  %v1684_v11 = vpop.f32.mrf.mxu3 }
 0x180   : > { %5406 = vmatmul.msk.f32.vlgmr.msra.gmra.mxu0 %vm343_vm1, %v5385_v37  ;;  %v6759_v60 = vadd.f32 %v1684_v11, %v1545_v25  ;;  %v6792_v25 = vld [vmem:[#allocation2 + $0xda] sm:$0xff] }
 0x181   : > { %5491 = vmatmul.msk.f32.gmra.mxu3 %vm343_vm1, %v6498_v4 }
 0x183   : > { %5470 = vmatmul.msk.f32.gmra.mxu2 %vm343_vm1, %v6430_v31 }
 0x184   : > { %v1307_v6 = vpop.f32.mrf.mxu1 }
 0x185   : > { %v1308_v45 = vadd.f32 %v1307_v6, %v1168_v57  ;;  %v6771_v57 = vld [vmem:[#allocation2 + $0xca] sm:$0xff]  ;;  %v1548_v31 = vpop.f32.mrf.mxu2 }
 0x187   : > { %v1367_v26 = vadd.f32 %v1308_v45, %v1025_v17  ;;  %5317 = vmatmul.msk.f32.gmra.mxu1 %vm343_vm1, %v6750_v8  ;;  %v647_v17 = vadd.f32 %v6333_v7, %v6370_v40  ;;  %v6774_v16 = vpop.f32.mrf.mxu0  ;;  %v1687_v5 = vpop.f32.mrf.mxu3  ;;  %v650_v7 = vadd.f32 %v6343_v19, %v6395_v51  ;;  %v972_v40 = vadd.f32 %v6306_v49, %v6304_v47  ;;  %v6798_v49 = vld [vmem:[%s6026_s14 + $0x31] sm:$0xff] }
 0x188   : > { %5407 = vmatmul.msk.f32.gmra.mxu0 %vm343_vm1, %v5386_v20  ;;  %v6786_v6 = vadd.f32 %v1687_v5, %v1548_v31 }
 0x189   : > { %1388 = vst.msk [vmem:[#allocation4] sm:$0xff] %vm1387_vm3, %v1367_v26  ;;  %v1026_v30 = vadd.f32 %v969_v35, %v647_v17  ;;  %5492 = vmatmul.msk.f32.gmra.mxu3 %vm343_vm1, %v6519_v43  ;;  %v1027_v37 = vadd.f32 %v972_v40, %v650_v7  ;;  %v975_v43 = vadd.f32 %v6319_v59, %v6317_v58  ;;  %v6821_v59 = vld [vmem:[%s6026_s14 + $0x39] sm:$0xff]  ;;  %v1735_v7 = vld [vmem:[#allocation2 + $0x21] sm:$0xff] }
 0x18b   : > { %5471 = vmatmul.msk.f32.gmra.mxu2 %vm343_vm1, %v6448_v41  ;;  %v653_v41 = vadd.f32 %v6355_v28, %v6416_v56 }
 0x18c   : > { %v1310_v3 = vpop.f32.mrf.mxu1 }
 0x18d   : > { %v1311_v45 = vadd.f32 %v1310_v3, %v6693_v9  ;;  %v1551_v51 = vpop.f32.mrf.mxu2  ;;  %v1028_v17 = vadd.f32 %v975_v43, %v653_v41 }
 0x18f   : > { %v1368_v4 = vadd.f32 %v1311_v45, %v1026_v30  ;;  %5318 = vmatmul.msk.f32.gmra.mxu1 %vm343_vm1, %v6771_v57  ;;  %v6794_v11 = vpop.f32.mrf.mxu0  ;;  %v1690_v47 = vpop.f32.mrf.mxu3  ;;  %v1734_v45 = vld [vmem:[#allocation2 + $0x19] sm:$0xff] }
 0x190   : > { %5408 = vmatmul.msk.f32.gmra.mxu0 %vm343_vm1, %v6798_v49 }
 0x191   : > { %1389 = vst.msk [vmem:[#allocation4 + $0x8] sm:$0xff] %vm1387_vm3, %v1368_v4  ;;  %5493 = vmatmul.msk.f32.gmra.mxu3 %vm343_vm1, %v6540_v14  ;;  %v978_v14 = vadd.f32 %v6331_v1, %v6329_v0  ;;  %v6842_v0 = vld [vmem:[%s6026_s14 + $0x49] sm:$0xff] }
 0x193   : > { %5472 = vmatmul.msk.f32.gmra.mxu2 %vm343_vm1, %v6466_v15  ;;  %v656_v15 = vadd.f32 %v6372_v42, %v6439_v50 }
 0x194   : > { %v1313_v9 = vpop.f32.mrf.mxu1 }
 0x195   : > { %v1314_v19 = vadd.f32 %v1313_v9, %v6712_v62  ;;  %v6809_v62 = vadd.f32 %v1690_v47, %v1551_v51  ;;  %v1554_v56 = vpop.f32.mrf.mxu2  ;;  %v1029_v5 = vadd.f32 %v978_v14, %v656_v15  ;;  %v6878_v51 = vld [vmem:[#allocation2 + $0x31] sm:$0xff]  ;;  %v8400_v14 = vld [vmem:[#allocation35_spill] sm:$0xff] }
 0x197   : > { %v1369_v26 = vadd.f32 %v1314_v19, %v1027_v37  ;;  %5319 = vmatmul.msk.f32.gmra.mxu1 %vm343_vm1, %v6792_v25  ;;  %v6817_v61 = vpop.f32.mrf.mxu0  ;;  %v1693_v58 = vpop.f32.mrf.mxu3 }
 0x198   : > { %5409 = vmatmul.msk.f32.gmra.mxu0 %vm343_vm1, %v6821_v59 }
 0x199   : > { %1390 = vst.msk [vmem:[#allocation4 + $0x10] sm:$0xff] %vm1387_vm3, %v1369_v26  ;;  %5494 = vmatmul.msk.f32.gmra.mxu3 %vm343_vm1, %v6557_v48  ;;  %v981_v48 = vadd.f32 %v6341_v13, %v6339_v12  ;;  %v6862_v12 = vld [vmem:[%s6026_s14 + $0x51] sm:$0xff] }
 0x19b   : > { %5473 = vmatmul.msk.f32.gmra.mxu2 %vm343_vm1, %v6482_v24  ;;  %v659_v24 = vadd.f32 %v6392_v36, %v6457_v34 }
 0x19c   : > { %v1316_v35 = vpop.f32.mrf.mxu1 }
 0x19d   : > { %v1317_v28 = vadd.f32 %v1316_v35, %v6728_v63  ;;  %v6832_v63 = vadd.f32 %v1693_v58, %v1554_v56  ;;  %v1557_v50 = vpop.f32.mrf.mxu2  ;;  %v1030_v9 = vadd.f32 %v981_v48, %v659_v24  ;;  %v6901_v35 = vld [vmem:[#allocation2 + $0x39] sm:$0xff] }
 0x19e   : > { %v8398_v58 = vld [vmem:[#allocation11_spill] sm:$0xff] }
 0x19f   : > { %v1370_v3 = vadd.f32 %v1317_v28, %v1028_v17  ;;  %5320 = vmatmul.msk.f32.gmra.mxu1 %vm343_vm1, %v6815_v21  ;;  %v6838_v31 = vpop.f32.mrf.mxu0  ;;  %v1696_v20 = vpop.f32.mrf.mxu3  ;;  %v6930_v24 = vld [vmem:[%s6026_s14 + $0x79] sm:$0xff] }
 0x1a0   : > { %5410 = vmatmul.msk.f32.gmra.mxu0 %vm343_vm1, %v6842_v0 }
 0x1a1   : > { %1391 = vst.msk [vmem:[#allocation4 + $0x18] sm:$0xff] %vm1387_vm3, %v1370_v3  ;;  %5495 = vmatmul.msk.f32.gmra.mxu3 %vm343_vm1, %v6576_v32  ;;  %v984_v32 = vadd.f32 %v6353_v27, %v6351_v23  ;;  %v6884_v27 = vld [vmem:[%s6026_s14 + $0x61] sm:$0xff] }
 0x1a2   : > { %v8399_v3 = vld [vmem:[#allocation12_spill] sm:$0xff] }
 0x1a3   : > { %5474 = vmatmul.msk.f32.gmra.mxu2 %vm343_vm1, %v6501_v38  ;;  %v662_v38 = vadd.f32 %v6408_v18, %v6479_v29  ;;  %v990_v15 = vadd.f32 %v8399_v3, %v8398_v58  ;;  %v6970_v3 = vld [vmem:[#allocation2 + $0x61] sm:$0xff] }
 0x1a4   : > { %v1319_v30 = vpop.f32.mrf.mxu1 }
 0x1a5   : > { %v1320_v42 = vadd.f32 %v1319_v30, %v6752_v22  ;;  %v6852_v22 = vadd.f32 %v1696_v20, %v1557_v50  ;;  %v1560_v34 = vpop.f32.mrf.mxu2  ;;  %v1031_v26 = vadd.f32 %v984_v32, %v662_v38  ;;  %v8401_v30 = vld [vmem:[#allocation52_spill] sm:$0xff] }
 0x1a6   : > { %v8407_v38 = vld [vmem:[#allocation56_spill] sm:$0xff] }
 0x1a7   : > { %v1371_v1 = vadd.f32 %v1320_v42, %v1029_v5  ;;  %5427 = vmatmul.msk.f32.vlgmr.msrb.gmra.mxu1 %vm343_vm1, %v1734_v45  ;;  %v6858_v40 = vpop.f32.mrf.mxu0  ;;  %v1699_v37 = vpop.f32.mrf.mxu3  ;;  %v6924_v5 = vld [vmem:[#allocation2 + $0x49] sm:$0xff] }
 0x1a8   : > { %5411 = vmatmul.msk.f32.gmra.mxu0 %vm343_vm1, %v6862_v12 }
 0x1a9   : > { %1392 = vst.msk [vmem:[#allocation4 + $0x20] sm:$0xff] %vm1387_vm3, %v1371_v1  ;;  %5496 = vmatmul.msk.f32.gmra.mxu3 %vm343_vm1, %v6597_v39  ;;  %v987_v39 = vadd.f32 %v6377_v33, %v6375_v52  ;;  %v6907_v33 = vld [vmem:[%s6026_s14 + $0x69] sm:$0xff] }
 0x1ab   : > { %5475 = vmatmul.msk.f32.gmra.mxu2 %vm343_vm1, %v6522_v53  ;;  %v665_v53 = vadd.f32 %v6427_v44, %v6507_v46 }
 0x1ac   : > { %v1322_v4 = vpop.f32.mrf.mxu1 }
 0x1ad   : > { %v1323_v36 = vadd.f32 %v1322_v4, %v6774_v16  ;;  %v6872_v16 = vadd.f32 %v1699_v37, %v1560_v34  ;;  %v1563_v29 = vpop.f32.mrf.mxu2  ;;  %v1032_v28 = vadd.f32 %v987_v39, %v665_v53  ;;  %v8402_v4 = vld [vmem:[#allocation31_spill] sm:$0xff]  ;;  %v8405_v34 = vld [vmem:[#allocation14_spill] sm:$0xff] }
 0x1ae   : > { %v6953_v53 = vld [vmem:[%s6026_s14 + $0x81] sm:$0xff] }
 0x1af   : > { %v1372_v13 = vadd.f32 %v1323_v36, %v1030_v9  ;;  %5428 = vmatmul.msk.f32.gmra.mxu1 %vm343_vm1, %v1735_v7  ;;  %v6880_v47 = vpop.f32.mrf.mxu0  ;;  %v1702_v23 = vpop.f32.mrf.mxu3  ;;  %v8403_v7 = vld [vmem:[#allocation18_spill] sm:$0xff]  ;;  %v8404_v36 = vld [vmem:[#allocation13_spill] sm:$0xff] }
 0x1b0   : > { %5412 = vmatmul.msk.f32.gmra.mxu0 %vm343_vm1, %v6884_v27  ;;  %v671_v9 = vadd.f32 %v8403_v7, %v8402_v4  ;;  %v993_v37 = vadd.f32 %v8405_v34, %v8404_v36  ;;  %v8416_v7 = vld [vmem:[#allocation19_spill] sm:$0xff] }
 0x1b1   : > { %1393 = vst.msk [vmem:[#allocation4 + $0x28] sm:$0xff] %vm1387_vm3, %v1372_v13  ;;  %5497 = vmatmul.msk.f32.gmra.mxu3 %vm343_vm1, %v6618_v10  ;;  %v8406_v13 = vld [vmem:[#allocation38_spill] sm:$0xff]  ;;  %v8419_v34 = vld [vmem:[#allocation47_spill] sm:$0xff] }
 0x1b3   : > { %5476 = vmatmul.msk.f32.gmra.mxu2 %vm343_vm1, %v6543_v55  ;;  %v8397_v55 = vld [vmem:[#allocation17_spill] sm:$0xff] }
 0x1b4   : > { %v1325_v19 = vpop.f32.mrf.mxu1  ;;  %v668_v10 = vadd.f32 %v8397_v55, %v6532_v54  ;;  %v8412_v55 = vld [vmem:[#allocation42_spill] sm:$0xff] }
 0x1b5   : > { %v1326_v18 = vadd.f32 %v1325_v19, %v6794_v11  ;;  %v6895_v11 = vadd.f32 %v1702_v23, %v1563_v29  ;;  %v1566_v44 = vpop.f32.mrf.mxu2  ;;  %v6947_v19 = vld [vmem:[#allocation2 + $0x51] sm:$0xff] }
 0x1b6   : > { %v1033_v50 = vadd.f32 %v990_v15, %v668_v10  ;;  %v8413_v10 = vld [vmem:[#allocation60_spill] sm:$0xff] }
 0x1b7   : > { %v1373_v41 = vadd.f32 %v1326_v18, %v1031_v26  ;;  %5429 = vmatmul.msk.f32.gmra.mxu1 %vm343_vm1, %v6878_v51  ;;  %v6903_v17 = vpop.f32.mrf.mxu0  ;;  %v1705_v52 = vpop.f32.mrf.mxu3  ;;  %v1034_v18 = vadd.f32 %v993_v37, %v671_v9  ;;  %v8417_v9 = vld [vmem:[#allocation20_spill] sm:$0xff]  ;;  %v8420_v37 = vld [vmem:[#allocation63_spill] sm:$0xff] }
 0x1b8   : > { %5413 = vmatmul.msk.f32.gmra.mxu0 %vm343_vm1, %v6907_v33  ;;  %v999_v36 = vadd.f32 %v8417_v9, %v8416_v7  ;;  %v8428_v9 = vld [vmem:[#allocation54_spill] sm:$0xff] }
 0x1b9   : > { %1394 = vst.msk [vmem:[#allocation4 + $0x30] sm:$0xff] %vm1387_vm3, %v1373_v41  ;;  %5498 = vmatmul.msk.f32.gmra.mxu3 %vm343_vm1, %v8401_v30 }
 0x1bb   : > { %5477 = vmatmul.msk.f32.gmra.mxu2 %vm343_vm1, %v8400_v14 }
 0x1bc   : > { %v1328_v43 = vpop.f32.mrf.mxu1 }
 0x1bd   : > { %v1329_v46 = vadd.f32 %v1328_v43, %v6817_v61  ;;  %v6918_v61 = vadd.f32 %v1705_v52, %v1566_v44  ;;  %v1569_v20 = vpop.f32.mrf.mxu2  ;;  %v8408_v43 = vld [vmem:[#allocation37_spill] sm:$0xff]  ;;  %v8410_v44 = vld [vmem:[#allocation15_spill] sm:$0xff]  ;;  %v8411_v52 = vld [vmem:[#allocation16_spill] sm:$0xff] }
 0x1bf   : > { %v1374_v56 = vadd.f32 %v1329_v46, %v1032_v28  ;;  %5430 = vmatmul.msk.f32.gmra.mxu1 %vm343_vm1, %v6901_v35  ;;  %v6926_v42 = vpop.f32.mrf.mxu0  ;;  %v1708_v1 = vpop.f32.mrf.mxu3  ;;  %v8409_v28 = vld [vmem:[#allocation21_spill] sm:$0xff] }
 0x1c0   : > { %5414 = vmatmul.msk.f32.gmra.mxu0 %vm343_vm1, %v6930_v24  ;;  %v674_v46 = vadd.f32 %v8409_v28, %v8408_v43  ;;  %v8421_v28 = vld [vmem:[#allocation48_spill] sm:$0xff] }
 0x1c1   : > { %1395 = vst.msk [vmem:[#allocation4 + $0x38] sm:$0xff] %vm1387_vm3, %v1374_v56  ;;  %5499 = vmatmul.msk.f32.gmra.mxu3 %vm343_vm1, %v8407_v38  ;;  %v996_v56 = vadd.f32 %v8411_v52, %v8410_v44  ;;  %v6993_v38 = vld [vmem:[#allocation2 + $0x69] sm:$0xff]  ;;  %v8423_v52 = vld [vmem:[#allocation22_spill] sm:$0xff] }
 0x1c3   : > { %5478 = vmatmul.msk.f32.gmra.mxu2 %vm343_vm1, %v8406_v13  ;;  %v1035_v14 = vadd.f32 %v996_v56, %v674_v46  ;;  %v8422_v46 = vld [vmem:[#allocation27_spill] sm:$0xff] }
 0x1c4   : > { %v1331_v45 = vpop.f32.mrf.mxu1  ;;  %v680_v44 = vadd.f32 %v8422_v46, %v8421_v28  ;;  %v8424_v56 = vld [vmem:[#allocation23_spill] sm:$0xff] }
 0x1c5   : > { %v1332_v54 = vadd.f32 %v1331_v45, %v6838_v31  ;;  %v6941_v31 = vadd.f32 %v1708_v1, %v1569_v20  ;;  %v1572_v23 = vpop.f32.mrf.mxu2  ;;  %v8414_v1 = vld [vmem:[#allocation43_spill] sm:$0xff] }
 0x1c7   : > { %v1375_v48 = vadd.f32 %v1332_v54, %v1033_v50  ;;  %5431 = vmatmul.msk.f32.gmra.mxu1 %vm343_vm1, %v6924_v5  ;;  %v6949_v26 = vpop.f32.mrf.mxu0  ;;  %v1711_v41 = vpop.f32.mrf.mxu3  ;;  %v6976_v54 = vld [vmem:[%s6026_s14 + $0x91] sm:$0xff] }
 0x1c8   : > { %5415 = vmatmul.msk.f32.gmra.mxu0 %vm343_vm1, %v6953_v53 }
 0x1c9   : > { %1396 = vst.msk [vmem:[#allocation4 + $0x40] sm:$0xff] %vm1387_vm3, %v1375_v48  ;;  %5500 = vmatmul.msk.f32.gmra.mxu3 %vm343_vm1, %v8413_v10  ;;  %v8415_v48 = vld [vmem:[#allocation24_spill] sm:$0xff]  ;;  %v8426_v10 = vld [vmem:[#allocation53_spill] sm:$0xff] }
 0x1ca   : > { %v677_v4 = vadd.f32 %v8415_v48, %v8414_v1 }
 0x1cb   : > { %5479 = vmatmul.msk.f32.gmra.mxu2 %vm343_vm1, %v8412_v55  ;;  %v1002_v55 = vadd.f32 %v8424_v56, %v8423_v52 }
 0x1cc   : > { %v1334_v32 = vpop.f32.mrf.mxu1 }
 0x1cd   : > { %v1335_v29 = vadd.f32 %v1334_v32, %v6858_v40  ;;  %v6964_v40 = vadd.f32 %v1711_v41, %v1572_v23  ;;  %v1575_v45 = vpop.f32.mrf.mxu2 }
 0x1cf   : > { %v1376_v39 = vadd.f32 %v1335_v29, %v1034_v18  ;;  %5432 = vmatmul.msk.f32.gmra.mxu1 %vm343_vm1, %v6947_v19  ;;  %v6972_v15 = vpop.f32.mrf.mxu0  ;;  %v1714_v50 = vpop.f32.mrf.mxu3  ;;  %v1036_v18 = vadd.f32 %v999_v36, %v677_v4  ;;  %v7022_v4 = vld [vmem:[%s6026_s14 + $0xa9] sm:$0xff]  ;;  %v8429_v36 = vld [vmem:[#allocation30_spill] sm:$0xff] }
 0x1d0   : > { %5416 = vmatmul.msk.f32.gmra.mxu0 %vm343_vm1, %v6976_v54 }
 0x1d1   : > { %1397 = vst.msk [vmem:[#allocation4 + $0x48] sm:$0xff] %vm1387_vm3, %v1376_v39  ;;  %5501 = vmatmul.msk.f32.gmra.mxu3 %vm343_vm1, %v8420_v37  ;;  %v6999_v39 = vld [vmem:[%s6026_s14 + $0x99] sm:$0xff]  ;;  %v8430_v37 = vld [vmem:[#allocation25_spill] sm:$0xff] }
 0x1d3   : > { %5480 = vmatmul.msk.f32.gmra.mxu2 %vm343_vm1, %v8419_v34  ;;  %v683_v34 = vadd.f32 %v8429_v36, %v8428_v9  ;;  %v7062_v36 = vld [vmem:[#allocation2 + $0x91] sm:$0xff] }
 0x1d4   : > { %v1337_v58 = vpop.f32.mrf.mxu1 }
 0x1d5   : > { %v1338_v30 = vadd.f32 %v1337_v58, %v6880_v47  ;;  %v6987_v47 = vadd.f32 %v1714_v50, %v1575_v45  ;;  %v1578_v23 = vpop.f32.mrf.mxu2  ;;  %v8427_v58 = vld [vmem:[#allocation66_spill] sm:$0xff]  ;;  %v1037_v50 = vadd.f32 %v1002_v55, %v680_v44 }
 0x1d6   : > { %v7045_v55 = vld [vmem:[%s6026_s14 + $0xb1] sm:$0xff] }
 0x1d7   : > { %v1377_v20 = vadd.f32 %v1338_v30, %v1035_v14  ;;  %5433 = vmatmul.msk.f32.gmra.mxu1 %vm343_vm1, %v6970_v3  ;;  %8418 = vst [vmem:[#allocation17_spill] sm:$0xff] %v6987_v47  ;;  %v6995_v32 = vpop.f32.mrf.mxu0  ;;  %v1717_v41 = vpop.f32.mrf.mxu3  ;;  %v7016_v30 = vld [vmem:[#allocation2 + $0x79] sm:$0xff] }
 0x1d8   : > { %5417 = vmatmul.msk.f32.gmra.mxu0 %vm343_vm1, %v6999_v39 }
 0x1d9   : > { %1398 = vst.msk [vmem:[#allocation4 + $0x50] sm:$0xff] %vm1387_vm3, %v1377_v20  ;;  %5502 = vmatmul.msk.f32.gmra.mxu3 %vm343_vm1, %v8427_v58  ;;  %v8435_v58 = vld [vmem:[#allocation5_spill] sm:$0xff] }
 0x1db   : > { %5481 = vmatmul.msk.f32.gmra.mxu2 %vm343_vm1, %v8426_v10 }
 0x1dc   : > { %v1340_v13 = vpop.f32.mrf.mxu1 }
 0x1dd   : > { %v1341_v29 = vadd.f32 %v1340_v13, %v6903_v17  ;;  %v7010_v17 = vadd.f32 %v1717_v41, %v1578_v23  ;;  %v1581_v1 = vpop.f32.mrf.mxu2  ;;  %v8431_v13 = vld [vmem:[#allocation26_spill] sm:$0xff]  ;;  %v8434_v23 = vld [vmem:[#allocation69_spill] sm:$0xff] }
 0x1df   : > { %v1378_v43 = vadd.f32 %v1341_v29, %v1036_v18  ;;  %5434 = vmatmul.msk.f32.gmra.mxu1 %vm343_vm1, %v6993_v38  ;;  %8425 = vst [vmem:[#allocation11_spill] sm:$0xff] %v7010_v17  ;;  %v7018_v45 = vpop.f32.mrf.mxu0  ;;  %v1720_v48 = vpop.f32.mrf.mxu3  ;;  %v1005_v18 = vadd.f32 %v8431_v13, %v8430_v37  ;;  %v8433_v29 = vld [vmem:[#allocation59_spill] sm:$0xff] }
 0x1e0   : > { %5418 = vmatmul.msk.f32.gmra.mxu0 %vm343_vm1, %v7022_v4 }
 0x1e1   : > { %1399 = vst.msk [vmem:[#allocation4 + $0x58] sm:$0xff] %vm1387_vm3, %v1378_v43  ;;  %5503 = vmatmul.msk.f32.gmra.mxu3 %vm343_vm1, %v8434_v23  ;;  %v7039_v43 = vld [vmem:[#allocation2 + $0x81] sm:$0xff]  ;;  %v1038_v46 = vadd.f32 %v1005_v18, %v683_v34 }
 0x1e2   : > { %v7068_v23 = vld [vmem:[%s6026_s14 + $0xc1] sm:$0xff] }
 0x1e3   : > { %5482 = vmatmul.msk.f32.gmra.mxu2 %vm343_vm1, %v8433_v29 }
 0x1e4   : > { %v1343_v14 = vpop.f32.mrf.mxu1 }
 0x1e5   : > { %v1344_v20 = vadd.f32 %v1343_v14, %v6926_v42  ;;  %v7033_v42 = vadd.f32 %v1720_v48, %v1581_v1  ;;  %v1584_v52 = vpop.f32.mrf.mxu2  ;;  %v8436_v14 = vld [vmem:[#allocation32_spill] sm:$0xff]  ;;  %v8438_v1 = vld [vmem:[#allocation29_spill] sm:$0xff] }
 0x1e7   : > { %v1379_v7 = vadd.f32 %v1344_v20, %v1037_v50  ;;  %5435 = vmatmul.msk.f32.gmra.mxu1 %vm343_vm1, %v7016_v30  ;;  %8432 = vst [vmem:[#allocation12_spill] sm:$0xff] %v7033_v42  ;;  %v7041_v28 = vpop.f32.mrf.mxu0  ;;  %v1723_v56 = vpop.f32.mrf.mxu3  ;;  %v686_v50 = vadd.f32 %v8436_v14, %v8435_v58  ;;  %v8437_v20 = vld [vmem:[#allocation28_spill] sm:$0xff] }
 0x1e8   : > { %5419 = vmatmul.msk.f32.gmra.mxu0 %vm343_vm1, %v7045_v55  ;;  %v1008_v48 = vadd.f32 %v8438_v1, %v8437_v20  ;;  %v8446_v58 = vld [vmem:[#allocation64_spill] sm:$0xff] }
 0x1e9   : > { %1400 = vst.msk [vmem:[#allocation4 + $0x60] sm:$0xff] %vm1387_vm3, %v1379_v7  ;;  %v8440_v7 = vld [vmem:[#allocation61_spill] sm:$0xff]  ;;  %5504 = vmatmul.msk.f32.gmra.mxu3 %vm343_vm1, %v6750_v8  ;;  %v8441_v8 = vld [vmem:[#allocation6_spill] sm:$0xff] }
 0x1ea   : > { %v1039_v37 = vadd.f32 %v1008_v48, %v686_v50  ;;  %v7085_v50 = vld [vmem:[#allocation2 + $0x99] sm:$0xff] }
 0x1eb   : > { %5483 = vmatmul.msk.f32.gmra.mxu2 %vm343_vm1, %v8440_v7 }
 0x1ec   : > { %v1346_v41 = vpop.f32.mrf.mxu1 }
 0x1ed   : > { %v1347_v44 = vadd.f32 %v1346_v41, %v6949_v26  ;;  %v7056_v26 = vadd.f32 %v1723_v56, %v1584_v52  ;;  %v1587_v18 = vpop.f32.mrf.mxu2  ;;  %v8443_v52 = vld [vmem:[#allocation33_spill] sm:$0xff]  ;;  %v8444_v56 = vld [vmem:[#allocation34_spill] sm:$0xff] }
 0x1ef   : > { %v1380_v10 = vadd.f32 %v1347_v44, %v1038_v46  ;;  %5436 = vmatmul.msk.f32.gmra.mxu1 %vm343_vm1, %v7039_v43  ;;  %8439 = vst [vmem:[#allocation35_spill] sm:$0xff] %v7056_v26  ;;  %v7064_v34 = vpop.f32.mrf.mxu0  ;;  %v1726_v29 = vpop.f32.mrf.mxu3  ;;  %v8442_v46 = vld [vmem:[#allocation36_spill] sm:$0xff]  ;;  %v8465_v26 = vld [vmem:[#allocation55_spill] sm:$0xff] }
 0x1f0   : > { %5420 = vmatmul.msk.f32.gmra.mxu0 %vm343_vm1, %v7068_v23  ;;  %v689_v44 = vadd.f32 %v8442_v46, %v8441_v8  ;;  %v8450_v8 = vld [vmem:[#allocation40_spill] sm:$0xff] }
 0x1f1   : > { %1401 = vst.msk [vmem:[#allocation4 + $0x68] sm:$0xff] %vm1387_vm3, %v1380_v10  ;;  %v1011_v10 = vadd.f32 %v8444_v56, %v8443_v52  ;;  %5505 = vmatmul.msk.f32.gmra.mxu3 %vm343_vm1, %v6771_v57  ;;  %v8447_v57 = vld [vmem:[#allocation7_spill] sm:$0xff]  ;;  %v7108_v56 = vld [vmem:[#allocation2 + $0xa9] sm:$0xff] }
 0x1f3   : > { %5484 = vmatmul.msk.f32.gmra.mxu2 %vm343_vm1, %v8446_v58  ;;  %v1040_v1 = vadd.f32 %v1011_v10, %v689_v44  ;;  %v8452_v44 = vld [vmem:[#allocation67_spill] sm:$0xff] }
 0x1f4   : > { %v1349_v9 = vpop.f32.mrf.mxu1 }
 0x1f5   : > { %v1350_v13 = vadd.f32 %v1349_v9, %v6972_v15  ;;  %v7079_v15 = vadd.f32 %v1726_v29, %v1587_v18  ;;  %v1590_v7 = vpop.f32.mrf.mxu2  ;;  %v8448_v18 = vld [vmem:[#allocation41_spill] sm:$0xff] }
 0x1f6   : > { %v692_v29 = vadd.f32 %v8448_v18, %v8447_v57  ;;  %v8455_v18 = vld [vmem:[#allocation44_spill] sm:$0xff] }
 0x1f7   : > { %v1381_v41 = vadd.f32 %v1350_v13, %v1039_v37  ;;  %5437 = vmatmul.msk.f32.gmra.mxu1 %vm343_vm1, %v7062_v36  ;;  %8445 = vst [vmem:[#allocation52_spill] sm:$0xff] %v7079_v15  ;;  %v7087_v20 = vpop.f32.mrf.mxu0  ;;  %v1729_v9 = vpop.f32.mrf.mxu3  ;;  %v7091_v37 = vld [vmem:[%s6026_s14 + $0xc9] sm:$0xff] }
 0x1f8   : > { %5421 = vmatmul.msk.f32.gmra.mxu0 %vm343_vm1, %v7091_v37 }
 0x1f9   : > { %1402 = vst.msk [vmem:[#allocation4 + $0x70] sm:$0xff] %vm1387_vm3, %v1381_v41  ;;  %v8449_v41 = vld [vmem:[#allocation39_spill] sm:$0xff]  ;;  %5506 = vmatmul.msk.f32.gmra.mxu3 %vm343_vm1, %v6792_v25  ;;  %v8453_v25 = vld [vmem:[#allocation8_spill] sm:$0xff] }
 0x1fa   : > { %v1014_v46 = vadd.f32 %v8450_v8, %v8449_v41  ;;  %v8457_v41 = vld [vmem:[#allocation70_spill] sm:$0xff] }
 0x1fb   : > { %5485 = vmatmul.msk.f32.gmra.mxu2 %vm343_vm1, %v8452_v44 }
 0x1fc   : > { %v1352_v14 = vpop.f32.mrf.mxu1  ;;  %v1041_v58 = vadd.f32 %v1014_v46, %v692_v29  ;;  %v8456_v29 = vld [vmem:[#allocation45_spill] sm:$0xff] }
 0x1fd   : > { %v1353_v48 = vadd.f32 %v1352_v14, %v6995_v32  ;;  %v7102_v32 = vadd.f32 %v1729_v9, %v1590_v7  ;;  %v7118_v7 = vld [vmem:[%s6026_s14 + $0xd9] sm:$0xff]  ;;  %v7133_v46 = vld [vmem:[#allocation2 + $0xb1] sm:$0xff] }
 0x1ff   : > { %v1382_v13 = vadd.f32 %v1353_v48, %v1040_v1  ;;  %5438 = vmatmul.msk.f32.gmra.mxu1 %vm343_vm1, %v7085_v50  ;;  %8451 = vst [vmem:[#allocation31_spill] sm:$0xff] %v7102_v32  ;;  %v7110_v10 = vpop.f32.mrf.mxu0  ;;  %v7113_v1 = vpop.f32.mrf.mxu2 }
 0x200   : > { %v7115_v48 = vpop.f32.mrf.mxu3  ;;  %5422 = vmatmul.msk.f32.gmra.mxu0 %vm343_vm1, %v7118_v7 }
 0x201   : > { %1403 = vst.msk [vmem:[#allocation4 + $0x78] sm:$0xff] %vm1387_vm3, %v1382_v13  ;;  %v8454_v13 = vld [vmem:[#allocation46_spill] sm:$0xff]  ;;  %5507 = vmatmul.msk.f32.gmra.mxu3 %vm343_vm1, %v6815_v21 }
 0x202   : > { %v695_v57 = vadd.f32 %v8454_v13, %v8453_v25  ;;  %v5466_v21 = vld [vmem:[%s6026_s14 + $0xf2] sm:$0xff] }
 0x203   : > { %5486 = vmatmul.msk.f32.gmra.mxu2 %vm343_vm1, %v8457_v41  ;;  %v8461_v41 = vld [vmem:[#allocation49_spill] sm:$0xff] }
 0x204   : > { %v1355_v52 = vpop.f32.mrf.mxu1 }
 0x205   : > { %v1356_v14 = vadd.f32 %v1355_v52, %v7018_v45  ;;  %v1017_v45 = vadd.f32 %v8456_v29, %v8455_v18  ;;  %v2094_v18 = vld [vmem:[#allocation2 + $0xf2] sm:$0xff]  ;;  %v342_v29 = vld [vmem:[%s6041_s29 + $0x88] sm:$0x3] }
 0x206   : > { %377 = vst.msk [vmem:[#allocation2 + $0x100] sm:$0x3] %vm346_vm2, %v342_v29 }
 0x207   : > { %v1383_v9 = vadd.f32 %v1356_v14, %v1041_v58  ;;  %5439 = vmatmul.msk.f32.gmra.mxu1 %vm343_vm1, %v7108_v56  ;;  %v7135_v44 = vpop.f32.mrf.mxu0  ;;  %v1042_v52 = vadd.f32 %v1017_v45, %v695_v57  ;;  %v7138_v14 = vpop.f32.mrf.mxu2  ;;  %v8459_v57 = vld [vmem:[#allocation9_spill] sm:$0xff]  ;;  %v8460_v45 = vld [vmem:[#allocation51_spill] sm:$0xff]  ;;  %380 = vst.msk [vmem:[#allocation2 + $0x118] sm:$0x3] %vm346_vm2, %v342_v29  ;;  %v8464_v29 = vld [vmem:[#allocation10_spill] sm:$0xff] }
 0x208   : > { %v7140_v25 = vpop.f32.mrf.mxu3 }
 0x209   : > { %1404 = vst.msk [vmem:[#allocation4 + $0x80] sm:$0xff] %vm1387_vm3, %v1383_v9  ;;  %v7143_v9 = vld [vmem:[%s6026_s14 + $0xe1] sm:$0xff]  ;;  %5508 = vmatmul.msk.f32.gmra.mxu3 %vm343_vm1, %v2094_v18 }
 0x20a   : > { %8458 = vst [vmem:[#allocation18_spill] sm:$0xff] %v7143_v9  ;;  %5423 = vmatmul.msk.f32.gmra.mxu0 %vm343_vm1, %v7143_v9  ;;  %v5467_v18 = vld [vmem:[%s6026_s14 + $0xfa] sm:$0xff] }
 0x20b   : > { %5487 = vmatmul.msk.f32.gmra.mxu2 %vm343_vm1, %v5466_v21 }
 0x20c   : > { %v1358_v8 = vpop.f32.mrf.mxu1 }
 0x20d   : > { %v1359_v58 = vadd.f32 %v1358_v8, %v7041_v28  ;;  %v698_v28 = vadd.f32 %v8460_v45, %v8459_v57  ;;  %v8462_v8 = vld [vmem:[#allocation50_spill] sm:$0xff] }
 0x20e   : > { %v1020_v32 = vadd.f32 %v8462_v8, %v8461_v41  ;;  %v7170_v8 = vld [vmem:[%s6026_s14 + $0xf1] sm:$0xff]  ;;  %v2095_v42 = vld [vmem:[#allocation2 + $0xfa] sm:$0xff] }
 0x20f   : > { %v1384_v13 = vadd.f32 %v1359_v58, %v1042_v52  ;;  %5440 = vmatmul.msk.f32.gmra.mxu1 %vm343_vm1, %v7133_v46  ;;  %v7160_v58 = vld [vmem:[#allocation2 + $0xc1] sm:$0xff]  ;;  %v7162_v15 = vpop.f32.mrf.mxu0  ;;  %v7165_v41 = vpop.f32.mrf.mxu2  ;;  %8463 = vst [vmem:[#allocation13_spill] sm:$0xff] %v7170_v8 }
 0x210   : > { %v1043_v57 = vadd.f32 %v1020_v32, %v698_v28  ;;  %v701_v32 = vadd.f32 %v8465_v26, %v8464_v29  ;;  %v8466_v28 = vld [vmem:[#allocation57_spill] sm:$0xff] }
 0x211   : > { %1405 = vst.msk [vmem:[#allocation4 + $0x88] sm:$0xff] %vm1387_vm3, %v1384_v13  ;;  %v7167_v13 = vpop.f32.mrf.mxu3  ;;  %5509 = vmatmul.msk.f32.gmra.mxu3 %vm343_vm1, %v2095_v42 }
 0x212   : > { %5424 = vmatmul.msk.f32.gmra.mxu0 %vm343_vm1, %v7170_v8 }
 0x213   : > { %5488 = vmatmul.msk.f32.gmra.mxu2 %vm343_vm1, %v5467_v18  ;;  %v7197_v18 = vld [vmem:[%s6026_s14 + $0xf9] sm:$0xff] }
 0x214   : > { %v1361_v52 = vpop.f32.mrf.mxu1 }
 0x215   : > { %v1362_v45 = vadd.f32 %v1361_v52, %v7064_v34  ;;  %v8467_v34 = vld [vmem:[#allocation58_spill] sm:$0xff] }
 0x216   : > { %v1023_v52 = vadd.f32 %v8467_v34, %v8466_v28  ;;  %v2337_v28 = vadd.f32 %v7115_v48, %v7113_v1 }
 0x217   : > { %v1385_v21 = vadd.f32 %v1362_v45, %v1043_v57  ;;  %5441 = vmatmul.msk.f32.gmra.mxu1 %vm343_vm1, %v7160_v58  ;;  %v7184_v45 = vld [vmem:[#allocation2 + $0xc9] sm:$0xff]  ;;  %v7186_v17 = vpop.f32.mrf.mxu0  ;;  %v7189_v47 = vpop.f32.mrf.mxu2 }
 0x218   : > { %v1044_v8 = vadd.f32 %v1023_v52, %v701_v32  ;;  %v7210_v32 = vld [vmem:[#allocation2 + $0xd9] sm:$0xff] }
 0x219   : > { %1406 = vst.msk [vmem:[#allocation4 + $0x90] sm:$0xff] %vm1387_vm3, %v1385_v21  ;;  %v7191_v26 = vpop.f32.mrf.mxu3  ;;  %v5573_v21 = vld [vmem:[%s8306_s2 + $0x38] sm:$0xff] }
 0x21a   : > { %v2843_v29 = vrot.slane %v5573_v21, 4  ;;  %5615 = vmatpush.msk.msrb.mxu3 %vm484_vm0, %v5573_v21  ;;  %5425 = vmatmul.msk.f32.gmra.mxu0 %vm343_vm1, %v7197_v18  ;;  %v8468_v21 = vld [vmem:[#allocation62_spill] sm:$0xff] }
 0x21b   : > { %5616 = vmatmul.msk.f32.vlgmr.msrb.gmra.mxu3 %vm343_vm1, %v6878_v51 }
 0x21c   : > { %v1364_v57 = vpop.f32.mrf.mxu1  ;;  %5594 = vmatpush.msk.msrb.mxu2 %vm484_vm0, %v2843_v29  ;;  %v7230_v29 = vld [vmem:[#allocation2 + $0xe1] sm:$0xff] }
 0x21d   : > { %v1365_v9 = vadd.f32 %v1364_v57, %v7087_v20  ;;  %5595 = vmatmul.msk.f32.vlgmr.msrb.gmra.mxu2 %vm343_vm1, %v6798_v49  ;;  %v5511_v57 = vld [vmem:[%s6026_s14 + $0x30] sm:$0xff] }
 0x21f   : > { %v1386_v42 = vadd.f32 %v1365_v9, %v1044_v8  ;;  %5442 = vmatmul.msk.f32.gmra.mxu1 %vm343_vm1, %v7184_v45  ;;  %v7212_v9 = vpop.f32.mrf.mxu0  ;;  %v7217_v34 = vpop.f32.mrf.mxu2 }
 0x221   : > { %1407 = vst.msk [vmem:[#allocation4 + $0x98] sm:$0xff] %vm1387_vm3, %v1386_v42  ;;  %v7219_v52 = vpop.f32.mrf.mxu3 }
 0x222   : > { %5532 = vmatmul.msk.f32.vlgmr.msrb.gmra.mxu0 %vm343_vm1, %v5511_v57  ;;  %v8469_v57 = vld [vmem:[#allocation65_spill] sm:$0xff] }
 0x223   : > { %5617 = vmatmul.msk.f32.gmra.mxu3 %vm343_vm1, %v6901_v35  ;;  %v5512_v35 = vld [vmem:[%s6026_s14 + $0x38] sm:$0xff] }
 0x224   : > { %v1994_v20 = vpop.f32.mrf.mxu1 }
 0x225   : > { %v1995_v8 = vadd.f32 %v1994_v20, %v7110_v10  ;;  %5596 = vmatmul.msk.f32.gmra.mxu2 %vm343_vm1, %v6821_v59  ;;  %v2416_v10 = vld [vmem:[#allocation4] sm:$0xff]  ;;  %v5636_v59 = vld [vmem:[%s8306_s2 + $0x40] sm:$0xff] }
 0x226   : > { %5678 = vmatpush.msk.msrb.mxu1 %vm484_vm0, %v5636_v59 }
 0x227   : > { %v2054_v49 = vadd.f32 %v1995_v8, %v8468_v21  ;;  %5443 = vmatmul.msk.f32.gmra.mxu1 %vm343_vm1, %v7210_v32  ;;  %v7232_v42 = vpop.f32.mrf.mxu0  ;;  %v2340_v8 = vadd.f32 %v7140_v25, %v7138_v14  ;;  %v2417_v25 = vld [vmem:[#allocation4 + $0x8] sm:$0xff] }
 0x229   : > { %v2396_v51 = vadd.f32 %v2337_v28, %v2054_v49  ;;  %v3185_v28 = vrot.slane %v5636_v59, 4  ;;  %v7246_v49 = vpop.f32.mrf.mxu2  ;;  %v5513_v59 = vld [vmem:[%s6026_s14 + $0x48] sm:$0xff] }
 0x22a   : > { %5533 = vmatmul.msk.f32.gmra.mxu0 %vm343_vm1, %v5512_v35 }
 0x22b   : > { %v2436_v1 = vadd.f32 %v2416_v10, %v2396_v51  ;;  %5657 = vmatpush.msk.msra.mxu0 %vm484_vm0, %v3185_v28  ;;  %5618 = vmatmul.msk.f32.gmra.mxu3 %vm343_vm1, %v6924_v5  ;;  %v8470_v28 = vld [vmem:[#allocation68_spill] sm:$0xff] }
 0x22c   : > { %v1997_v48 = vpop.f32.mrf.mxu1 }
 0x22d   : > { %2456 = vst.msk [vmem:[#allocation4] sm:$0xff] %vm1387_vm3, %v2436_v1  ;;  %v1998_v20 = vadd.f32 %v1997_v48, %v7135_v44  ;;  %v2351_v44 = vpop.f32.mrf.mxu3  ;;  %5597 = vmatmul.msk.f32.gmra.mxu2 %vm343_vm1, %v6842_v0  ;;  %v7254_v1 = vld [vmem:[#allocation2 + $0xf1] sm:$0xff] }
 0x22f   : > { %v2055_v21 = vadd.f32 %v1998_v20, %v8469_v57  ;;  %5444 = vmatmul.msk.f32.gmra.mxu1 %vm343_vm1, %v7230_v29  ;;  %v7256_v48 = vpop.f32.mrf.mxu0 }
 0x231   : > { %v2397_v14 = vadd.f32 %v2340_v8, %v2055_v21  ;;  %v2343_v8 = vadd.f32 %v7167_v13, %v7165_v41  ;;  %v2215_v35 = vpop.f32.mrf.mxu2  ;;  %v2418_v21 = vld [vmem:[#allocation4 + $0x10] sm:$0xff] }
 0x232   : > { %5534 = vmatmul.msk.f32.gmra.mxu0 %vm343_vm1, %v5513_v59  ;;  %v7271_v13 = vld [vmem:[#allocation2 + $0xf9] sm:$0xff]  ;;  %v2479_v59 = vld [vmem:[#allocation2 + $0x30] sm:$0xff] }
 0x233   : > { %v2437_v51 = vadd.f32 %v2417_v25, %v2397_v14  ;;  %5619 = vmatmul.msk.f32.gmra.mxu3 %vm343_vm1, %v6947_v19 }
 0x234   : > { %v2000_v10 = vpop.f32.mrf.mxu1 }
 0x235   : > { %2457 = vst.msk [vmem:[#allocation4 + $0x8] sm:$0xff] %vm1387_vm3, %v2437_v51  ;;  %v2001_v20 = vadd.f32 %v2000_v10, %v7162_v15  ;;  %v2354_v57 = vpop.f32.mrf.mxu3  ;;  %5598 = vmatmul.msk.f32.gmra.mxu2 %vm343_vm1, %v6862_v12  ;;  %v2346_v51 = vadd.f32 %v7191_v26, %v7189_v47  ;;  %v5514_v10 = vld [vmem:[%s6026_s14 + $0x50] sm:$0xff] }
 0x237   : > { %v2056_v0 = vadd.f32 %v2001_v20, %v8470_v28  ;;  %5445 = vmatmul.msk.f32.gmra.mxu1 %vm343_vm1, %v7254_v1  ;;  %v7273_v14 = vpop.f32.mrf.mxu0  ;;  %v2419_v20 = vld [vmem:[#allocation4 + $0x18] sm:$0xff] }
 0x239   : > { %v2398_v5 = vadd.f32 %v2343_v8, %v2056_v0  ;;  %v2218_v8 = vpop.f32.mrf.mxu2  ;;  %v2349_v0 = vadd.f32 %v7219_v52, %v7217_v34  ;;  %v2352_v52 = vadd.f32 %v2351_v44, %v7246_v49  ;;  %v2481_v44 = vld [vmem:[#allocation2 + $0x48] sm:$0xff] }
 0x23a   : > { %5535 = vmatmul.msk.f32.gmra.mxu0 %vm343_vm1, %v5514_v10  ;;  %v5516_v10 = vld [vmem:[%s6026_s14 + $0x68] sm:$0xff] }
 0x23b   : > { %v2438_v15 = vadd.f32 %v2418_v21, %v2398_v5  ;;  %5620 = vmatmul.msk.f32.gmra.mxu3 %vm343_vm1, %v6970_v3  ;;  %v5515_v5 = vld [vmem:[%s6026_s14 + $0x60] sm:$0xff]  ;;  %v2420_v21 = vld [vmem:[#allocation4 + $0x20] sm:$0xff] }
 0x23c   : > { %v2003_v41 = vpop.f32.mrf.mxu1 }
 0x23d   : > { %2458 = vst.msk [vmem:[#allocation4 + $0x10] sm:$0xff] %vm1387_vm3, %v2438_v15  ;;  %v2004_v25 = vadd.f32 %v2003_v41, %v7186_v17  ;;  %5599 = vmatmul.msk.f32.gmra.mxu2 %vm343_vm1, %v6884_v27  ;;  %v2357_v47 = vpop.f32.mrf.mxu3  ;;  %v2480_v41 = vld [vmem:[#allocation2 + $0x38] sm:$0xff] }
 0x23f   : > { %v2057_v12 = vadd.f32 %v2004_v25, %v6742_v2  ;;  %5446 = vmatmul.msk.f32.gmra.mxu1 %vm343_vm1, %v7271_v13  ;;  %v7288_v2 = vpop.f32.mrf.mxu0 }
 0x241   : > { %v2399_v19 = vadd.f32 %v2346_v51, %v2057_v12  ;;  %v2221_v25 = vpop.f32.mrf.mxu2  ;;  %v2421_v12 = vld [vmem:[#allocation4 + $0x28] sm:$0xff] }
 0x242   : > { %5536 = vmatmul.msk.f32.gmra.mxu0 %vm343_vm1, %v5515_v5  ;;  %v2358_v5 = vadd.f32 %v2357_v47, %v2218_v8  ;;  %v2483_v47 = vld [vmem:[#allocation2 + $0x60] sm:$0xff] }
 0x243   : > { %v2439_v17 = vadd.f32 %v2419_v20, %v2399_v19  ;;  %5621 = vmatmul.msk.f32.gmra.mxu3 %vm343_vm1, %v6993_v38  ;;  %v2355_v20 = vadd.f32 %v2354_v57, %v2215_v35  ;;  %v2482_v57 = vld [vmem:[#allocation2 + $0x50] sm:$0xff] }
 0x244   : > { %v2006_v26 = vpop.f32.mrf.mxu1 }
 0x245   : > { %2459 = vst.msk [vmem:[#allocation4 + $0x18] sm:$0xff] %vm1387_vm3, %v2439_v17  ;;  %v2007_v28 = vadd.f32 %v2006_v26, %v7212_v9  ;;  %5600 = vmatmul.msk.f32.gmra.mxu2 %vm343_vm1, %v6907_v33  ;;  %v2360_v51 = vpop.f32.mrf.mxu3  ;;  %v5517_v17 = vld [vmem:[%s6026_s14 + $0x78] sm:$0xff] }
 0x247   : > { %v2058_v27 = vadd.f32 %v2007_v28, %v6759_v60  ;;  %5553 = vmatmul.msk.f32.vlgmr.msra.gmra.mxu1 %vm343_vm1, %v2479_v59  ;;  %v7302_v34 = vpop.f32.mrf.mxu0  ;;  %v2422_v28 = vld [vmem:[#allocation4 + $0x30] sm:$0xff] }
 0x249   : > { %v2400_v3 = vadd.f32 %v2349_v0, %v2058_v27  ;;  %v5518_v27 = vld [vmem:[%s6026_s14 + $0x80] sm:$0xff] }
 0x24a   : > { %5537 = vmatmul.msk.f32.gmra.mxu0 %vm343_vm1, %v5516_v10 }
 0x24b   : > { %v2440_v9 = vadd.f32 %v2420_v21, %v2400_v3  ;;  %5622 = vmatmul.msk.f32.gmra.mxu3 %vm343_vm1, %v7016_v30 }
 0x24c   : > { %v2009_v15 = vpop.f32.mrf.mxu1 }
 0x24d   : > { %2460 = vst.msk [vmem:[#allocation4 + $0x20] sm:$0xff] %vm1387_vm3, %v2440_v9  ;;  %v2010_v60 = vadd.f32 %v2009_v15, %v7232_v42  ;;  %5601 = vmatmul.msk.f32.gmra.mxu2 %vm343_vm1, %v6930_v24  ;;  %v2224_v24 = vpop.f32.mrf.mxu2  ;;  %v2363_v59 = vpop.f32.mrf.mxu3  ;;  %v2423_v9 = vld [vmem:[#allocation4 + $0x38] sm:$0xff] }
 0x24f   : > { %v2059_v33 = vadd.f32 %v2010_v60, %v6786_v6  ;;  %5554 = vmatmul.msk.f32.gmra.mxu1 %vm343_vm1, %v2480_v41  ;;  %v7315_v19 = vpop.f32.mrf.mxu0  ;;  %v2361_v41 = vadd.f32 %v2360_v51, %v2221_v25  ;;  %v5519_v60 = vld [vmem:[%s6026_s14 + $0x90] sm:$0xff]  ;;  %v2484_v51 = vld [vmem:[#allocation2 + $0x68] sm:$0xff] }
 0x251   : > { %v2401_v38 = vadd.f32 %v2352_v52, %v2059_v33 }
 0x252   : > { %5538 = vmatmul.msk.f32.gmra.mxu0 %vm343_vm1, %v5517_v17 }
 0x253   : > { %v2441_v42 = vadd.f32 %v2421_v12, %v2401_v38  ;;  %5623 = vmatmul.msk.f32.gmra.mxu3 %vm343_vm1, %v7039_v43  ;;  %v2364_v12 = vadd.f32 %v2363_v59, %v2224_v24  ;;  %v5521_v59 = vld [vmem:[%s6026_s14 + $0xa8] sm:$0xff] }
 0x254   : > { %v2012_v49 = vpop.f32.mrf.mxu1 }
 0x255   : > { %2461 = vst.msk [vmem:[#allocation4 + $0x28] sm:$0xff] %vm1387_vm3, %v2441_v42  ;;  %v2013_v6 = vadd.f32 %v2012_v49, %v7256_v48  ;;  %5602 = vmatmul.msk.f32.gmra.mxu2 %vm343_vm1, %v6953_v53  ;;  %v2227_v43 = vpop.f32.mrf.mxu2  ;;  %v2366_v21 = vpop.f32.mrf.mxu3  ;;  %v5520_v42 = vld [vmem:[%s6026_s14 + $0x98] sm:$0xff] }
 0x256   : > { %v2367_v17 = vadd.f32 %v2366_v21, %v2227_v43  ;;  %v2487_v43 = vld [vmem:[#allocation2 + $0x90] sm:$0xff] }
 0x257   : > { %v2060_v26 = vadd.f32 %v2013_v6, %v6809_v62  ;;  %5555 = vmatmul.msk.f32.gmra.mxu1 %vm343_vm1, %v2481_v44  ;;  %v7327_v0 = vpop.f32.mrf.mxu0 }
 0x259   : > { %v2402_v30 = vadd.f32 %v2355_v20, %v2060_v26 }
 0x25a   : > { %5539 = vmatmul.msk.f32.gmra.mxu0 %vm343_vm1, %v5518_v27 }
 0x25b   : > { %v2442_v48 = vadd.f32 %v2422_v28, %v2402_v30  ;;  %5624 = vmatmul.msk.f32.gmra.mxu3 %vm343_vm1, %v7062_v36  ;;  %v2424_v36 = vld [vmem:[#allocation4 + $0x40] sm:$0xff]  ;;  %v2426_v30 = vld [vmem:[#allocation4 + $0x50] sm:$0xff] }
 0x25c   : > { %v2015_v35 = vpop.f32.mrf.mxu1 }
 0x25d   : > { %2462 = vst.msk [vmem:[#allocation4 + $0x30] sm:$0xff] %vm1387_vm3, %v2442_v48  ;;  %v2016_v62 = vadd.f32 %v2015_v35, %v7273_v14  ;;  %5603 = vmatmul.msk.f32.gmra.mxu2 %vm343_vm1, %v6976_v54  ;;  %v2230_v33 = vpop.f32.mrf.mxu2  ;;  %v2486_v48 = vld [vmem:[#allocation2 + $0x80] sm:$0xff] }
 0x25f   : > { %v2061_v3 = vadd.f32 %v2016_v62, %v6832_v63  ;;  %5556 = vmatmul.msk.f32.gmra.mxu1 %vm343_vm1, %v2482_v57  ;;  %v7339_v15 = vpop.f32.mrf.mxu0  ;;  %v5522_v62 = vld [vmem:[%s6026_s14 + $0xb0] sm:$0xff] }
 0x261   : > { %v2403_v53 = vadd.f32 %v2358_v5, %v2061_v3  ;;  %v2427_v3 = vld [vmem:[#allocation4 + $0x58] sm:$0xff] }
 0x262   : > { %5540 = vmatmul.msk.f32.gmra.mxu0 %vm343_vm1, %v5519_v60  ;;  %v2488_v60 = vld [vmem:[#allocation2 + $0x98] sm:$0xff] }
 0x263   : > { %v2443_v14 = vadd.f32 %v2423_v9, %v2403_v53  ;;  %5625 = vmatmul.msk.f32.gmra.mxu3 %vm343_vm1, %v7085_v50  ;;  %v2425_v50 = vld [vmem:[#allocation4 + $0x48] sm:$0xff] }
 0x264   : > { %v2018_v8 = vpop.f32.mrf.mxu1 }
 0x265   : > { %2463 = vst.msk [vmem:[#allocation4 + $0x38] sm:$0xff] %vm1387_vm3, %v2443_v14  ;;  %v2019_v63 = vadd.f32 %v2018_v8, %v7288_v2  ;;  %5604 = vmatmul.msk.f32.gmra.mxu2 %vm343_vm1, %v6999_v39  ;;  %v2369_v2 = vpop.f32.mrf.mxu3  ;;  %v2233_v26 = vpop.f32.mrf.mxu2  ;;  %v5523_v8 = vld [vmem:[%s6026_s14 + $0xc0] sm:$0xff] }
 0x266   : > { %v2370_v57 = vadd.f32 %v2369_v2, %v2230_v33 }
 0x267   : > { %v2062_v52 = vadd.f32 %v2019_v63, %v6852_v22  ;;  %5557 = vmatmul.msk.f32.gmra.mxu1 %vm343_vm1, %v2483_v47  ;;  %v7351_v38 = vpop.f32.mrf.mxu0  ;;  %v2428_v47 = vld [vmem:[#allocation4 + $0x60] sm:$0xff] }
 0x269   : > { %v2404_v54 = vadd.f32 %v2361_v41, %v2062_v52 }
 0x26a   : > { %5541 = vmatmul.msk.f32.gmra.mxu0 %vm343_vm1, %v5520_v42  ;;  %v8471_v42 = vld [vmem:[#allocation17_spill] sm:$0xff] }
 0x26b   : > { %v2444_v10 = vadd.f32 %v2424_v36, %v2404_v54  ;;  %5626 = vmatmul.msk.f32.gmra.mxu3 %vm343_vm1, %v7108_v56 }
 0x26c   : > { %v2021_v25 = vpop.f32.mrf.mxu1 }
 0x26d   : > { %2464 = vst.msk [vmem:[#allocation4 + $0x40] sm:$0xff] %vm1387_vm3, %v2444_v10  ;;  %v2022_v22 = vadd.f32 %v2021_v25, %v7302_v34  ;;  %5605 = vmatmul.msk.f32.gmra.mxu2 %vm343_vm1, %v7022_v4  ;;  %v2485_v34 = vld [vmem:[#allocation2 + $0x78] sm:$0xff]  ;;  %v2372_v24 = vpop.f32.mrf.mxu3 }
 0x26e   : > { %v2373_v9 = vadd.f32 %v2372_v24, %v2233_v26 }
 0x26f   : > { %v2063_v49 = vadd.f32 %v2022_v22, %v6872_v16  ;;  %5558 = vmatmul.msk.f32.gmra.mxu1 %vm343_vm1, %v2484_v51  ;;  %v7363_v20 = vpop.f32.mrf.mxu0  ;;  %v2489_v51 = vld [vmem:[#allocation2 + $0xa8] sm:$0xff] }
 0x271   : > { %v2405_v39 = vadd.f32 %v2364_v12, %v2063_v49 }
 0x272   : > { %5542 = vmatmul.msk.f32.gmra.mxu0 %vm343_vm1, %v5521_v59  ;;  %v8473_v59 = vld [vmem:[#allocation11_spill] sm:$0xff] }
 0x273   : > { %v2445_v44 = vadd.f32 %v2425_v50, %v2405_v39  ;;  %5627 = vmatmul.msk.f32.gmra.mxu3 %vm343_vm1, %v7133_v46  ;;  %v8472_v39 = vld [vmem:[#allocation18_spill] sm:$0xff]  ;;  %v2430_v50 = vld [vmem:[#allocation4 + $0x70] sm:$0xff] }
 0x274   : > { %v2024_v6 = vpop.f32.mrf.mxu1 }
 0x275   : > { %2465 = vst.msk [vmem:[#allocation4 + $0x48] sm:$0xff] %vm1387_vm3, %v2445_v44  ;;  %v2025_v16 = vadd.f32 %v2024_v6, %v7315_v19  ;;  %5606 = vmatmul.msk.f32.gmra.mxu2 %vm343_vm1, %v7045_v55  ;;  %v2236_v55 = vpop.f32.mrf.mxu2  ;;  %v2375_v46 = vpop.f32.mrf.mxu3 }
 0x276   : > { %v2376_v52 = vadd.f32 %v2375_v46, %v2236_v55 }
 0x277   : > { %v2064_v4 = vadd.f32 %v2025_v16, %v6895_v11  ;;  %5559 = vmatmul.msk.f32.gmra.mxu1 %vm343_vm1, %v2485_v34  ;;  %v7375_v35 = vpop.f32.mrf.mxu0  ;;  %v2490_v34 = vld [vmem:[#allocation2 + $0xb0] sm:$0xff] }
 0x279   : > { %v2406_v56 = vadd.f32 %v2367_v17, %v2064_v4 }
 0x27a   : > { %5543 = vmatmul.msk.f32.gmra.mxu0 %vm343_vm1, %v5522_v62 }
 0x27b   : > { %v2446_v19 = vadd.f32 %v2426_v30, %v2406_v56  ;;  %5628 = vmatmul.msk.f32.gmra.mxu3 %vm343_vm1, %v7160_v58  ;;  %v5526_v56 = vld [vmem:[%s6026_s14 + $0xe0] sm:$0xff]  ;;  %v8474_v30 = vld [vmem:[#allocation13_spill] sm:$0xff] }
 0x27c   : > { %v2027_v28 = vpop.f32.mrf.mxu1 }
 0x27d   : > { %2466 = vst.msk [vmem:[#allocation4 + $0x50] sm:$0xff] %vm1387_vm3, %v2446_v19  ;;  %v2028_v11 = vadd.f32 %v2027_v28, %v7327_v0  ;;  %5607 = vmatmul.msk.f32.gmra.mxu2 %vm343_vm1, %v7068_v23  ;;  %v2239_v58 = vpop.f32.mrf.mxu2  ;;  %v2378_v63 = vpop.f32.mrf.mxu3  ;;  %v2431_v19 = vld [vmem:[#allocation4 + $0x78] sm:$0xff] }
 0x27e   : > { %v2379_v22 = vadd.f32 %v2378_v63, %v2239_v58  ;;  %v5528_v58 = vld [vmem:[%s6026_s14 + $0xf8] sm:$0xff] }
 0x27f   : > { %v2065_v5 = vadd.f32 %v2028_v11, %v6918_v61  ;;  %5560 = vmatmul.msk.f32.gmra.mxu1 %vm343_vm1, %v2486_v48  ;;  %v7387_v21 = vpop.f32.mrf.mxu0 }
 0x281   : > { %v2407_v27 = vadd.f32 %v2370_v57, %v2065_v5  ;;  %v8475_v5 = vld [vmem:[#allocation12_spill] sm:$0xff] }
 0x282   : > { %5544 = vmatmul.msk.f32.gmra.mxu0 %vm343_vm1, %v5523_v8  ;;  %v8476_v8 = vld [vmem:[#allocation35_spill] sm:$0xff] }
 0x283   : > { %v2447_v0 = vadd.f32 %v2427_v3, %v2407_v27  ;;  %5629 = vmatmul.msk.f32.gmra.mxu3 %vm343_vm1, %v7184_v45  ;;  %v2429_v45 = vld [vmem:[#allocation4 + $0x68] sm:$0xff]  ;;  %v5527_v27 = vld [vmem:[%s6026_s14 + $0xf0] sm:$0xff] }
 0x284   : > { %v2030_v53 = vpop.f32.mrf.mxu1 }
 0x285   : > { %2467 = vst.msk [vmem:[#allocation4 + $0x58] sm:$0xff] %vm1387_vm3, %v2447_v0  ;;  %v2031_v61 = vadd.f32 %v2030_v53, %v7339_v15  ;;  %5608 = vmatmul.msk.f32.gmra.mxu2 %vm343_vm1, %v7091_v37  ;;  %v5524_v37 = vld [vmem:[%s6026_s14 + $0xc8] sm:$0xff]  ;;  %v2242_v2 = vpop.f32.mrf.mxu2  ;;  %v2432_v0 = vld [vmem:[#allocation4 + $0x80] sm:$0xff] }
 0x287   : > { %v2066_v14 = vadd.f32 %v2031_v61, %v6941_v31  ;;  %5561 = vmatmul.msk.f32.gmra.mxu1 %vm343_vm1, %v2487_v43  ;;  %v7401_v54 = vpop.f32.mrf.mxu0 }
 0x289   : > { %v2408_v23 = vadd.f32 %v2373_v9, %v2066_v14 }
 0x28a   : > { %5545 = vmatmul.msk.f32.gmra.mxu0 %vm343_vm1, %v5524_v37 }
 0x28b   : > { %v2448_v15 = vadd.f32 %v2428_v47, %v2408_v23  ;;  %5630 = vmatmul.msk.f32.gmra.mxu3 %vm343_vm1, %v7210_v32  ;;  %v2820_v47 = vld [vmem:[#allocation2 + $0x109] sm:$0xff] }
 0x28c   : > { %v2033_v41 = vpop.f32.mrf.mxu1 }
 0x28d   : > { %2468 = vst.msk [vmem:[#allocation4 + $0x60] sm:$0xff] %vm1387_vm3, %v2448_v15  ;;  %v2034_v31 = vadd.f32 %v2033_v41, %v7351_v38  ;;  %5609 = vmatmul.msk.f32.gmra.mxu2 %vm343_vm1, %v7118_v7  ;;  %v2381_v38 = vpop.f32.mrf.mxu3  ;;  %v5525_v7 = vld [vmem:[%s6026_s14 + $0xd8] sm:$0xff]  ;;  %v2245_v17 = vpop.f32.mrf.mxu2 }
 0x28e   : > { %v2382_v16 = vadd.f32 %v2381_v38, %v2242_v2  ;;  %v2433_v15 = vld [vmem:[#allocation4 + $0x88] sm:$0xff]  ;;  %v2434_v38 = vld [vmem:[#allocation4 + $0x90] sm:$0xff] }
 0x28f   : > { %v2067_v36 = vadd.f32 %v2034_v31, %v6964_v40  ;;  %5562 = vmatmul.msk.f32.gmra.mxu1 %vm343_vm1, %v2488_v60  ;;  %v7413_v12 = vpop.f32.mrf.mxu0  ;;  %v5593_v2 = vld [vmem:[%s6026_s14 + $0x111] sm:$0xff] }
 0x291   : > { %v2409_v10 = vadd.f32 %v2376_v52, %v2067_v36  ;;  %v2493_v52 = vld [vmem:[#allocation2 + $0xd8] sm:$0xff] }
 0x292   : > { %5546 = vmatmul.msk.f32.gmra.mxu0 %vm343_vm1, %v5525_v7 }
 0x293   : > { %v2449_v33 = vadd.f32 %v2429_v45, %v2409_v10  ;;  %5631 = vmatmul.msk.f32.gmra.mxu3 %vm343_vm1, %v7230_v29  ;;  %v8477_v10 = vld [vmem:[#allocation52_spill] sm:$0xff] }
 0x294   : > { %v2036_v25 = vpop.f32.mrf.mxu1 }
 0x295   : > { %2469 = vst.msk [vmem:[#allocation4 + $0x68] sm:$0xff] %vm1387_vm3, %v2449_v33  ;;  %v2037_v40 = vadd.f32 %v2036_v25, %v7363_v20  ;;  %5610 = vmatmul.msk.f32.gmra.mxu2 %vm343_vm1, %v8472_v39  ;;  %v2384_v24 = vpop.f32.mrf.mxu3  ;;  %v2248_v46 = vpop.f32.mrf.mxu2  ;;  %v5529_v33 = vld [vmem:[%s6026_s14 + $0x108] sm:$0xff]  ;;  %v2821_v25 = vld [vmem:[#allocation2 + $0x111] sm:$0xff] }
 0x296   : > { %v2385_v57 = vadd.f32 %v2384_v24, %v2245_v17  ;;  %v2495_v24 = vld [vmem:[#allocation2 + $0xf0] sm:$0xff] }
 0x297   : > { %v2068_v49 = vadd.f32 %v2037_v40, %v8471_v42  ;;  %5563 = vmatmul.msk.f32.gmra.mxu1 %vm343_vm1, %v2489_v51  ;;  %v7425_v26 = vpop.f32.mrf.mxu0 }
 0x299   : > { %v2410_v32 = vadd.f32 %v2379_v22, %v2068_v49  ;;  %v2494_v49 = vld [vmem:[#allocation2 + $0xe0] sm:$0xff] }
 0x29a   : > { %5547 = vmatmul.msk.f32.gmra.mxu0 %vm343_vm1, %v5526_v56  ;;  %v2496_v56 = vld [vmem:[#allocation2 + $0xf8] sm:$0xff] }
 0x29b   : > { %v2450_v44 = vadd.f32 %v2430_v50, %v2410_v32  ;;  %5632 = vmatmul.msk.f32.gmra.mxu3 %vm343_vm1, %v7254_v1  ;;  %v8478_v50 = vld [vmem:[#allocation31_spill] sm:$0xff] }
 0x29c   : > { %v2039_v6 = vpop.f32.mrf.mxu1 }
 0x29d   : > { %2470 = vst.msk [vmem:[#allocation4 + $0x70] sm:$0xff] %vm1387_vm3, %v2450_v44  ;;  %v2040_v20 = vadd.f32 %v2039_v6, %v7375_v35  ;;  %5611 = vmatmul.msk.f32.gmra.mxu2 %vm343_vm1, %v8474_v30  ;;  %v2491_v35 = vld [vmem:[#allocation2 + $0xc0] sm:$0xff]  ;;  %v2387_v3 = vpop.f32.mrf.mxu3  ;;  %v2251_v63 = vpop.f32.mrf.mxu2  ;;  %v5530_v6 = vld [vmem:[%s6026_s14 + $0x110] sm:$0xff] }
 0x29e   : > { %v2388_v9 = vadd.f32 %v2387_v3, %v2248_v46  ;;  %v5638_v30 = vld [vmem:[%s6026_s14 + $0x3a] sm:$0xff] }
 0x29f   : > { %v2069_v4 = vadd.f32 %v2040_v20, %v8473_v59  ;;  %5564 = vmatmul.msk.f32.gmra.mxu1 %vm343_vm1, %v2490_v34  ;;  %v7437_v62 = vpop.f32.mrf.mxu0  ;;  %v2435_v20 = vld [vmem:[#allocation4 + $0x98] sm:$0xff]  ;;  %v5637_v59 = vld [vmem:[%s6026_s14 + $0x32] sm:$0xff] }
 0x2a1   : > { %v2411_v29 = vadd.f32 %v2382_v16, %v2069_v4 }
 0x2a2   : > { %5548 = vmatmul.msk.f32.gmra.mxu0 %vm343_vm1, %v5527_v27  ;;  %v3144_v27 = vld [vmem:[#allocation2 + $0x32] sm:$0xff] }
 0x2a3   : > { %v2451_v28 = vadd.f32 %v2431_v19, %v2411_v29  ;;  %5633 = vmatmul.msk.f32.gmra.mxu3 %vm343_vm1, %v7271_v13 }
 0x2a4   : > { %v2042_v48 = vpop.f32.mrf.mxu1 }
 0x2a5   : > { %2471 = vst.msk [vmem:[#allocation4 + $0x78] sm:$0xff] %vm1387_vm3, %v2451_v28  ;;  %v2043_v11 = vadd.f32 %v2042_v48, %v7387_v21  ;;  %5612 = vmatmul.msk.f32.gmra.mxu2 %vm343_vm1, %v7197_v18  ;;  %v2492_v21 = vld [vmem:[#allocation2 + $0xc8] sm:$0xff]  ;;  %v2390_v41 = vpop.f32.mrf.mxu3  ;;  %v2254_v22 = vpop.f32.mrf.mxu2 }
 0x2a6   : > { %v5592_v18 = vld [vmem:[%s6026_s14 + $0x109] sm:$0xff]  ;;  %v2391_v36 = vadd.f32 %v2390_v41, %v2251_v63 }
 0x2a7   : > { %v2070_v55 = vadd.f32 %v2043_v11, %v8475_v5  ;;  %5565 = vmatmul.msk.f32.gmra.mxu1 %vm343_vm1, %v2491_v35  ;;  %v7449_v14 = vpop.f32.mrf.mxu0  ;;  %v2497_v28 = vld [vmem:[#allocation2 + $0x108] sm:$0xff] }
 0x2a8   : > { %v5639_v35 = vld [vmem:[%s6026_s14 + $0x4a] sm:$0xff] }
 0x2a9   : > { %v2412_v1 = vadd.f32 %v2385_v57, %v2070_v55  ;;  %v2498_v57 = vld [vmem:[#allocation2 + $0x110] sm:$0xff] }
 0x2aa   : > { %5549 = vmatmul.msk.f32.gmra.mxu0 %vm343_vm1, %v5528_v58  ;;  %v5640_v55 = vld [vmem:[%s6026_s14 + $0x52] sm:$0xff] }
 0x2ab   : > { %v2452_v53 = vadd.f32 %v2432_v0, %v2412_v1  ;;  %5634 = vmatmul.msk.f32.gmra.mxu3 %vm343_vm1, %v2820_v47  ;;  %v5641_v1 = vld [vmem:[%s6026_s14 + $0x62] sm:$0xff] }
 0x2ac   : > { %v2045_v43 = vpop.f32.mrf.mxu1 }
 0x2ad   : > { %2472 = vst.msk [vmem:[#allocation4 + $0x80] sm:$0xff] %vm1387_vm3, %v2452_v53  ;;  %v2046_v61 = vadd.f32 %v2045_v43, %v7401_v54  ;;  %5613 = vmatmul.msk.f32.gmra.mxu2 %vm343_vm1, %v5592_v18  ;;  %v2393_v42 = vpop.f32.mrf.mxu3  ;;  %v3145_v53 = vld [vmem:[#allocation2 + $0x3a] sm:$0xff]  ;;  %v3147_v18 = vld [vmem:[#allocation2 + $0x52] sm:$0xff] }
 0x2ae   : > { %v2394_v32 = vadd.f32 %v2393_v42, %v2254_v22 }
 0x2af   : > { %v2071_v23 = vadd.f32 %v2046_v61, %v8476_v8  ;;  %5566 = vmatmul.msk.f32.gmra.mxu1 %vm343_vm1, %v2492_v21  ;;  %v7460_v37 = vpop.f32.mrf.mxu0  ;;  %v5642_v21 = vld [vmem:[%s6026_s14 + $0x6a] sm:$0xff] }
 0x2b1   : > { %v2413_v13 = vadd.f32 %v2388_v9, %v2071_v23  ;;  %v3146_v9 = vld [vmem:[#allocation2 + $0x4a] sm:$0xff]  ;;  %v5643_v23 = vld [vmem:[%s6026_s14 + $0x7a] sm:$0xff] }
 0x2b2   : > { %5550 = vmatmul.msk.f32.gmra.mxu0 %vm343_vm1, %v5529_v33 }
 0x2b3   : > { %v2453_v60 = vadd.f32 %v2433_v15, %v2413_v13  ;;  %5635 = vmatmul.msk.f32.gmra.mxu3 %vm343_vm1, %v2821_v25  ;;  %v5644_v13 = vld [vmem:[%s6026_s14 + $0x82] sm:$0xff] }
 0x2b4   : > { %v2048_v31 = vpop.f32.mrf.mxu1  ;;  %v3148_v15 = vld [vmem:[#allocation2 + $0x62] sm:$0xff] }
 0x2b5   : > { %2473 = vst.msk [vmem:[#allocation4 + $0x88] sm:$0xff] %vm1387_vm3, %v2453_v60  ;;  %v2049_v54 = vadd.f32 %v2048_v31, %v7413_v12  ;;  %5614 = vmatmul.msk.f32.gmra.mxu2 %vm343_vm1, %v5593_v2  ;;  %v5645_v60 = vld [vmem:[%s6026_s14 + $0x92] sm:$0xff]  ;;  %v5647_v2 = vld [vmem:[%s6026_s14 + $0xaa] sm:$0xff] }
 0x2b7   : > { %v2072_v45 = vadd.f32 %v2049_v54, %v8477_v10  ;;  %5567 = vmatmul.msk.f32.gmra.mxu1 %vm343_vm1, %v2493_v52  ;;  %v7471_v39 = vpop.f32.mrf.mxu0  ;;  %v3149_v52 = vld [vmem:[#allocation2 + $0x6a] sm:$0xff] }
 0x2b9   : > { %v2414_v51 = vadd.f32 %v2391_v36, %v2072_v45  ;;  %v5646_v36 = vld [vmem:[%s6026_s14 + $0x9a] sm:$0xff] }
 0x2ba   : > { %5551 = vmatmul.msk.f32.gmra.mxu0 %vm343_vm1, %v5530_v6  ;;  %v3150_v45 = vld [vmem:[#allocation2 + $0x7a] sm:$0xff] }
 0x2bb   : > { %v2454_v40 = vadd.f32 %v2434_v38, %v2414_v51  ;;  %v3151_v51 = vld [vmem:[#allocation2 + $0x82] sm:$0xff] }
 0x2bc   : > { %v2051_v12 = vpop.f32.mrf.mxu1 }
 0x2bd   : > { %2474 = vst.msk [vmem:[#allocation4 + $0x90] sm:$0xff] %vm1387_vm3, %v2454_v40  ;;  %v2052_v7 = vadd.f32 %v2051_v12, %v7425_v26  ;;  %v5648_v40 = vld [vmem:[%s6026_s14 + $0xb2] sm:$0xff] }
 0x2be   : > { %v3152_v12 = vld [vmem:[#allocation2 + $0x92] sm:$0xff] }
 0x2bf   : > { %v2073_v44 = vadd.f32 %v2052_v7, %v8478_v50  ;;  %5568 = vmatmul.msk.f32.gmra.mxu1 %vm343_vm1, %v2494_v49  ;;  %v7480_v26 = vpop.f32.mrf.mxu0  ;;  %v5649_v49 = vld [vmem:[%s6026_s14 + $0xc2] sm:$0xff] }
 0x2c1   : > { %v2415_v34 = vadd.f32 %v2394_v32, %v2073_v44  ;;  %v3153_v32 = vld [vmem:[#allocation2 + $0x9a] sm:$0xff]  ;;  %v5650_v44 = vld [vmem:[%s6026_s14 + $0xca] sm:$0xff] }
 0x2c2   : > { %5658 = vmatmul.msk.f32.vlgmr.msra.gmra.mxu0 %vm343_vm1, %v5637_v59  ;;  %v3062_v59 = vpop.f32.mrf.mxu3 }
 0x2c3   : > { %v2455_v16 = vadd.f32 %v2435_v20, %v2415_v34  ;;  %v3154_v34 = vld [vmem:[#allocation2 + $0xaa] sm:$0xff] }
 0x2c4   : > { %v7477_v17 = vpop.f32.mrf.mxu1 }
 0x2c5   : > { %2475 = vst.msk [vmem:[#allocation4 + $0x98] sm:$0xff] %vm1387_vm3, %v2455_v16  ;;  %v2923_v16 = vpop.f32.mrf.mxu2 }
 0x2c7   : > { %5569 = vmatmul.msk.f32.gmra.mxu1 %vm343_vm1, %v2495_v24  ;;  %v7487_v29 = vpop.f32.mrf.mxu0  ;;  %v5651_v24 = vld [vmem:[%s6026_s14 + $0xda] sm:$0xff] }
 0x2ca   : > { %5659 = vmatmul.msk.f32.gmra.mxu0 %vm343_vm1, %v5638_v30  ;;  %v3155_v30 = vld [vmem:[#allocation2 + $0xb2] sm:$0xff] }
 0x2cc   : > { %v7485_v4 = vpop.f32.mrf.mxu1 }
 0x2cf   : > { %5570 = vmatmul.msk.f32.gmra.mxu1 %vm343_vm1, %v2496_v56  ;;  %v7494_v48 = vpop.f32.mrf.mxu0 }
 0x2d2   : > { %5660 = vmatmul.msk.f32.gmra.mxu0 %vm343_vm1, %v5639_v35  ;;  %v5652_v35 = vld [vmem:[%s6026_s14 + $0xe2] sm:$0xff] }
 0x2d4   : > { %v7492_v19 = vpop.f32.mrf.mxu1 }
 0x2d7   : > { %5571 = vmatmul.msk.f32.gmra.mxu1 %vm343_vm1, %v2497_v28  ;;  %v7501_v5 = vpop.f32.mrf.mxu0 }
 0x2da   : > { %5661 = vmatmul.msk.f32.gmra.mxu0 %vm343_vm1, %v5640_v55  ;;  %v3065_v55 = vpop.f32.mrf.mxu3 }
 0x2dc   : > { %v7499_v11 = vpop.f32.mrf.mxu1 }
 0x2df   : > { %5572 = vmatmul.msk.f32.gmra.mxu1 %vm343_vm1, %v2498_v57  ;;  %v7508_v3 = vpop.f32.mrf.mxu0  ;;  %v2926_v57 = vpop.f32.mrf.mxu2 }
 0x2e2   : > { %5662 = vmatmul.msk.f32.gmra.mxu0 %vm343_vm1, %v5641_v1  ;;  %v3156_v1 = vld [vmem:[#allocation2 + $0xc2] sm:$0xff] }
 0x2e4   : > { %v7506_v46 = vpop.f32.mrf.mxu1 }
 0x2e7   : > { %5679 = vmatmul.msk.f32.vlgmr.msrb.gmra.mxu1 %vm343_vm1, %v3144_v27  ;;  %v7515_v43 = vpop.f32.mrf.mxu0 }
 0x2ea   : > { %5663 = vmatmul.msk.f32.gmra.mxu0 %vm343_vm1, %v5642_v21 }
 0x2ec   : > { %v7513_v0 = vpop.f32.mrf.mxu1 }
 0x2ef   : > { %5680 = vmatmul.msk.f32.gmra.mxu1 %vm343_vm1, %v3145_v53  ;;  %v7522_v8 = vpop.f32.mrf.mxu0 }
 0x2f2   : > { %5664 = vmatmul.msk.f32.gmra.mxu0 %vm343_vm1, %v5643_v23  ;;  %v2929_v23 = vpop.f32.mrf.mxu2 }
 0x2f4   : > { %v7520_v61 = vpop.f32.mrf.mxu1 }
 0x2f7   : > { %5681 = vmatmul.msk.f32.gmra.mxu1 %vm343_vm1, %v3146_v9  ;;  %v7529_v47 = vpop.f32.mrf.mxu0  ;;  %v5653_v9 = vld [vmem:[%s6026_s14 + $0xf2] sm:$0xff] }
 0x2fa   : > { %5665 = vmatmul.msk.f32.gmra.mxu0 %vm343_vm1, %v5644_v13 }
 0x2fc   : > { %v7527_v58 = vpop.f32.mrf.mxu1 }
 0x2ff   : > { %5682 = vmatmul.msk.f32.gmra.mxu1 %vm343_vm1, %v3147_v18  ;;  %v7536_v41 = vpop.f32.mrf.mxu0  ;;  %v3068_v18 = vpop.f32.mrf.mxu3 }
 0x302   : > { %5666 = vmatmul.msk.f32.gmra.mxu0 %vm343_vm1, %v5645_v60 }
 0x304   : > { %v7534_v63 = vpop.f32.mrf.mxu1 }
 0x307   : > { %5683 = vmatmul.msk.f32.gmra.mxu1 %vm343_vm1, %v3148_v15  ;;  %v7543_v54 = vpop.f32.mrf.mxu0  ;;  %v3157_v15 = vld [vmem:[#allocation2 + $0xca] sm:$0xff] }
 0x30a   : > { %5667 = vmatmul.msk.f32.gmra.mxu0 %vm343_vm1, %v5646_v36  ;;  %v5654_v36 = vld [vmem:[%s6026_s14 + $0xfa] sm:$0xff] }
 0x30c   : > { %v7541_v31 = vpop.f32.mrf.mxu1 }
 0x30f   : > { %5684 = vmatmul.msk.f32.gmra.mxu1 %vm343_vm1, %v3149_v52  ;;  %v7550_v33 = vpop.f32.mrf.mxu0 }
 0x312   : > { %5668 = vmatmul.msk.f32.gmra.mxu0 %vm343_vm1, %v5647_v2  ;;  %v3158_v2 = vld [vmem:[#allocation2 + $0xda] sm:$0xff] }
 0x314   : > { %v7548_v10 = vpop.f32.mrf.mxu1 }
 0x317   : > { %5685 = vmatmul.msk.f32.gmra.mxu1 %vm343_vm1, %v3150_v45  ;;  %v7557_v38 = vpop.f32.mrf.mxu0 }
 0x31a   : > { %5669 = vmatmul.msk.f32.gmra.mxu0 %vm343_vm1, %v5648_v40 }
 0x31c   : > { %v7555_v25 = vpop.f32.mrf.mxu1 }
 0x31f   : > { %5686 = vmatmul.msk.f32.gmra.mxu1 %vm343_vm1, %v3151_v51  ;;  %v2649_v42 = vpop.f32.mrf.mxu0  ;;  %v2932_v51 = vpop.f32.mrf.mxu2 }
 0x322   : > { %5670 = vmatmul.msk.f32.gmra.mxu0 %vm343_vm1, %v5649_v49  ;;  %v5655_v49 = vld [vmem:[%s6026_s14 + $0x10a] sm:$0xff] }
 0x324   : > { %v7562_v22 = vpop.f32.mrf.mxu1 }
 0x327   : > { %5687 = vmatmul.msk.f32.gmra.mxu1 %vm343_vm1, %v3152_v12  ;;  %v2652_v50 = vpop.f32.mrf.mxu0 }
 0x32a   : > { %5671 = vmatmul.msk.f32.gmra.mxu0 %vm343_vm1, %v5650_v44 }
 0x32c   : > { %v7567_v7 = vpop.f32.mrf.mxu1 }
 0x32f   : > { %5688 = vmatmul.msk.f32.gmra.mxu1 %vm343_vm1, %v3153_v32  ;;  %v2655_v20 = vpop.f32.mrf.mxu0 }
 0x332   : > { %5672 = vmatmul.msk.f32.gmra.mxu0 %vm343_vm1, %v5651_v24  ;;  %v7599_v24 = vpop.f32.mrf.mxu2 }
 0x334   : > { %v7572_v6 = vpop.f32.mrf.mxu1 }
 0x337   : > { %5689 = vmatmul.msk.f32.gmra.mxu1 %vm343_vm1, %v3154_v34  ;;  %v2658_v28 = vpop.f32.mrf.mxu0 }
 0x33a   : > { %5673 = vmatmul.msk.f32.gmra.mxu0 %vm343_vm1, %v5652_v35 }
 0x33c   : > { %v7577_v56 = vpop.f32.mrf.mxu1 }
 0x33f   : > { %5690 = vmatmul.msk.f32.gmra.mxu1 %vm343_vm1, %v3155_v30  ;;  %v3265_v21 = vpop.f32.mrf.mxu0  ;;  %v5656_v30 = vld [vmem:[%s6026_s14 + $0x112] sm:$0xff] }
 0x342   : > { %5674 = vmatmul.msk.f32.gmra.mxu0 %vm343_vm1, %v5653_v9  ;;  %v3160_v9 = vld [vmem:[#allocation2 + $0xf2] sm:$0xff] }
 0x344   : > { %v2788_v27 = vpop.f32.mrf.mxu1 }
 0x345   : > { %v7582_v53 = vadd.f32 %v2788_v27, %v2649_v42  ;;  %v3071_v42 = vpop.f32.mrf.mxu3  ;;  %v3063_v27 = vadd.f32 %v3062_v59, %v2923_v16 }
 0x347   : > { %5691 = vmatmul.msk.f32.gmra.mxu1 %vm343_vm1, %v3156_v1  ;;  %v3268_v52 = vpop.f32.mrf.mxu0 }
 0x34a   : > { %5675 = vmatmul.msk.f32.gmra.mxu0 %vm343_vm1, %v5654_v36 }
 0x34c   : > { %v2791_v13 = vpop.f32.mrf.mxu1 }
 0x34d   : > { %v7587_v60 = vadd.f32 %v2791_v13, %v2652_v50  ;;  %v3159_v50 = vld [vmem:[#allocation2 + $0xe2] sm:$0xff]  ;;  %v7603_v35 = vpop.f32.mrf.mxu3 }
 0x34f   : > { %5692 = vmatmul.msk.f32.gmra.mxu1 %vm343_vm1, %v3157_v15  ;;  %v3271_v12 = vpop.f32.mrf.mxu0 }
 0x352   : > { %5676 = vmatmul.msk.f32.gmra.mxu0 %vm343_vm1, %v5655_v49  ;;  %v3066_v49 = vadd.f32 %v3065_v55, %v2926_v57  ;;  %v2747_v57 = vadd.f32 %v7492_v19, %v7460_v37  ;;  %v3069_v55 = vadd.f32 %v3068_v18, %v2929_v23  ;;  %v3486_v37 = vld [vmem:[#allocation4 + $0x10] sm:$0xff]  ;;  %v2750_v23 = vadd.f32 %v7499_v11, %v7471_v39  ;;  %v3487_v39 = vld [vmem:[#allocation4 + $0x18] sm:$0xff] }
 0x353   : > { %v3072_v18 = vadd.f32 %v3071_v42, %v2932_v51  ;;  %v2753_v11 = vadd.f32 %v7506_v46, %v7480_v26  ;;  %v3075_v51 = vadd.f32 %v7603_v35, %v7599_v24  ;;  %v3488_v46 = vld [vmem:[#allocation4 + $0x20] sm:$0xff]  ;;  %v2756_v24 = vadd.f32 %v7513_v0, %v7487_v29 }
 0x354   : > { %v2794_v45 = vpop.f32.mrf.mxu1  ;;  %v2759_v29 = vadd.f32 %v7520_v61, %v7494_v48  ;;  %v2762_v48 = vadd.f32 %v7527_v58, %v7501_v5  ;;  %v2765_v5 = vadd.f32 %v7534_v63, %v7508_v3  ;;  %v2768_v3 = vadd.f32 %v7541_v31, %v7515_v43 }
 0x355   : > { %v7592_v40 = vadd.f32 %v2794_v45, %v2655_v20  ;;  %v2741_v20 = vadd.f32 %v7477_v17, %v7437_v62  ;;  %v3484_v45 = vld [vmem:[#allocation4] sm:$0xff]  ;;  %v3161_v17 = vld [vmem:[#allocation2 + $0xfa] sm:$0xff]  ;;  %v2771_v43 = vadd.f32 %v7548_v10, %v7522_v8 }
 0x357   : > { %5693 = vmatmul.msk.f32.gmra.mxu1 %vm343_vm1, %v3158_v2  ;;  %v3274_v34 = vpop.f32.mrf.mxu0  ;;  %v3122_v13 = vadd.f32 %v3063_v27, %v2741_v20  ;;  %v2744_v2 = vadd.f32 %v7485_v4, %v7449_v14  ;;  %v7623_v20 = vld [vmem:[%s8307_s3] ss:$0 sm:$0xff]  ;;  %v3485_v4 = vld [vmem:[#allocation4 + $0x8] sm:$0xff] }
 0x359   : > { %v3123_v16 = vadd.f32 %v3066_v49, %v2744_v2 }
 0x35a   : > { %5677 = vmatmul.msk.f32.gmra.mxu0 %vm343_vm1, %v5656_v30  ;;  %v7615_v30 = vpop.f32.mrf.mxu3 }
 0x35c   : > { %v2797_v32 = vpop.f32.mrf.mxu1 }
 0x35d   : > { %v7597_v44 = vadd.f32 %v2797_v32, %v2658_v28  ;;  %v7613_v32 = vpop.f32.mrf.mxu2 }
 0x35e   : > { %v3078_v35 = vadd.f32 %v7615_v30, %v7613_v32 }
 0x35f   : > { %5694 = vmatmul.msk.f32.gmra.mxu1 %vm343_vm1, %v3159_v50  ;;  %v7608_v28 = vpop.f32.mrf.mxu0 }
 0x364   : > { %v3404_v1 = vpop.f32.mrf.mxu1 }
 0x365   : > { %v3405_v15 = vadd.f32 %v3404_v1, %v3265_v21 }
 0x367   : > { %v3464_v36 = vadd.f32 %v3405_v15, %v3122_v13  ;;  %5695 = vmatmul.msk.f32.gmra.mxu1 %vm343_vm1, %v3160_v9  ;;  %v7618_v21 = vpop.f32.mrf.mxu0  ;;  %v2941_v9 = vpop.f32.mrf.mxu2 }
 0x368   : > { %v3080_v13 = vpop.f32.mrf.mxu3 }
 0x369   : > { %v3504_v50 = vadd.f32 %v3484_v45, %v3464_v36  ;;  %v3162_v36 = vld [vmem:[#allocation2 + $0x10a] sm:$0xff]  ;;  %v3124_v45 = vadd.f32 %v3069_v55, %v2747_v57  ;;  %v3081_v0 = vadd.f32 %v3080_v13, %v2941_v9 }
 0x36b   : > { %3524 = vst.msk [vmem:[#allocation4] sm:$0xff] %vm1387_vm3, %v3504_v50 }
 0x36c   : > { %v3407_v62 = vpop.f32.mrf.mxu1 }
 0x36d   : > { %v3408_v59 = vadd.f32 %v3407_v62, %v3268_v52 }
 0x36f   : > { %v3465_v14 = vadd.f32 %v3408_v59, %v3123_v16  ;;  %5696 = vmatmul.msk.f32.gmra.mxu1 %vm343_vm1, %v3161_v17  ;;  %v3283_v19 = vpop.f32.mrf.mxu0 }
 0x371   : > { %v3505_v27 = vadd.f32 %v3485_v4, %v3465_v14  ;;  %v3163_v14 = vld [vmem:[#allocation2 + $0x112] sm:$0xff]  ;;  %v2944_v4 = vpop.f32.mrf.mxu2 }
 0x372   : > { %v3544_v1 = vld [vmem:[#allocation4] sm:$0xff] }
 0x373   : > { %v3568_v52 = vadd.f32 %v7623_v20, %v3544_v1  ;;  %3525 = vst.msk [vmem:[#allocation4 + $0x8] sm:$0xff] %vm1387_vm3, %v3505_v27  ;;  %v3083_v27 = vpop.f32.mrf.mxu3 }
 0x374   : > { %v3410_v15 = vpop.f32.mrf.mxu1  ;;  %v3084_v61 = vadd.f32 %v3083_v27, %v2944_v4 }
 0x375   : > { %v3588_v2 = vmax.f32 %v3568_v52, 0.0  ;;  %v3411_v49 = vadd.f32 %v3410_v15, %v3271_v12  ;;  %v3125_v12 = vadd.f32 %v3072_v18, %v2750_v23 }
 0x377   : > { %3608 = vst.msk [vmem:[#allocation3 + $0x1] sm:$0xff] %vm1387_vm3, %v3588_v2  ;;  %v3466_v50 = vadd.f32 %v3411_v49, %v3124_v45  ;;  %5697 = vmatmul.msk.f32.gmra.mxu1 %vm343_vm1, %v3162_v36  ;;  %v3286_v15 = vpop.f32.mrf.mxu0  ;;  %v3126_v45 = vadd.f32 %v3075_v51, %v2753_v11  ;;  %v3128_v51 = vadd.f32 %v3081_v0, %v2759_v29  ;;  %v3492_v29 = vld [vmem:[#allocation4 + $0x40] sm:$0xff] }
 0x379   : > { %v3506_v62 = vadd.f32 %v3486_v37, %v3466_v50  ;;  %v2947_v50 = vpop.f32.mrf.mxu2 }
 0x37a   : > { %v3545_v17 = vld [vmem:[#allocation4 + $0x8] sm:$0xff] }
 0x37b   : > { %v3569_v16 = vadd.f32 %v7623_v20, %v3545_v17  ;;  %3526 = vst.msk [vmem:[#allocation4 + $0x10] sm:$0xff] %vm1387_vm3, %v3506_v62  ;;  %v3086_v26 = vpop.f32.mrf.mxu3 }
 0x37c   : > { %v3413_v59 = vpop.f32.mrf.mxu1  ;;  %v3087_v58 = vadd.f32 %v3086_v26, %v2947_v50 }
 0x37d   : > { %v3589_v57 = vmax.f32 %v3569_v16, 0.0  ;;  %v3414_v55 = vadd.f32 %v3413_v59, %v3274_v34  ;;  %v3127_v16 = vadd.f32 %v3078_v35, %v2756_v24 }
 0x37f   : > { %3609 = vst.msk [vmem:[#allocation3 + $0x9] sm:$0xff] %vm1387_vm3, %v3589_v57  ;;  %v3467_v1 = vadd.f32 %v3414_v55, %v3125_v12  ;;  %5698 = vmatmul.msk.f32.gmra.mxu1 %vm343_vm1, %v3163_v14  ;;  %v3489_v57 = vld [vmem:[#allocation4 + $0x28] sm:$0xff] }
 0x381   : > { %v3507_v42 = vadd.f32 %v3487_v39, %v3467_v1  ;;  %v2950_v32 = vpop.f32.mrf.mxu2 }
 0x382   : > { %v3546_v52 = vld [vmem:[#allocation4 + $0x10] sm:$0xff] }
 0x383   : > { %v3570_v36 = vadd.f32 %v7623_v20, %v3546_v52  ;;  %3527 = vst.msk [vmem:[#allocation4 + $0x18] sm:$0xff] %vm1387_vm3, %v3507_v42  ;;  %v3089_v55 = vpop.f32.mrf.mxu3 }
 0x384   : > { %v3416_v34 = vpop.f32.mrf.mxu1  ;;  %v3090_v63 = vadd.f32 %v3089_v55, %v2950_v32 }
 0x385   : > { %v3590_v2 = vmax.f32 %v3570_v36, 0.0  ;;  %v3417_v49 = vadd.f32 %v3416_v34, %v7608_v28  ;;  %v3289_v28 = vpop.f32.mrf.mxu0  ;;  %v3490_v34 = vld [vmem:[#allocation4 + $0x30] sm:$0xff] }
 0x387   : > { %3610 = vst.msk [vmem:[#allocation3 + $0x19] sm:$0xff] %vm1387_vm3, %v3590_v2  ;;  %v3468_v37 = vadd.f32 %v3417_v49, %v3126_v45 }
 0x389   : > { %v3508_v23 = vadd.f32 %v3488_v46, %v3468_v37  ;;  %v2953_v45 = vpop.f32.mrf.mxu2  ;;  %v3129_v46 = vadd.f32 %v3084_v61, %v2762_v48 }
 0x38a   : > { %v3547_v18 = vld [vmem:[#allocation4 + $0x18] sm:$0xff] }
 0x38b   : > { %v3571_v62 = vadd.f32 %v7623_v20, %v3547_v18  ;;  %3528 = vst.msk [vmem:[#allocation4 + $0x20] sm:$0xff] %vm1387_vm3, %v3508_v23  ;;  %v3092_v49 = vpop.f32.mrf.mxu3  ;;  %v3491_v23 = vld [vmem:[#allocation4 + $0x38] sm:$0xff] }
 0x38c   : > { %v3419_v17 = vpop.f32.mrf.mxu1  ;;  %v3093_v31 = vadd.f32 %v3092_v49, %v2953_v45 }
 0x38d   : > { %v3591_v59 = vmax.f32 %v3571_v62, 0.0  ;;  %v3420_v14 = vadd.f32 %v3419_v17, %v7618_v21  ;;  %v3292_v52 = vpop.f32.mrf.mxu0 }
 0x38f   : > { %3611 = vst.msk [vmem:[#allocation3 + $0x21] sm:$0xff] %vm1387_vm3, %v3591_v59  ;;  %v3469_v12 = vadd.f32 %v3420_v14, %v3127_v16  ;;  %v3130_v16 = vadd.f32 %v3087_v58, %v2765_v5 }
 0x391   : > { %v3509_v30 = vadd.f32 %v3489_v57, %v3469_v12  ;;  %v2956_v59 = vpop.f32.mrf.mxu2 }
 0x392   : > { %v3548_v1 = vld [vmem:[#allocation4 + $0x20] sm:$0xff] }
 0x393   : > { %v3572_v39 = vadd.f32 %v7623_v20, %v3548_v1  ;;  %3529 = vst.msk [vmem:[#allocation4 + $0x28] sm:$0xff] %vm1387_vm3, %v3509_v30  ;;  %v3095_v12 = vpop.f32.mrf.mxu3 }
 0x394   : > { %v3422_v11 = vpop.f32.mrf.mxu1  ;;  %v3096_v8 = vadd.f32 %v3095_v12, %v2956_v59 }
 0x395   : > { %v3592_v42 = vmax.f32 %v3572_v39, 0.0  ;;  %v3423_v21 = vadd.f32 %v3422_v11, %v3283_v19  ;;  %v3295_v18 = vpop.f32.mrf.mxu0  ;;  %v3131_v39 = vadd.f32 %v3090_v63, %v2768_v3  ;;  %v3496_v63 = vld [vmem:[#allocation4 + $0x60] sm:$0xff] }
 0x397   : > { %3612 = vst.msk [vmem:[#allocation3 + $0x31] sm:$0xff] %vm1387_vm3, %v3592_v42  ;;  %v3470_v36 = vadd.f32 %v3423_v21, %v3128_v51 }
 0x399   : > { %v3510_v9 = vadd.f32 %v3490_v34, %v3470_v36  ;;  %v2959_v51 = vpop.f32.mrf.mxu2  ;;  %v3493_v36 = vld [vmem:[#allocation4 + $0x48] sm:$0xff] }
 0x39a   : > { %v3549_v13 = vld [vmem:[#allocation4 + $0x28] sm:$0xff] }
 0x39b   : > { %v3573_v2 = vadd.f32 %v7623_v20, %v3549_v13  ;;  %3530 = vst.msk [vmem:[#allocation4 + $0x30] sm:$0xff] %vm1387_vm3, %v3510_v9  ;;  %v3098_v21 = vpop.f32.mrf.mxu3  ;;  %v3132_v9 = vadd.f32 %v3093_v31, %v2771_v43 }
 0x39c   : > { %v3425_v37 = vpop.f32.mrf.mxu1 }
 0x39d   : > { %v3593_v19 = vmax.f32 %v3573_v2, 0.0  ;;  %v3426_v24 = vadd.f32 %v3425_v37, %v3286_v15  ;;  %v3298_v0 = vpop.f32.mrf.mxu0  ;;  %v3494_v37 = vld [vmem:[#allocation4 + $0x50] sm:$0xff] }
 0x39f   : > { %3613 = vst.msk [vmem:[#allocation3 + $0x39] sm:$0xff] %vm1387_vm3, %v3593_v19  ;;  %v3471_v35 = vadd.f32 %v3426_v24, %v3129_v46  ;;  %v2774_v46 = vadd.f32 %v7555_v25, %v7529_v47  ;;  %v2777_v47 = vadd.f32 %v7562_v22, %v7536_v41  ;;  %v3099_v25 = vadd.f32 %v3098_v21, %v2959_v51 }
 0x3a0   : > { %v2780_v41 = vadd.f32 %v7567_v7, %v7543_v54  ;;  %v2783_v54 = vadd.f32 %v7572_v6, %v7550_v33  ;;  %v2786_v33 = vadd.f32 %v7577_v56, %v7557_v38 }
 0x3a1   : > { %v3511_v4 = vadd.f32 %v3491_v23, %v3471_v35  ;;  %v2962_v10 = vpop.f32.mrf.mxu2  ;;  %v3133_v23 = vadd.f32 %v3096_v8, %v2774_v46  ;;  %v3134_v12 = vadd.f32 %v3099_v25, %v2777_v47 }
 0x3a2   : > { %v3550_v27 = vld [vmem:[#allocation4 + $0x30] sm:$0xff] }
 0x3a3   : > { %v3574_v62 = vadd.f32 %v7623_v20, %v3550_v27  ;;  %3531 = vst.msk [vmem:[#allocation4 + $0x38] sm:$0xff] %vm1387_vm3, %v3511_v4  ;;  %v3101_v49 = vpop.f32.mrf.mxu3  ;;  %v3495_v27 = vld [vmem:[#allocation4 + $0x58] sm:$0xff] }
 0x3a4   : > { %v3428_v17 = vpop.f32.mrf.mxu1  ;;  %v3102_v22 = vadd.f32 %v3101_v49, %v2962_v10 }
 0x3a5   : > { %v3594_v14 = vmax.f32 %v3574_v62, 0.0  ;;  %v3429_v15 = vadd.f32 %v3428_v17, %v3289_v28  ;;  %v3301_v61 = vpop.f32.mrf.mxu0 }
 0x3a7   : > { %3614 = vst.msk [vmem:[#allocation3 + $0x49] sm:$0xff] %vm1387_vm3, %v3594_v14  ;;  %v3472_v57 = vadd.f32 %v3429_v15, %v3130_v16 }
 0x3a9   : > { %v3512_v50 = vadd.f32 %v3492_v29, %v3472_v57  ;;  %v2965_v16 = vpop.f32.mrf.mxu2 }
 0x3aa   : > { %v3551_v26 = vld [vmem:[#allocation4 + $0x38] sm:$0xff] }
 0x3ab   : > { %v3575_v30 = vadd.f32 %v7623_v20, %v3551_v26  ;;  %3532 = vst.msk [vmem:[#allocation4 + $0x40] sm:$0xff] %vm1387_vm3, %v3512_v50  ;;  %v3104_v14 = vpop.f32.mrf.mxu3 }
 0x3ac   : > { %v3431_v1 = vpop.f32.mrf.mxu1  ;;  %v3105_v7 = vadd.f32 %v3104_v14, %v2965_v16  ;;  %v3500_v14 = vld [vmem:[#allocation4 + $0x80] sm:$0xff] }
 0x3ad   : > { %v3595_v11 = vmax.f32 %v3575_v30, 0.0  ;;  %v3432_v28 = vadd.f32 %v3431_v1, %v3292_v52  ;;  %v3304_v58 = vpop.f32.mrf.mxu0 }
 0x3af   : > { %3615 = vst.msk [vmem:[#allocation3 + $0x51] sm:$0xff] %vm1387_vm3, %v3595_v11  ;;  %v3473_v42 = vadd.f32 %v3432_v28, %v3131_v39  ;;  %v3135_v39 = vadd.f32 %v3102_v22, %v2780_v41 }
 0x3b1   : > { %v3513_v32 = vadd.f32 %v3493_v36, %v3473_v42  ;;  %v2968_v11 = vpop.f32.mrf.mxu2  ;;  %v3497_v36 = vld [vmem:[#allocation4 + $0x68] sm:$0xff] }
 0x3b2   : > { %v3552_v55 = vld [vmem:[#allocation4 + $0x40] sm:$0xff] }
 0x3b3   : > { %v3576_v34 = vadd.f32 %v7623_v20, %v3552_v55  ;;  %3533 = vst.msk [vmem:[#allocation4 + $0x48] sm:$0xff] %vm1387_vm3, %v3513_v32  ;;  %v3107_v42 = vpop.f32.mrf.mxu3 }
 0x3b4   : > { %v3434_v48 = vpop.f32.mrf.mxu1  ;;  %v3108_v6 = vadd.f32 %v3107_v42, %v2968_v11 }
 0x3b5   : > { %v3596_v52 = vmax.f32 %v3576_v34, 0.0  ;;  %v3435_v13 = vadd.f32 %v3434_v48, %v3295_v18  ;;  %v3307_v50 = vpop.f32.mrf.mxu0  ;;  %v3136_v48 = vadd.f32 %v3105_v7, %v2783_v54 }
 0x3b7   : > { %3616 = vst.msk [vmem:[#allocation3 + $0x61] sm:$0xff] %vm1387_vm3, %v3596_v52  ;;  %v3474_v2 = vadd.f32 %v3435_v13, %v3132_v9 }
 0x3b9   : > { %v3514_v45 = vadd.f32 %v3494_v37, %v3474_v2  ;;  %v2971_v52 = vpop.f32.mrf.mxu2  ;;  %v3498_v37 = vld [vmem:[#allocation4 + $0x70] sm:$0xff] }
 0x3ba   : > { %v3553_v19 = vld [vmem:[#allocation4 + $0x48] sm:$0xff] }
 0x3bb   : > { %v3577_v24 = vadd.f32 %v7623_v20, %v3553_v19  ;;  %3534 = vst.msk [vmem:[#allocation4 + $0x50] sm:$0xff] %vm1387_vm3, %v3514_v45  ;;  %v3110_v2 = vpop.f32.mrf.mxu3  ;;  %v3137_v19 = vadd.f32 %v3108_v6, %v2786_v33 }
 0x3bc   : > { %v3437_v35 = vpop.f32.mrf.mxu1 }
 0x3bd   : > { %v3597_v5 = vmax.f32 %v3577_v24, 0.0  ;;  %v3438_v18 = vadd.f32 %v3437_v35, %v3298_v0  ;;  %v3310_v32 = vpop.f32.mrf.mxu0 }
 0x3bf   : > { %3617 = vst.msk [vmem:[#allocation3 + $0x69] sm:$0xff] %vm1387_vm3, %v3597_v5  ;;  %v3475_v4 = vadd.f32 %v3438_v18, %v3133_v23  ;;  %v3499_v5 = vld [vmem:[#allocation4 + $0x78] sm:$0xff]  ;;  %v3111_v18 = vadd.f32 %v3110_v2, %v2971_v52 }
 0x3c1   : > { %v3515_v62 = vadd.f32 %v3495_v27, %v3475_v4  ;;  %v3138_v25 = vadd.f32 %v3111_v18, %v7582_v53 }
 0x3c2   : > { %v3554_v17 = vld [vmem:[#allocation4 + $0x50] sm:$0xff] }
 0x3c3   : > { %v3578_v59 = vadd.f32 %v7623_v20, %v3554_v17  ;;  %3535 = vst.msk [vmem:[#allocation4 + $0x58] sm:$0xff] %vm1387_vm3, %v3515_v62  ;;  %v3113_v38 = vpop.f32.mrf.mxu3 }
 0x3c4   : > { %v3440_v15 = vpop.f32.mrf.mxu1 }
 0x3c5   : > { %v3598_v57 = vmax.f32 %v3578_v59, 0.0  ;;  %v3441_v29 = vadd.f32 %v3440_v15, %v3301_v61  ;;  %v3313_v49 = vpop.f32.mrf.mxu0 }
 0x3c7   : > { %3618 = vst.msk [vmem:[#allocation3 + $0x79] sm:$0xff] %vm1387_vm3, %v3598_v57  ;;  %v3476_v3 = vadd.f32 %v3441_v29, %v3134_v12 }
 0x3c9   : > { %v3516_v26 = vadd.f32 %v3496_v63, %v3476_v3 }
 0x3ca   : > { %v3555_v0 = vld [vmem:[#allocation4 + $0x58] sm:$0xff] }
 0x3cb   : > { %v3579_v30 = vadd.f32 %v7623_v20, %v3555_v0  ;;  %3536 = vst.msk [vmem:[#allocation4 + $0x60] sm:$0xff] %vm1387_vm3, %v3516_v26  ;;  %v3116_v63 = vpop.f32.mrf.mxu3  ;;  %v3501_v0 = vld [vmem:[#allocation4 + $0x88] sm:$0xff] }
 0x3cc   : > { %v3443_v1 = vpop.f32.mrf.mxu1 }
 0x3cd   : > { %v3599_v28 = vmax.f32 %v3579_v30, 0.0  ;;  %v3444_v51 = vadd.f32 %v3443_v1, %v3304_v58  ;;  %v2974_v58 = vpop.f32.mrf.mxu2  ;;  %v3316_v16 = vpop.f32.mrf.mxu0  ;;  %v5945_v1 = vmov 0.0  }
 0x3ce   : > { %v3114_v15 = vadd.f32 %v3113_v38, %v2974_v58  ;;  %3629 = vst.msk [vmem:[#allocation3] sm:$0x1] %vm3628_vm4, %v5945_v1 }
 0x3cf   : > { %3619 = vst.msk [vmem:[#allocation3 + $0x81] sm:$0xff] %vm1387_vm3, %v3599_v28  ;;  %v3477_v21 = vadd.f32 %v3444_v51, %v3135_v39 }
 0x3d0   : > { %v3139_v41 = vadd.f32 %v3114_v15, %v7587_v60  ;;  %3630 = vst.msk [vmem:[#allocation3 + $0x18] sm:$0x1] %vm3628_vm4, %v5945_v1 }
 0x3d1   : > { %v3517_v43 = vadd.f32 %v3497_v36, %v3477_v21  ;;  %3631 = vst.msk [vmem:[#allocation3 + $0x30] sm:$0x1] %vm3628_vm4, %v5945_v1 }
 0x3d2   : > { %v3556_v31 = vld [vmem:[#allocation4 + $0x60] sm:$0xff]  ;;  %3632 = vst.msk [vmem:[#allocation3 + $0x48] sm:$0x1] %vm3628_vm4, %v5945_v1 }
 0x3d3   : > { %v3580_v55 = vadd.f32 %v7623_v20, %v3556_v31  ;;  %3537 = vst.msk [vmem:[#allocation4 + $0x68] sm:$0xff] %vm1387_vm3, %v3517_v43  ;;  %v3119_v7 = vpop.f32.mrf.mxu3  ;;  %v3502_v31 = vld [vmem:[#allocation4 + $0x90] sm:$0xff] }
 0x3d4   : > { %v3446_v34 = vpop.f32.mrf.mxu1  ;;  %3633 = vst.msk [vmem:[#allocation3 + $0x60] sm:$0x1] %vm3628_vm4, %v5945_v1 }
 0x3d5   : > { %v3600_v61 = vmax.f32 %v3580_v55, 0.0  ;;  %v3447_v9 = vadd.f32 %v3446_v34, %v3307_v50  ;;  %v2977_v29 = vpop.f32.mrf.mxu2  ;;  %v3319_v30 = vpop.f32.mrf.mxu0  ;;  %3634 = vst.msk [vmem:[#allocation3 + $0x78] sm:$0x1] %vm3628_vm4, %v5945_v1 }
 0x3d6   : > { %v3117_v39 = vadd.f32 %v3116_v63, %v2977_v29  ;;  %3635 = vst.msk [vmem:[#allocation3 + $0x90] sm:$0x1] %vm3628_vm4, %v5945_v1 }
 0x3d7   : > { %3620 = vst.msk [vmem:[#allocation3 + $0x91] sm:$0xff] %vm1387_vm3, %v3600_v61  ;;  %v3478_v13 = vadd.f32 %v3447_v9, %v3136_v48 }
 0x3d8   : > { %v3140_v42 = vadd.f32 %v3117_v39, %v7592_v40  ;;  %3636 = vst.msk [vmem:[#allocation3 + $0xa8] sm:$0x1] %vm3628_vm4, %v5945_v1 }
 0x3d9   : > { %v3518_v46 = vadd.f32 %v3498_v37, %v3478_v13  ;;  %3637 = vst.msk [vmem:[#allocation3 + $0xc0] sm:$0x1] %vm3628_vm4, %v5945_v1  ;;  %v3503_v37 = vld [vmem:[#allocation4 + $0x98] sm:$0xff] }
 0x3da   : > { %v3557_v8 = vld [vmem:[#allocation4 + $0x68] sm:$0xff]  ;;  %3638 = vst.msk [vmem:[#allocation3 + $0xd8] sm:$0x1] %vm3628_vm4, %v5945_v1 }
 0x3db   : > { %v3581_v10 = vadd.f32 %v7623_v20, %v3557_v8  ;;  %3538 = vst.msk [vmem:[#allocation4 + $0x70] sm:$0xff] %vm1387_vm3, %v3518_v46 }
 0x3dc   : > { %v3449_v45 = vpop.f32.mrf.mxu1  ;;  %3639 = vst.msk [vmem:[#allocation3 + $0x11] sm:$0x1] %vm3628_vm4, %v5945_v1 }
 0x3dd   : > { %v3601_v24 = vmax.f32 %v3581_v10, 0.0  ;;  %v3450_v35 = vadd.f32 %v3449_v45, %v3310_v32  ;;  %v2980_v54 = vpop.f32.mrf.mxu2  ;;  %v3322_v40 = vpop.f32.mrf.mxu0  ;;  %3640 = vst.msk [vmem:[#allocation3 + $0x29] sm:$0x1] %vm3628_vm4, %v5945_v1 }
 0x3de   : > { %v3120_v32 = vadd.f32 %v3119_v7, %v2980_v54  ;;  %3641 = vst.msk [vmem:[#allocation3 + $0x41] sm:$0x1] %vm3628_vm4, %v5945_v1 }
 0x3df   : > { %3621 = vst.msk [vmem:[#allocation3 + $0x99] sm:$0xff] %vm1387_vm3, %v3601_v24  ;;  %v3479_v23 = vadd.f32 %v3450_v35, %v3137_v19 }
 0x3e0   : > { %v3141_v9 = vadd.f32 %v3120_v32, %v7597_v44  ;;  %3642 = vst.msk [vmem:[#allocation3 + $0x59] sm:$0x1] %vm3628_vm4, %v5945_v1 }
 0x3e1   : > { %v3519_v4 = vadd.f32 %v3499_v5, %v3479_v23  ;;  %3643 = vst.msk [vmem:[#allocation3 + $0x71] sm:$0x1] %vm3628_vm4, %v5945_v1 }
 0x3e2   : > { %v3558_v56 = vld [vmem:[#allocation4 + $0x70] sm:$0xff]  ;;  %3644 = vst.msk [vmem:[#allocation3 + $0x89] sm:$0x1] %vm3628_vm4, %v5945_v1 }
 0x3e3   : > { %v3582_v27 = vadd.f32 %v7623_v20, %v3558_v56  ;;  %3539 = vst.msk [vmem:[#allocation4 + $0x78] sm:$0xff] %vm1387_vm3, %v3519_v4 }
 0x3e4   : > { %v3452_v47 = vpop.f32.mrf.mxu1  ;;  %3645 = vst.msk [vmem:[#allocation3 + $0xa1] sm:$0x1] %vm3628_vm4, %v5945_v1 }
 0x3e5   : > { %v3602_v62 = vmax.f32 %v3582_v27, 0.0  ;;  %v3453_v17 = vadd.f32 %v3452_v47, %v3313_v49  ;;  %3646 = vst.msk [vmem:[#allocation3 + $0xb9] sm:$0x1] %vm3628_vm4, %v5945_v1 }
 0x3e6   : > { %3647 = vst.msk [vmem:[#allocation3 + $0xd1] sm:$0x1] %vm3628_vm4, %v5945_v1 }
 0x3e7   : > { %3622 = vst.msk [vmem:[#allocation3 + $0xa9] sm:$0xff] %vm1387_vm3, %v3602_v62  ;;  %v3480_v59 = vadd.f32 %v3453_v17, %v3138_v25 }
 0x3e8   : > { %3648 = vst.msk [vmem:[#allocation3 + $0xe9] sm:$0x1] %vm3628_vm4, %v5945_v1 }
 0x3e9   : > { %v3520_v12 = vadd.f32 %v3500_v14, %v3480_v59 }
 0x3ea   : > { %v3559_v57 = vld [vmem:[#allocation4 + $0x78] sm:$0xff] }
 0x3eb   : > { %v3583_v3 = vadd.f32 %v7623_v20, %v3559_v57  ;;  %3540 = vst.msk [vmem:[#allocation4 + $0x80] sm:$0xff] %vm1387_vm3, %v3520_v12 }
 0x3ec   : > { %v3455_v50 = vpop.f32.mrf.mxu1 }
 0x3ed   : > { %v3603_v53 = vmax.f32 %v3583_v3, 0.0  ;;  %v3456_v22 = vadd.f32 %v3455_v50, %v3316_v16 }
 0x3ef   : > { %3623 = vst.msk [vmem:[#allocation3 + $0xb1] sm:$0xff] %vm1387_vm3, %v3603_v53  ;;  %v3481_v26 = vadd.f32 %v3456_v22, %v3139_v41 }
 0x3f1   : > { %v3521_v11 = vadd.f32 %v3501_v0, %v3481_v26 }
 0x3f2   : > { %v3560_v28 = vld [vmem:[#allocation4 + $0x80] sm:$0xff] }
 0x3f3   : > { %v3584_v60 = vadd.f32 %v7623_v20, %v3560_v28  ;;  %3541 = vst.msk [vmem:[#allocation4 + $0x88] sm:$0xff] %vm1387_vm3, %v3521_v11 }
 0x3f4   : > { %v3458_v51 = vpop.f32.mrf.mxu1 }
 0x3f5   : > { %v3604_v21 = vmax.f32 %v3584_v60, 0.0  ;;  %v3459_v36 = vadd.f32 %v3458_v51, %v3319_v30 }
 0x3f7   : > { %3624 = vst.msk [vmem:[#allocation3 + $0xc1] sm:$0xff] %vm1387_vm3, %v3604_v21  ;;  %v3482_v43 = vadd.f32 %v3459_v36, %v3140_v42 }
 0x3f9   : > { %v3522_v55 = vadd.f32 %v3502_v31, %v3482_v43 }
 0x3fa   : > { %v3561_v34 = vld [vmem:[#allocation4 + $0x88] sm:$0xff] }
 0x3fb   : > { %v3585_v48 = vadd.f32 %v7623_v20, %v3561_v34  ;;  %3542 = vst.msk [vmem:[#allocation4 + $0x90] sm:$0xff] %vm1387_vm3, %v3522_v55 }
 0x3fc   : > { %v3461_v61 = vpop.f32.mrf.mxu1 }
 0x3fd   : > { %v3605_v52 = vmax.f32 %v3585_v48, 0.0  ;;  %v3462_v13 = vadd.f32 %v3461_v61, %v3322_v40 }
 0x3ff   : > { %3625 = vst.msk [vmem:[#allocation3 + $0xc9] sm:$0xff] %vm1387_vm3, %v3605_v52  ;;  %v3483_v2 = vadd.f32 %v3462_v13, %v3141_v9 }
 0x401   : > { %v3523_v33 = vadd.f32 %v3503_v37, %v3483_v2 }
 0x402   : > { %v3562_v6 = vld [vmem:[#allocation4 + $0x90] sm:$0xff] }
 0x403   : > { %v3586_v44 = vadd.f32 %v7623_v20, %v3562_v6  ;;  %3543 = vst.msk [vmem:[#allocation4 + $0x98] sm:$0xff] %vm1387_vm3, %v3523_v33 }
 0x405   : > { %v3606_v46 = vmax.f32 %v3586_v44, 0.0 }
 0x407   : > { %3626 = vst.msk [vmem:[#allocation3 + $0xd9] sm:$0xff] %vm1387_vm3, %v3606_v46 }
 0x40a   : > { %v3563_v8 = vld [vmem:[#allocation4 + $0x98] sm:$0xff] }
 0x40b   : > { %v3587_v10 = vadd.f32 %v7623_v20, %v3563_v8  ;;  %3652 = sbr.rel (%p5699_p8) target bundleno = 1044 (0x414), region = 48 }
 0x40d   : > { %v3607_v45 = vmax.f32 %v3587_v10, 0.0 }
 0x40f   : > { %3627 = vst.msk [vmem:[#allocation3 + $0xe1] sm:$0xff] %vm1387_vm3, %v3607_v45 }
 0x410   : > { %vm3655_vm5 = vcmask 58368   ;;  %v5946_v49 = vmov 0.0  }
 0x411   : > { %3653 = vst.msk [vmem:[#allocation3] sm:$0xff] %vm1387_vm3, %v5946_v49 }
 0x412   : > { %3654 = vst.msk [vmem:[#allocation3 + $0x8] sm:$0xff] %vm1387_vm3, %v5946_v49 }
 0x413   : > { %3656 = vst.msk [vmem:[#allocation3 + $0x10] sm:$0x3] %vm3655_vm5, %v5946_v49 }
 0x414 PF: > { %p5700_p9 = scmp.ne.s32.totalorder %s5927_s21, 1 }
 0x416   : > { %3660 = sbr.rel (%p5700_p9) target bundleno = 1055 (0x41f), region = 52 }
 0x41b   : > { %vm3664_vm6 = vcmask 58368   ;;  %v5947_v19 = vmov 0.0  }
 0x41c   : > { %3662 = vst.msk [vmem:[#allocation3 + $0xd8] sm:$0xff] %vm1387_vm3, %v5947_v19 }
 0x41d   : > { %3663 = vst.msk [vmem:[#allocation3 + $0xe0] sm:$0xff] %vm1387_vm3, %v5947_v19 }
 0x41e   : > { %3665 = vst.msk [vmem:[#allocation3 + $0xe8] sm:$0x3] %vm3664_vm6, %v5947_v19 }
 0x41f PF: > { %v5701_v20 = vld [vmem:[%s8308_s4 + $0x8] sm:$0xff]  ;;  %v3682_v24 = vld [vmem:[%s8308_s4] sm:$0xff]  ;;  %v5734_v5 = vld [vmem:[%s8308_s4 + $0x10] sm:$0xff] }
 0x420   : > { %v3683_v35 = vld [vmem:[#allocation3 + $0x1] sm:$0xff]  ;;  %3764 = vmatpush.msra.mxu2 %v5701_v20  ;;  %3877 = vmatpush.msra.mxu3 %v3682_v24  ;;  %v3684_v58 = vld [vmem:[#allocation3 + $0x9] sm:$0xff]  ;;  %v7767_v38 = vld [vmem:[#allocation3 + $0x19] sm:$0xff] }
 0x421   : > { %v3666_v23 = vld [vmem:[#allocation3] sm:$0xff]  ;;  %5702 = vmatmul.msk.f32.vlgmr.msra.gmra.mxu2 %vm1387_vm3, %v3683_v35  ;;  %v3667_v4 = vld [vmem:[#allocation3 + $0x8] sm:$0xff]  ;;  %v3668_v56 = vld [vmem:[#allocation3 + $0x18] sm:$0xff] }
 0x422   : > { %v5752_v18 = vld [vmem:[%s8308_s4 + $0x20] sm:$0xff]  ;;  %5718 = vmatmul.msk.f32.vlgmr.msra.gmra.mxu3 %vm1387_vm3, %v3666_v23  ;;  %4008 = vmatpush.msrb.mxu2 %v5734_v5  ;;  %v7777_v25 = vld [vmem:[#allocation3 + $0x31] sm:$0xff]  ;;  %v7793_v59 = vld [vmem:[#allocation3 + $0x49] sm:$0xff] }
 0x423   : > { %4190 = vmatpush.msrb.mxu3 %v5752_v18  ;;  %v7772_v27 = vld [vmem:[#allocation3 + $0x21] sm:$0xff]  ;;  %v7779_v62 = vld [vmem:[#allocation3 + $0x30] sm:$0xff]  ;;  %v7785_v17 = vld [vmem:[#allocation3 + $0x39] sm:$0xff] }
 0x424   : > { %v3669_v47 = vld [vmem:[#allocation3 + $0x20] sm:$0xff]  ;;  %v7787_v16 = vld [vmem:[#allocation3 + $0x38] sm:$0xff]  ;;  %v7795_v14 = vld [vmem:[#allocation3 + $0x48] sm:$0xff] }
 0x425   : > { %v7801_v15 = vld [vmem:[#allocation3 + $0x51] sm:$0xff]  ;;  %v7809_v57 = vld [vmem:[#allocation3 + $0x61] sm:$0xff]  ;;  %v7817_v3 = vld [vmem:[#allocation3 + $0x69] sm:$0xff] }
 0x426   : > { %v7803_v12 = vld [vmem:[#allocation3 + $0x50] sm:$0xff]  ;;  %v7811_v29 = vld [vmem:[#allocation3 + $0x60] sm:$0xff]  ;;  %v7819_v63 = vld [vmem:[#allocation3 + $0x68] sm:$0xff] }
 0x427   : > { %v7825_v50 = vld [vmem:[#allocation3 + $0x79] sm:$0xff]  ;;  %v7833_v53 = vld [vmem:[#allocation3 + $0x81] sm:$0xff]  ;;  %v7841_v26 = vld [vmem:[#allocation3 + $0x91] sm:$0xff] }
 0x428   : > { %v7827_v41 = vld [vmem:[#allocation3 + $0x78] sm:$0xff]  ;;  %v7835_v22 = vld [vmem:[#allocation3 + $0x80] sm:$0xff]  ;;  %v7843_v0 = vld [vmem:[#allocation3 + $0x90] sm:$0xff] }
 0x429   : > { %5703 = vmatmul.msk.f32.gmra.mxu2 %vm1387_vm3, %v3684_v58  ;;  %v5803_v30 = vld [vmem:[%s8308_s4 + $0x38] sm:$0xff]  ;;  %v5802_v1 = vld [vmem:[%s8308_s4 + $0x30] sm:$0xff]  ;;  %v5785_v11 = vld [vmem:[%s8308_s4 + $0x28] sm:$0xff] }
 0x42a   : > { %5719 = vmatmul.msk.f32.gmra.mxu3 %vm1387_vm3, %v3667_v4  ;;  %4648 = vmatpush.msra.mxu2 %v5803_v30  ;;  %v5751_v39 = vld [vmem:[%s8308_s4 + $0x18] sm:$0xff]  ;;  %v5836_v42 = vld [vmem:[%s8308_s4 + $0x40] sm:$0xff]  ;;  %v7874_v21 = vld [vmem:[#allocation3 + $0xa9] sm:$0xff] }
 0x42b   : > { %4761 = vmatpush.msra.mxu3 %v5802_v1  ;;  %v7861_v28 = vld [vmem:[#allocation3 + $0x99] sm:$0xff]  ;;  %4303 = vmatpush.msrb.mxu0 %v5751_v39  ;;  %v7876_v36 = vld [vmem:[#allocation3 + $0xa8] sm:$0xff]  ;;  %v7884_v7 = vld [vmem:[#allocation3 + $0xb1] sm:$0xff] }
 0x42c   : > { %v7863_v60 = vld [vmem:[#allocation3 + $0x98] sm:$0xff]  ;;  %4434 = vmatpush.msra.mxu1 %v5785_v11  ;;  %5769 = vmatmul.msk.f32.vlgmr.msrb.gmra.mxu0 %vm1387_vm3, %v3668_v56  ;;  %v4354_v54 = vld [vmem:[#allocation3 + $0x22] sm:$0xff]  ;;  %v7886_v43 = vld [vmem:[#allocation3 + $0xb0] sm:$0xff] }
 0x42d   : > { %v4353_v51 = vld [vmem:[#allocation3 + $0x1a] sm:$0xff]  ;;  %4892 = vmatpush.msra.mxu0 %v5836_v42  ;;  %v7890_v31 = vld [vmem:[#allocation3 + $0x32] sm:$0xff]  ;;  %v3927_v32 = vld [vmem:[#allocation3 + $0x2] sm:$0xff] }
 0x42e   : > { %5786 = vmatmul.msk.f32.vlgmr.msra.gmra.mxu1 %vm1387_vm3, %v4353_v51  ;;  %v7900_v55 = vld [vmem:[#allocation3 + $0x3a] sm:$0xff]  ;;  %v3928_v61 = vld [vmem:[#allocation3 + $0xa] sm:$0xff]  ;;  %v7922_v37 = vld [vmem:[#allocation3 + $0x52] sm:$0xff] }
 0x42f   : > { %v7911_v9 = vld [vmem:[#allocation3 + $0x4a] sm:$0xff]  ;;  %v7933_v46 = vld [vmem:[#allocation3 + $0x62] sm:$0xff]  ;;  %v7956_v35 = vld [vmem:[#allocation3 + $0x7a] sm:$0xff] }
 0x430   : > { %v7944_v49 = vld [vmem:[#allocation3 + $0x6a] sm:$0xff]  ;;  %v7968_v58 = vld [vmem:[#allocation3 + $0x82] sm:$0xff]  ;;  %v7992_v39 = vld [vmem:[#allocation3 + $0x9a] sm:$0xff] }
 0x431   : > { %5704 = vmatmul.msk.f32.gmra.mxu2 %vm1387_vm3, %v7767_v38 }
 0x432   : > { %5720 = vmatmul.msk.f32.gmra.mxu3 %vm1387_vm3, %v3668_v56 }
 0x434   : > { %5770 = vmatmul.msk.f32.gmra.mxu0 %vm1387_vm3, %v3669_v47 }
 0x436   : > { %5787 = vmatmul.msk.f32.gmra.mxu1 %vm1387_vm3, %v4354_v54 }
 0x439   : > { %5705 = vmatmul.msk.f32.gmra.mxu2 %vm1387_vm3, %v7772_v27 }
 0x43a   : > { %5721 = vmatmul.msk.f32.gmra.mxu3 %vm1387_vm3, %v3669_v47 }
 0x43c   : > { %5771 = vmatmul.msk.f32.gmra.mxu0 %vm1387_vm3, %v7779_v62 }
 0x43e   : > { %5788 = vmatmul.msk.f32.gmra.mxu1 %vm1387_vm3, %v7890_v31 }
 0x441   : > { %5706 = vmatmul.msk.f32.gmra.mxu2 %vm1387_vm3, %v7777_v25 }
 0x442   : > { %5722 = vmatmul.msk.f32.gmra.mxu3 %vm1387_vm3, %v7779_v62 }
 0x444   : > { %5772 = vmatmul.msk.f32.gmra.mxu0 %vm1387_vm3, %v7787_v16 }
 0x446   : > { %5789 = vmatmul.msk.f32.gmra.mxu1 %vm1387_vm3, %v7900_v55 }
 0x449   : > { %5707 = vmatmul.msk.f32.gmra.mxu2 %vm1387_vm3, %v7785_v17 }
 0x44a   : > { %5723 = vmatmul.msk.f32.gmra.mxu3 %vm1387_vm3, %v7787_v16 }
 0x44c   : > { %5773 = vmatmul.msk.f32.gmra.mxu0 %vm1387_vm3, %v7795_v14 }
 0x44e   : > { %5790 = vmatmul.msk.f32.gmra.mxu1 %vm1387_vm3, %v7911_v9 }
 0x451   : > { %5708 = vmatmul.msk.f32.gmra.mxu2 %vm1387_vm3, %v7793_v59 }
 0x452   : > { %5724 = vmatmul.msk.f32.gmra.mxu3 %vm1387_vm3, %v7795_v14 }
 0x454   : > { %5774 = vmatmul.msk.f32.gmra.mxu0 %vm1387_vm3, %v7803_v12 }
 0x456   : > { %5791 = vmatmul.msk.f32.gmra.mxu1 %vm1387_vm3, %v7922_v37 }
 0x459   : > { %5709 = vmatmul.msk.f32.gmra.mxu2 %vm1387_vm3, %v7801_v15 }
 0x45a   : > { %5725 = vmatmul.msk.f32.gmra.mxu3 %vm1387_vm3, %v7803_v12 }
 0x45c   : > { %5775 = vmatmul.msk.f32.gmra.mxu0 %vm1387_vm3, %v7811_v29 }
 0x45e   : > { %5792 = vmatmul.msk.f32.gmra.mxu1 %vm1387_vm3, %v7933_v46 }
 0x461   : > { %5710 = vmatmul.msk.f32.gmra.mxu2 %vm1387_vm3, %v7809_v57 }
 0x462   : > { %5726 = vmatmul.msk.f32.gmra.mxu3 %vm1387_vm3, %v7811_v29 }
 0x464   : > { %5776 = vmatmul.msk.f32.gmra.mxu0 %vm1387_vm3, %v7819_v63 }
 0x466   : > { %5793 = vmatmul.msk.f32.gmra.mxu1 %vm1387_vm3, %v7944_v49 }
 0x469   : > { %5711 = vmatmul.msk.f32.gmra.mxu2 %vm1387_vm3, %v7817_v3 }
 0x46a   : > { %5727 = vmatmul.msk.f32.gmra.mxu3 %vm1387_vm3, %v7819_v63 }
 0x46c   : > { %5777 = vmatmul.msk.f32.gmra.mxu0 %vm1387_vm3, %v7827_v41 }
 0x46e   : > { %5794 = vmatmul.msk.f32.gmra.mxu1 %vm1387_vm3, %v7956_v35 }
 0x471   : > { %5712 = vmatmul.msk.f32.gmra.mxu2 %vm1387_vm3, %v7825_v50 }
 0x472   : > { %5728 = vmatmul.msk.f32.gmra.mxu3 %vm1387_vm3, %v7827_v41 }
 0x474   : > { %5778 = vmatmul.msk.f32.gmra.mxu0 %vm1387_vm3, %v7835_v22 }
 0x476   : > { %5795 = vmatmul.msk.f32.gmra.mxu1 %vm1387_vm3, %v7968_v58 }
 0x479   : > { %5713 = vmatmul.msk.f32.gmra.mxu2 %vm1387_vm3, %v7833_v53 }
 0x47a   : > { %5729 = vmatmul.msk.f32.gmra.mxu3 %vm1387_vm3, %v7835_v22 }
 0x47c   : > { %5779 = vmatmul.msk.f32.gmra.mxu0 %vm1387_vm3, %v7843_v0 }
 0x481   : > { %5714 = vmatmul.msk.f32.gmra.mxu2 %vm1387_vm3, %v7841_v26 }
 0x482   : > { %5730 = vmatmul.msk.f32.gmra.mxu3 %vm1387_vm3, %v7843_v0 }
 0x484   : > { %5780 = vmatmul.msk.f32.gmra.mxu0 %vm1387_vm3, %v7863_v60 }
 0x489   : > { %5715 = vmatmul.msk.f32.gmra.mxu2 %vm1387_vm3, %v7861_v28 }
 0x48a   : > { %5731 = vmatmul.msk.f32.gmra.mxu3 %vm1387_vm3, %v7863_v60 }
 0x48c   : > { %5781 = vmatmul.msk.f32.gmra.mxu0 %vm1387_vm3, %v7876_v36 }
 0x491   : > { %5716 = vmatmul.msk.f32.gmra.mxu2 %vm1387_vm3, %v7874_v21 }
 0x492   : > { %5732 = vmatmul.msk.f32.gmra.mxu3 %vm1387_vm3, %v7876_v36 }
 0x494   : > { %5782 = vmatmul.msk.f32.gmra.mxu0 %vm1387_vm3, %v7886_v43 }
 0x499   : > { %5717 = vmatmul.msk.f32.gmra.mxu2 %vm1387_vm3, %v7884_v7 }
 0x49a   : > { %5733 = vmatmul.msk.f32.gmra.mxu3 %vm1387_vm3, %v7886_v43 }
 0x4a1   : > { %5735 = vmatmul.msk.f32.vlgmr.msrb.gmra.mxu2 %vm1387_vm3, %v3927_v32 }
 0x4a2   : > { %5753 = vmatmul.msk.f32.vlgmr.msrb.gmra.mxu3 %vm1387_vm3, %v7767_v38 }
 0x4a4   : > { %v3766_v34 = vpop.f32.mrf.mxu2 }
 0x4a5   : > { %v3879_v40 = vpop.f32.mrf.mxu3 }
 0x4a6   : > { %v7907_v48 = vadd.f32 %v3879_v40, %v3766_v34 }
 0x4a9   : > { %5736 = vmatmul.msk.f32.gmra.mxu2 %vm1387_vm3, %v3928_v61  ;;  %v8016_v61 = vld [vmem:[#allocation3 + $0xb2] sm:$0xff] }
 0x4aa   : > { %5754 = vmatmul.msk.f32.gmra.mxu3 %vm1387_vm3, %v7772_v27  ;;  %v7980_v27 = vld [vmem:[#allocation3 + $0x92] sm:$0xff] }
 0x4ab   : > { %5796 = vmatmul.msk.f32.gmra.mxu1 %vm1387_vm3, %v7980_v27 }
 0x4ac   : > { %v3769_v52 = vpop.f32.mrf.mxu2 }
 0x4ad   : > { %v3882_v13 = vpop.f32.mrf.mxu3 }
 0x4ae   : > { %v7918_v2 = vadd.f32 %v3882_v13, %v3769_v52 }
 0x4b1   : > { %5737 = vmatmul.msk.f32.gmra.mxu2 %vm1387_vm3, %v4353_v51 }
 0x4b2   : > { %5755 = vmatmul.msk.f32.gmra.mxu3 %vm1387_vm3, %v7777_v25 }
 0x4b3   : > { %5797 = vmatmul.msk.f32.gmra.mxu1 %vm1387_vm3, %v7992_v39 }
 0x4b4   : > { %v3772_v33 = vpop.f32.mrf.mxu2 }
 0x4b5   : > { %v3885_v6 = vpop.f32.mrf.mxu3 }
 0x4b6   : > { %v7929_v44 = vadd.f32 %v3885_v6, %v3772_v33  ;;  %v8026_v6 = vld [vmem:[#allocation3 + $0xc0] sm:$0xff] }
 0x4b7   : > { %5783 = vmatmul.msk.f32.gmra.mxu0 %vm1387_vm3, %v8026_v6 }
 0x4b9   : > { %5738 = vmatmul.msk.f32.gmra.mxu2 %vm1387_vm3, %v4354_v54  ;;  %v8004_v54 = vld [vmem:[#allocation3 + $0xaa] sm:$0xff] }
 0x4ba   : > { %5756 = vmatmul.msk.f32.gmra.mxu3 %vm1387_vm3, %v7785_v17 }
 0x4bb   : > { %5798 = vmatmul.msk.f32.gmra.mxu1 %vm1387_vm3, %v8004_v54 }
 0x4bc   : > { %v3775_v8 = vpop.f32.mrf.mxu2 }
 0x4bd   : > { %v3888_v10 = vpop.f32.mrf.mxu3 }
 0x4be   : > { %v7940_v45 = vadd.f32 %v3888_v10, %v3775_v8  ;;  %v8030_v8 = vld [vmem:[#allocation3 + $0xc2] sm:$0xff] }
 0x4c1   : > { %5739 = vmatmul.msk.f32.gmra.mxu2 %vm1387_vm3, %v7890_v31 }
 0x4c2   : > { %5757 = vmatmul.msk.f32.gmra.mxu3 %vm1387_vm3, %v7793_v59 }
 0x4c3   : > { %5799 = vmatmul.msk.f32.gmra.mxu1 %vm1387_vm3, %v8016_v61 }
 0x4c4   : > { %v3778_v19 = vpop.f32.mrf.mxu2 }
 0x4c5   : > { %v3891_v20 = vpop.f32.mrf.mxu3 }
 0x4c6   : > { %v7952_v24 = vadd.f32 %v3891_v20, %v3778_v19 }
 0x4c9   : > { %5740 = vmatmul.msk.f32.gmra.mxu2 %vm1387_vm3, %v7900_v55 }
 0x4ca   : > { %5758 = vmatmul.msk.f32.gmra.mxu3 %vm1387_vm3, %v7801_v15 }
 0x4cb   : > { %5800 = vmatmul.msk.f32.gmra.mxu1 %vm1387_vm3, %v8030_v8 }
 0x4cc   : > { %v3781_v23 = vpop.f32.mrf.mxu2 }
 0x4cd   : > { %v3894_v5 = vpop.f32.mrf.mxu3 }
 0x4ce   : > { %v7964_v18 = vadd.f32 %v3894_v5, %v3781_v23  ;;  %v8040_v23 = vld [vmem:[#allocation3 + $0xc8] sm:$0xff] }
 0x4cf   : > { %8479 = vst [vmem:[#allocation14_spill] sm:$0xff] %v8040_v23  ;;  %5784 = vmatmul.msk.f32.gmra.mxu0 %vm1387_vm3, %v8040_v23  ;;  %v8044_v5 = vld [vmem:[#allocation3 + $0xca] sm:$0xff] }
 0x4d1   : > { %5741 = vmatmul.msk.f32.gmra.mxu2 %vm1387_vm3, %v7911_v9 }
 0x4d2   : > { %5759 = vmatmul.msk.f32.gmra.mxu3 %vm1387_vm3, %v7809_v57 }
 0x4d3   : > { %5801 = vmatmul.msk.f32.gmra.mxu1 %vm1387_vm3, %v8044_v5 }
 0x4d4   : > { %v3784_v4 = vpop.f32.mrf.mxu2 }
 0x4d5   : > { %v3897_v38 = vpop.f32.mrf.mxu3 }
 0x4d6   : > { %v7976_v56 = vadd.f32 %v3897_v38, %v3784_v4 }
 0x4d7   : > { %5837 = vmatmul.msk.f32.vlgmr.msra.gmra.mxu0 %vm1387_vm3, %v7890_v31 }
 0x4d9   : > { %5742 = vmatmul.msk.f32.gmra.mxu2 %vm1387_vm3, %v7922_v37 }
 0x4da   : > { %5760 = vmatmul.msk.f32.gmra.mxu3 %vm1387_vm3, %v7817_v3 }
 0x4dc   : > { %v3787_v47 = vpop.f32.mrf.mxu2 }
 0x4dd   : > { %v3900_v30 = vpop.f32.mrf.mxu3 }
 0x4de   : > { %v7988_v1 = vadd.f32 %v3900_v30, %v3787_v47  ;;  %v4305_v30 = vpop.f32.mrf.mxu0 }
 0x4df   : > { %5838 = vmatmul.msk.f32.gmra.mxu0 %vm1387_vm3, %v7900_v55 }
 0x4e1   : > { %5743 = vmatmul.msk.f32.gmra.mxu2 %vm1387_vm3, %v7933_v46 }
 0x4e2   : > { %5761 = vmatmul.msk.f32.gmra.mxu3 %vm1387_vm3, %v7825_v50 }
 0x4e4   : > { %v3790_v11 = vpop.f32.mrf.mxu2 }
 0x4e5   : > { %v3903_v51 = vpop.f32.mrf.mxu3 }
 0x4e6   : > { %v8000_v42 = vadd.f32 %v3903_v51, %v3790_v11  ;;  %v4436_v11 = vpop.f32.mrf.mxu1 }
 0x4e7   : > { %5839 = vmatmul.msk.f32.gmra.mxu0 %vm1387_vm3, %v7911_v9 }
 0x4e9   : > { %5744 = vmatmul.msk.f32.gmra.mxu2 %vm1387_vm3, %v7944_v49 }
 0x4ea   : > { %5762 = vmatmul.msk.f32.gmra.mxu3 %vm1387_vm3, %v7833_v53 }
 0x4ec   : > { %v3793_v32 = vpop.f32.mrf.mxu2 }
 0x4ed   : > { %v3906_v34 = vpop.f32.mrf.mxu3 }
 0x4ee   : > { %v8012_v40 = vadd.f32 %v3906_v34, %v3793_v32 }
 0x4ef   : > { %5840 = vmatmul.msk.f32.gmra.mxu0 %vm1387_vm3, %v7922_v37 }
 0x4f1   : > { %5745 = vmatmul.msk.f32.gmra.mxu2 %vm1387_vm3, %v7956_v35 }
 0x4f2   : > { %5763 = vmatmul.msk.f32.gmra.mxu3 %vm1387_vm3, %v7841_v26 }
 0x4f4   : > { %v3796_v52 = vpop.f32.mrf.mxu2 }
 0x4f5   : > { %v3909_v13 = vpop.f32.mrf.mxu3 }
 0x4f6   : > { %v8024_v33 = vadd.f32 %v3909_v13, %v3796_v52  ;;  %v4308_v52 = vpop.f32.mrf.mxu0  ;;  %v8062_v13 = vld [vmem:[#allocation3 + $0xc1] sm:$0xff] }
 0x4f7   : > { %5841 = vmatmul.msk.f32.gmra.mxu0 %vm1387_vm3, %v7933_v46 }
 0x4f9   : > { %5746 = vmatmul.msk.f32.gmra.mxu2 %vm1387_vm3, %v7968_v58 }
 0x4fa   : > { %5764 = vmatmul.msk.f32.gmra.mxu3 %vm1387_vm3, %v7861_v28 }
 0x4fc   : > { %v3799_v10 = vpop.f32.mrf.mxu2 }
 0x4fd   : > { %v3912_v19 = vpop.f32.mrf.mxu3 }
 0x4fe   : > { %v8038_v20 = vadd.f32 %v3912_v19, %v3799_v10 }
 0x4ff   : > { %5842 = vmatmul.msk.f32.gmra.mxu0 %vm1387_vm3, %v7944_v49 }
 0x501   : > { %5747 = vmatmul.msk.f32.gmra.mxu2 %vm1387_vm3, %v7980_v27 }
 0x502   : > { %5765 = vmatmul.msk.f32.gmra.mxu3 %vm1387_vm3, %v7874_v21 }
 0x504   : > { %v3802_v4 = vpop.f32.mrf.mxu2 }
 0x505   : > { %v3915_v38 = vpop.f32.mrf.mxu3 }
 0x506   : > { %v8052_v47 = vadd.f32 %v3915_v38, %v3802_v4  ;;  %v4439_v4 = vpop.f32.mrf.mxu1  ;;  %v4311_v38 = vpop.f32.mrf.mxu0 }
 0x507   : > { %5843 = vmatmul.msk.f32.gmra.mxu0 %vm1387_vm3, %v7956_v35 }
 0x508   : > { %8480 = vst [vmem:[#allocation38_spill] sm:$0xff] %v8052_v47 }
 0x509   : > { %5748 = vmatmul.msk.f32.gmra.mxu2 %vm1387_vm3, %v7992_v39 }
 0x50a   : > { %5766 = vmatmul.msk.f32.gmra.mxu3 %vm1387_vm3, %v7884_v7 }
 0x50c   : > { %v3805_v51 = vpop.f32.mrf.mxu2 }
 0x50d   : > { %v3918_v32 = vpop.f32.mrf.mxu3 }
 0x50e   : > { %v8060_v34 = vadd.f32 %v3918_v32, %v3805_v51  ;;  %v8072_v51 = vld [vmem:[#allocation3 + $0xc9] sm:$0xff]  ;;  %v4314_v23 = vpop.f32.mrf.mxu0 }
 0x50f   : > { %8483 = vst [vmem:[#allocation21_spill] sm:$0xff] %v8072_v51  ;;  %5844 = vmatmul.msk.f32.gmra.mxu0 %vm1387_vm3, %v7968_v58 }
 0x510   : > { %8481 = vst [vmem:[#allocation56_spill] sm:$0xff] %v8060_v34 }
 0x511   : > { %5749 = vmatmul.msk.f32.gmra.mxu2 %vm1387_vm3, %v8004_v54 }
 0x512   : > { %5767 = vmatmul.msk.f32.gmra.mxu3 %vm1387_vm3, %v8062_v13 }
 0x514   : > { %v3808_v31 = vpop.f32.mrf.mxu2 }
 0x515   : > { %v3921_v10 = vpop.f32.mrf.mxu3 }
 0x516   : > { %v8070_v19 = vadd.f32 %v3921_v10, %v3808_v31  ;;  %v4442_v31 = vpop.f32.mrf.mxu1 }
 0x517   : > { %5845 = vmatmul.msk.f32.gmra.mxu0 %vm1387_vm3, %v7980_v27 }
 0x518   : > { %8482 = vst [vmem:[#allocation37_spill] sm:$0xff] %v8070_v19 }
 0x519   : > { %5750 = vmatmul.msk.f32.gmra.mxu2 %vm1387_vm3, %v8016_v61 }
 0x51a   : > { %5768 = vmatmul.msk.f32.gmra.mxu3 %vm1387_vm3, %v8072_v51  ;;  %v4317_v51 = vpop.f32.mrf.mxu0 }
 0x51c   : > { %v3811_v55 = vpop.f32.mrf.mxu2 }
 0x51d   : > { %v3924_v32 = vpop.f32.mrf.mxu3 }
 0x51e   : > { %v8080_v34 = vadd.f32 %v3924_v32, %v3811_v55 }
 0x51f   : > { %5846 = vmatmul.msk.f32.gmra.mxu0 %vm1387_vm3, %v7992_v39 }
 0x520   : > { %8484 = vst [vmem:[#allocation15_spill] sm:$0xff] %v8080_v34 }
 0x521   : > { %5804 = vmatmul.msk.f32.vlgmr.msra.gmra.mxu2 %vm1387_vm3, %v7777_v25  ;;  %v4445_v25 = vpop.f32.mrf.mxu1 }
 0x522   : > { %5820 = vmatmul.msk.f32.vlgmr.msra.gmra.mxu3 %vm1387_vm3, %v7779_v62 }
 0x524   : > { %v4010_v9 = vpop.f32.mrf.mxu2 }
 0x525   : > { %v4192_v10 = vpop.f32.mrf.mxu3  ;;  %v4058_v19 = vadd.f32 %v4010_v9, %v7907_v48  ;;  %v4320_v48 = vpop.f32.mrf.mxu0 }
 0x526   : > { %v4306_v55 = vadd.f32 %v4305_v30, %v4192_v10 }
 0x527   : > { %4074 = vst.msk [vmem:[#allocation4] sm:$0xff] %vm1387_vm3, %v4058_v19  ;;  %5847 = vmatmul.msk.f32.gmra.mxu0 %vm1387_vm3, %v8004_v54 }
 0x528   : > { %v4484_v32 = vadd.f32 %v4436_v11, %v4306_v55 }
 0x529   : > { %5805 = vmatmul.msk.f32.gmra.mxu2 %vm1387_vm3, %v7785_v17 }
 0x52a   : > { %5821 = vmatmul.msk.f32.gmra.mxu3 %vm1387_vm3, %v7787_v16  ;;  %v4448_v16 = vpop.f32.mrf.mxu1 }
 0x52c   : > { %v4013_v37 = vpop.f32.mrf.mxu2 }
 0x52d   : > { %v4195_v62 = vpop.f32.mrf.mxu3  ;;  %v4059_v34 = vadd.f32 %v4013_v37, %v7918_v2  ;;  %v4323_v19 = vpop.f32.mrf.mxu0 }
 0x52e   : > { %v4500_v9 = vld [vmem:[#allocation4] sm:$0xff]  ;;  %v4309_v17 = vadd.f32 %v4308_v52, %v4195_v62 }
 0x52f   : > { %v4516_v47 = vadd.f32 %v4500_v9, %v4484_v32  ;;  %4075 = vst.msk [vmem:[#allocation4 + $0x8] sm:$0xff] %vm1387_vm3, %v4059_v34  ;;  %5848 = vmatmul.msk.f32.gmra.mxu0 %vm1387_vm3, %v8016_v61 }
 0x530   : > { %v4485_v30 = vadd.f32 %v4439_v4, %v4309_v17 }
 0x531   : > { %4532 = vst.msk [vmem:[#allocation4] sm:$0xff] %vm1387_vm3, %v4516_v47  ;;  %5806 = vmatmul.msk.f32.gmra.mxu2 %vm1387_vm3, %v7793_v59 }
 0x532   : > { %5822 = vmatmul.msk.f32.gmra.mxu3 %vm1387_vm3, %v7795_v14  ;;  %v4451_v52 = vpop.f32.mrf.mxu1 }
 0x534   : > { %v4016_v46 = vpop.f32.mrf.mxu2 }
 0x535   : > { %v4198_v2 = vpop.f32.mrf.mxu3  ;;  %v4060_v11 = vadd.f32 %v4016_v46, %v7929_v44  ;;  %v4326_v4 = vpop.f32.mrf.mxu0 }
 0x536   : > { %v4501_v34 = vld [vmem:[#allocation4 + $0x8] sm:$0xff]  ;;  %v4312_v59 = vadd.f32 %v4311_v38, %v4198_v2 }
 0x537   : > { %v4517_v10 = vadd.f32 %v4501_v34, %v4485_v30  ;;  %4076 = vst.msk [vmem:[#allocation4 + $0x10] sm:$0xff] %vm1387_vm3, %v4060_v11  ;;  %5849 = vmatmul.msk.f32.gmra.mxu0 %vm1387_vm3, %v8030_v8 }
 0x538   : > { %v4486_v44 = vadd.f32 %v4442_v31, %v4312_v59 }
 0x539   : > { %4533 = vst.msk [vmem:[#allocation4 + $0x8] sm:$0xff] %vm1387_vm3, %v4517_v10  ;;  %5807 = vmatmul.msk.f32.gmra.mxu2 %vm1387_vm3, %v7801_v15 }
 0x53a   : > { %5823 = vmatmul.msk.f32.gmra.mxu3 %vm1387_vm3, %v7803_v12  ;;  %v4454_v58 = vpop.f32.mrf.mxu1 }
 0x53c   : > { %v4019_v14 = vpop.f32.mrf.mxu2 }
 0x53d   : > { %v4201_v49 = vpop.f32.mrf.mxu3  ;;  %v4061_v47 = vadd.f32 %v4019_v14, %v7940_v45  ;;  %v4329_v31 = vpop.f32.mrf.mxu0 }
 0x53e   : > { %v4502_v55 = vld [vmem:[#allocation4 + $0x10] sm:$0xff]  ;;  %v4315_v15 = vadd.f32 %v4314_v23, %v4201_v49 }
 0x53f   : > { %v4518_v37 = vadd.f32 %v4502_v55, %v4486_v44  ;;  %4077 = vst.msk [vmem:[#allocation4 + $0x18] sm:$0xff] %vm1387_vm3, %v4061_v47  ;;  %5850 = vmatmul.msk.f32.gmra.mxu0 %vm1387_vm3, %v8044_v5  ;;  %v4825_v5 = vld [vmem:[#allocation3 + $0xda] sm:$0xff] }
 0x540   : > { %v4487_v35 = vadd.f32 %v4445_v25, %v4315_v15 }
 0x541   : > { %4534 = vst.msk [vmem:[#allocation4 + $0x10] sm:$0xff] %vm1387_vm3, %v4518_v37  ;;  %5808 = vmatmul.msk.f32.gmra.mxu2 %vm1387_vm3, %v7809_v57 }
 0x542   : > { %5824 = vmatmul.msk.f32.gmra.mxu3 %vm1387_vm3, %v7811_v29 }
 0x544   : > { %v4022_v12 = vpop.f32.mrf.mxu2 }
 0x545   : > { %v4204_v45 = vpop.f32.mrf.mxu3  ;;  %v4062_v38 = vadd.f32 %v4022_v12, %v7952_v24  ;;  %v4332_v9 = vpop.f32.mrf.mxu0 }
 0x546   : > { %v4503_v62 = vld [vmem:[#allocation4 + $0x18] sm:$0xff]  ;;  %v4318_v57 = vadd.f32 %v4317_v51, %v4204_v45 }
 0x547   : > { %v4519_v32 = vadd.f32 %v4503_v62, %v4487_v35  ;;  %4078 = vst.msk [vmem:[#allocation4 + $0x20] sm:$0xff] %vm1387_vm3, %v4062_v38  ;;  %5851 = vmatmul.msk.f32.gmra.mxu0 %vm1387_vm3, %v4825_v5 }
 0x548   : > { %v4488_v23 = vadd.f32 %v4448_v16, %v4318_v57 }
 0x549   : > { %4535 = vst.msk [vmem:[#allocation4 + $0x18] sm:$0xff] %vm1387_vm3, %v4519_v32  ;;  %5809 = vmatmul.msk.f32.gmra.mxu2 %vm1387_vm3, %v7817_v3  ;;  %v4457_v3 = vpop.f32.mrf.mxu1 }
 0x54a   : > { %5825 = vmatmul.msk.f32.gmra.mxu3 %vm1387_vm3, %v7819_v63 }
 0x54c   : > { %v4025_v29 = vpop.f32.mrf.mxu2 }
 0x54d   : > { %v4207_v24 = vpop.f32.mrf.mxu3  ;;  %v4063_v25 = vadd.f32 %v4025_v29, %v7964_v18  ;;  %v4335_v2 = vpop.f32.mrf.mxu0 }
 0x54e   : > { %v4504_v17 = vld [vmem:[#allocation4 + $0x20] sm:$0xff]  ;;  %v4321_v27 = vadd.f32 %v4320_v48, %v4207_v24 }
 0x54f   : > { %v4520_v46 = vadd.f32 %v4504_v17, %v4488_v23  ;;  %4079 = vst.msk [vmem:[#allocation4 + $0x28] sm:$0xff] %vm1387_vm3, %v4063_v25  ;;  %v4826_v23 = vld [vmem:[#allocation3 + $0xe2] sm:$0xff]  ;;  %v8485_v17 = vld [vmem:[#allocation38_spill] sm:$0xff] }
 0x550   : > { %v4489_v51 = vadd.f32 %v4451_v52, %v4321_v27  ;;  %5852 = vmatmul.msk.f32.gmra.mxu0 %vm1387_vm3, %v4826_v23 }
 0x551   : > { %4536 = vst.msk [vmem:[#allocation4 + $0x20] sm:$0xff] %vm1387_vm3, %v4520_v46  ;;  %5810 = vmatmul.msk.f32.gmra.mxu2 %vm1387_vm3, %v7825_v50 }
 0x552   : > { %5826 = vmatmul.msk.f32.gmra.mxu3 %vm1387_vm3, %v7827_v41  ;;  %v4460_v41 = vpop.f32.mrf.mxu1 }
 0x554   : > { %v4028_v63 = vpop.f32.mrf.mxu2 }
 0x555   : > { %v4210_v18 = vpop.f32.mrf.mxu3  ;;  %v4064_v16 = vadd.f32 %v4028_v63, %v7976_v56  ;;  %v4338_v10 = vpop.f32.mrf.mxu0 }
 0x556   : > { %v4505_v30 = vld [vmem:[#allocation4 + $0x28] sm:$0xff]  ;;  %v4324_v50 = vadd.f32 %v4323_v19, %v4210_v18 }
 0x557   : > { %v4521_v11 = vadd.f32 %v4505_v30, %v4489_v51  ;;  %4080 = vst.msk [vmem:[#allocation4 + $0x30] sm:$0xff] %vm1387_vm3, %v4064_v16  ;;  %v8488_v30 = vld [vmem:[#allocation56_spill] sm:$0xff] }
 0x558   : > { %v4490_v48 = vadd.f32 %v4454_v58, %v4324_v50 }
 0x559   : > { %4537 = vst.msk [vmem:[#allocation4 + $0x28] sm:$0xff] %vm1387_vm3, %v4521_v11  ;;  %5811 = vmatmul.msk.f32.gmra.mxu2 %vm1387_vm3, %v7833_v53 }
 0x55a   : > { %5827 = vmatmul.msk.f32.gmra.mxu3 %vm1387_vm3, %v7835_v22  ;;  %v4463_v49 = vpop.f32.mrf.mxu1 }
 0x55c   : > { %v4031_v39 = vpop.f32.mrf.mxu2 }
 0x55d   : > { %v4213_v56 = vpop.f32.mrf.mxu3  ;;  %v4065_v34 = vadd.f32 %v4031_v39, %v7988_v1  ;;  %v4341_v44 = vpop.f32.mrf.mxu0  ;;  %v4581_v39 = vld [vmem:[#allocation3 + $0xd9] sm:$0xff] }
 0x55e   : > { %v4506_v59 = vld [vmem:[#allocation4 + $0x30] sm:$0xff]  ;;  %v4327_v53 = vadd.f32 %v4326_v4, %v4213_v56  ;;  %v4563_v56 = vld [vmem:[#allocation3 + $0xd8] sm:$0xff] }
 0x55f   : > { %v4522_v14 = vadd.f32 %v4506_v59, %v4490_v48  ;;  %4081 = vst.msk [vmem:[#allocation4 + $0x38] sm:$0xff] %vm1387_vm3, %v4065_v34 }
 0x560   : > { %v4491_v1 = vadd.f32 %v4457_v3, %v4327_v53 }
 0x561   : > { %4538 = vst.msk [vmem:[#allocation4 + $0x30] sm:$0xff] %vm1387_vm3, %v4522_v14  ;;  %5812 = vmatmul.msk.f32.gmra.mxu2 %vm1387_vm3, %v7841_v26 }
 0x562   : > { %5828 = vmatmul.msk.f32.gmra.mxu3 %vm1387_vm3, %v7843_v0  ;;  %v4466_v8 = vpop.f32.mrf.mxu1 }
 0x564   : > { %v4034_v22 = vpop.f32.mrf.mxu2 }
 0x565   : > { %v4216_v54 = vpop.f32.mrf.mxu3  ;;  %v4066_v19 = vadd.f32 %v4034_v22, %v8000_v42  ;;  %v8169_v55 = vpop.f32.mrf.mxu0  ;;  %v8489_v22 = vld [vmem:[#allocation37_spill] sm:$0xff] }
 0x566   : > { %v4507_v47 = vld [vmem:[#allocation4 + $0x38] sm:$0xff]  ;;  %v4330_v26 = vadd.f32 %v4329_v31, %v4216_v54 }
 0x567   : > { %v4523_v52 = vadd.f32 %v4507_v47, %v4491_v1  ;;  %4082 = vst.msk [vmem:[#allocation4 + $0x40] sm:$0xff] %vm1387_vm3, %v4066_v19  ;;  %v4582_v19 = vld [vmem:[#allocation3 + $0xe1] sm:$0xff] }
 0x568   : > { %v4492_v61 = vadd.f32 %v4460_v41, %v4330_v26 }
 0x569   : > { %4539 = vst.msk [vmem:[#allocation4 + $0x38] sm:$0xff] %vm1387_vm3, %v4523_v52  ;;  %5813 = vmatmul.msk.f32.gmra.mxu2 %vm1387_vm3, %v7861_v28 }
 0x56a   : > { %5829 = vmatmul.msk.f32.gmra.mxu3 %vm1387_vm3, %v7863_v60 }
 0x56c   : > { %v4037_v0 = vpop.f32.mrf.mxu2 }
 0x56d   : > { %v4219_v42 = vpop.f32.mrf.mxu3  ;;  %v4067_v4 = vadd.f32 %v4037_v0, %v8012_v40  ;;  %v8180_v35 = vpop.f32.mrf.mxu0 }
 0x56e   : > { %v4508_v37 = vld [vmem:[#allocation4 + $0x40] sm:$0xff]  ;;  %v4333_v28 = vadd.f32 %v4332_v9, %v4219_v42 }
 0x56f   : > { %v4524_v15 = vadd.f32 %v4508_v37, %v4492_v61  ;;  %4083 = vst.msk [vmem:[#allocation4 + $0x48] sm:$0xff] %vm1387_vm3, %v4067_v4  ;;  %v8490_v4 = vld [vmem:[#allocation15_spill] sm:$0xff] }
 0x570   : > { %v4493_v12 = vadd.f32 %v4463_v49, %v4333_v28  ;;  %v4564_v49 = vld [vmem:[#allocation3 + $0xe0] sm:$0xff] }
 0x571   : > { %4540 = vst.msk [vmem:[#allocation4 + $0x40] sm:$0xff] %vm1387_vm3, %v4524_v15  ;;  %5814 = vmatmul.msk.f32.gmra.mxu2 %vm1387_vm3, %v7874_v21  ;;  %v4469_v21 = vpop.f32.mrf.mxu1 }
 0x572   : > { %5830 = vmatmul.msk.f32.gmra.mxu3 %vm1387_vm3, %v7876_v36 }
 0x574   : > { %v4040_v60 = vpop.f32.mrf.mxu2 }
 0x575   : > { %v4222_v40 = vpop.f32.mrf.mxu3  ;;  %v4068_v45 = vadd.f32 %v4040_v60, %v8024_v33  ;;  %v4350_v29 = vpop.f32.mrf.mxu0 }
 0x576   : > { %v4509_v38 = vld [vmem:[#allocation4 + $0x48] sm:$0xff]  ;;  %v4336_v62 = vadd.f32 %v4335_v2, %v4222_v40 }
 0x577   : > { %v4525_v31 = vadd.f32 %v4509_v38, %v4493_v12  ;;  %4084 = vst.msk [vmem:[#allocation4 + $0x50] sm:$0xff] %vm1387_vm3, %v4068_v45 }
 0x578   : > { %v4494_v32 = vadd.f32 %v4466_v8, %v4336_v62  ;;  %v4958_v62 = vld [vmem:[#allocation4] sm:$0xff] }
 0x579   : > { %4541 = vst.msk [vmem:[#allocation4 + $0x48] sm:$0xff] %vm1387_vm3, %v4525_v31  ;;  %5815 = vmatmul.msk.f32.gmra.mxu2 %vm1387_vm3, %v7884_v7 }
 0x57a   : > { %5831 = vmatmul.msk.f32.gmra.mxu3 %vm1387_vm3, %v7886_v43  ;;  %v4472_v43 = vpop.f32.mrf.mxu1 }
 0x57c   : > { %v4043_v36 = vpop.f32.mrf.mxu2 }
 0x57d   : > { %v4225_v33 = vpop.f32.mrf.mxu3  ;;  %v4069_v58 = vadd.f32 %v4043_v36, %v8038_v20  ;;  %v4894_v3 = vpop.f32.mrf.mxu0 }
 0x57e   : > { %v4510_v57 = vld [vmem:[#allocation4 + $0x50] sm:$0xff]  ;;  %v4339_v7 = vadd.f32 %v4338_v10, %v4225_v33 }
 0x57f   : > { %v4526_v24 = vadd.f32 %v4510_v57, %v4494_v32  ;;  %4085 = vst.msk [vmem:[#allocation4 + $0x58] sm:$0xff] %vm1387_vm3, %v4069_v58  ;;  %v8224_v57 = vld [vmem:[%s8309_s5] ss:$0 sm:$0xff] }
 0x580   : > { %v4495_v9 = vadd.f32 %v4469_v21, %v4339_v7 }
 0x581   : > { %4542 = vst.msk [vmem:[#allocation4 + $0x50] sm:$0xff] %vm1387_vm3, %v4526_v24  ;;  %5816 = vmatmul.msk.f32.gmra.mxu2 %vm1387_vm3, %v8062_v13  ;;  %v8486_v13 = vld [vmem:[#allocation21_spill] sm:$0xff]  ;;  %v4959_v24 = vld [vmem:[#allocation4 + $0x8] sm:$0xff] }
 0x582   : > { %5832 = vmatmul.msk.f32.gmra.mxu3 %vm1387_vm3, %v8026_v6  ;;  %v8487_v6 = vld [vmem:[#allocation14_spill] sm:$0xff]  ;;  %v4475_v41 = vpop.f32.mrf.mxu1 }
 0x584   : > { %v4046_v25 = vpop.f32.mrf.mxu2 }
 0x585   : > { %v4228_v20 = vpop.f32.mrf.mxu3  ;;  %v4070_v46 = vadd.f32 %v4046_v25, %v8485_v17  ;;  %v4897_v34 = vpop.f32.mrf.mxu0 }
 0x586   : > { %v4511_v27 = vld [vmem:[#allocation4 + $0x58] sm:$0xff]  ;;  %v4342_v18 = vadd.f32 %v4341_v44, %v4228_v20 }
 0x587   : > { %v4527_v63 = vadd.f32 %v4511_v27, %v4495_v9  ;;  %4086 = vst.msk [vmem:[#allocation4 + $0x60] sm:$0xff] %vm1387_vm3, %v4070_v46 }
 0x588   : > { %v4496_v2 = vadd.f32 %v4472_v43, %v4342_v18 }
 0x589   : > { %4543 = vst.msk [vmem:[#allocation4 + $0x58] sm:$0xff] %vm1387_vm3, %v4527_v63  ;;  %5817 = vmatmul.msk.f32.gmra.mxu2 %vm1387_vm3, %v8486_v13 }
 0x58a   : > { %5833 = vmatmul.msk.f32.gmra.mxu3 %vm1387_vm3, %v8487_v6  ;;  %v4478_v47 = vpop.f32.mrf.mxu1 }
 0x58c   : > { %v4049_v51 = vpop.f32.mrf.mxu2 }
 0x58d   : > { %v4231_v16 = vpop.f32.mrf.mxu3  ;;  %v4071_v11 = vadd.f32 %v4049_v51, %v8488_v30  ;;  %v4900_v26 = vpop.f32.mrf.mxu0 }
 0x58e   : > { %v4512_v50 = vld [vmem:[#allocation4 + $0x60] sm:$0xff]  ;;  %v4345_v10 = vadd.f32 %v8169_v55, %v4231_v16 }
 0x58f   : > { %v4528_v48 = vadd.f32 %v4512_v50, %v4496_v2  ;;  %4087 = vst.msk [vmem:[#allocation4 + $0x68] sm:$0xff] %vm1387_vm3, %v4071_v11  ;;  %v4961_v11 = vld [vmem:[#allocation4 + $0x18] sm:$0xff] }
 0x590   : > { %v4497_v53 = vadd.f32 %v4475_v41, %v4345_v10 }
 0x591   : > { %4544 = vst.msk [vmem:[#allocation4 + $0x60] sm:$0xff] %vm1387_vm3, %v4528_v48  ;;  %5818 = vmatmul.msk.f32.gmra.mxu2 %vm1387_vm3, %v4581_v39 }
 0x592   : > { %5834 = vmatmul.msk.f32.gmra.mxu3 %vm1387_vm3, %v4563_v56  ;;  %v4481_v28 = vpop.f32.mrf.mxu1 }
 0x594   : > { %v4052_v59 = vpop.f32.mrf.mxu2 }
 0x595   : > { %v4234_v14 = vpop.f32.mrf.mxu3  ;;  %v4072_v54 = vadd.f32 %v4052_v59, %v8489_v22  ;;  %v4903_v60 = vpop.f32.mrf.mxu0 }
 0x596   : > { %v4513_v1 = vld [vmem:[#allocation4 + $0x68] sm:$0xff]  ;;  %v4348_v52 = vadd.f32 %v8180_v35, %v4234_v14 }
 0x597   : > { %v4529_v44 = vadd.f32 %v4513_v1, %v4497_v53  ;;  %4088 = vst.msk [vmem:[#allocation4 + $0x70] sm:$0xff] %vm1387_vm3, %v4072_v54  ;;  %v4962_v53 = vld [vmem:[#allocation4 + $0x20] sm:$0xff] }
 0x598   : > { %v4498_v61 = vadd.f32 %v4478_v47, %v4348_v52 }
 0x599   : > { %4545 = vst.msk [vmem:[#allocation4 + $0x68] sm:$0xff] %vm1387_vm3, %v4529_v44  ;;  %5819 = vmatmul.msk.f32.gmra.mxu2 %vm1387_vm3, %v4582_v19 }
 0x59a   : > { %5835 = vmatmul.msk.f32.gmra.mxu3 %vm1387_vm3, %v4564_v49 }
 0x59c   : > { %v4055_v0 = vpop.f32.mrf.mxu2 }
 0x59d   : > { %v4237_v42 = vpop.f32.mrf.mxu3  ;;  %v4073_v55 = vadd.f32 %v4055_v0, %v8490_v4  ;;  %v4906_v58 = vpop.f32.mrf.mxu0  ;;  %v4963_v0 = vld [vmem:[#allocation4 + $0x28] sm:$0xff] }
 0x59e   : > { %v4514_v37 = vld [vmem:[#allocation4 + $0x70] sm:$0xff]  ;;  %v4351_v8 = vadd.f32 %v4350_v29, %v4237_v42 }
 0x59f   : > { %v4530_v15 = vadd.f32 %v4514_v37, %v4498_v61  ;;  %4089 = vst.msk [vmem:[#allocation4 + $0x78] sm:$0xff] %vm1387_vm3, %v4073_v55 }
 0x5a0   : > { %v4499_v45 = vadd.f32 %v4481_v28, %v4351_v8 }
 0x5a1   : > { %4546 = vst.msk [vmem:[#allocation4 + $0x70] sm:$0xff] %vm1387_vm3, %v4530_v15 }
 0x5a4   : > { %v4650_v40 = vpop.f32.mrf.mxu2 }
 0x5a5   : > { %v4763_v12 = vpop.f32.mrf.mxu3  ;;  %v4909_v27 = vpop.f32.mrf.mxu0 }
 0x5a6   : > { %v4764_v35 = vadd.f32 %v4763_v12, %v4650_v40  ;;  %v4515_v38 = vld [vmem:[#allocation4 + $0x78] sm:$0xff]  ;;  %v4964_v40 = vld [vmem:[#allocation4 + $0x30] sm:$0xff] }
 0x5a7   : > { %v4531_v31 = vadd.f32 %v4515_v38, %v4499_v45 }
 0x5a8   : > { %v4942_v5 = vadd.f32 %v4894_v3, %v4764_v35  ;;  %v4960_v3 = vld [vmem:[#allocation4 + $0x10] sm:$0xff] }
 0x5a9   : > { %4547 = vst.msk [vmem:[#allocation4 + $0x78] sm:$0xff] %vm1387_vm3, %v4531_v31 }
 0x5aa   : > { %v4974_v21 = vadd.f32 %v4958_v62, %v4942_v5 }
 0x5ac   : > { %4990 = vst.msk [vmem:[#allocation4] sm:$0xff] %vm1387_vm3, %v4974_v21  ;;  %v4653_v36 = vpop.f32.mrf.mxu2 }
 0x5ad   : > { %v4766_v33 = vpop.f32.mrf.mxu3  ;;  %v4912_v41 = vpop.f32.mrf.mxu0 }
 0x5ae   : > { %v4767_v32 = vadd.f32 %v4766_v33, %v4653_v36  ;;  %v4965_v33 = vld [vmem:[#allocation4 + $0x38] sm:$0xff] }
 0x5b0   : > { %v4943_v29 = vadd.f32 %v4897_v34, %v4767_v32 }
 0x5b2   : > { %v4975_v23 = vadd.f32 %v4959_v24, %v4943_v29 }
 0x5b3   : > { %v5006_v7 = vld [vmem:[#allocation4] sm:$0xff] }
 0x5b4   : > { %v5026_v43 = vadd.f32 %v8224_v57, %v5006_v7  ;;  %4991 = vst.msk [vmem:[#allocation4 + $0x8] sm:$0xff] %vm1387_vm3, %v4975_v23  ;;  %v4656_v25 = vpop.f32.mrf.mxu2 }
 0x5b5   : > { %v4769_v20 = vpop.f32.mrf.mxu3  ;;  %v4915_v19 = vpop.f32.mrf.mxu0 }
 0x5b6   : > { %v5042_v9 = vmax.f32 %v5026_v43, 0.0  ;;  %v4770_v17 = vadd.f32 %v4769_v20, %v4656_v25  ;;  %v4966_v20 = vld [vmem:[#allocation4 + $0x40] sm:$0xff] }
 0x5b8   : > { %5058 = vst.msk [vmem:[%s6036_s19] sm:$0xff] %vm1387_vm3, %v5042_v9  ;;  %v4944_v46 = vadd.f32 %v4900_v26, %v4770_v17 }
 0x5ba   : > { %v4976_v63 = vadd.f32 %v4960_v3, %v4944_v46 }
 0x5bb   : > { %v5007_v18 = vld [vmem:[#allocation4 + $0x8] sm:$0xff] }
 0x5bc   : > { %v5027_v13 = vadd.f32 %v8224_v57, %v5007_v18  ;;  %4992 = vst.msk [vmem:[#allocation4 + $0x10] sm:$0xff] %vm1387_vm3, %v4976_v63  ;;  %v4659_v6 = vpop.f32.mrf.mxu2 }
 0x5bd   : > { %v4772_v51 = vpop.f32.mrf.mxu3  ;;  %v4918_v28 = vpop.f32.mrf.mxu0 }
 0x5be   : > { %v5043_v16 = vmax.f32 %v5027_v13, 0.0  ;;  %v4773_v2 = vadd.f32 %v4772_v51, %v4659_v6  ;;  %v4967_v51 = vld [vmem:[#allocation4 + $0x48] sm:$0xff] }
 0x5c0   : > { %5059 = vst.msk [vmem:[%s6036_s19 + $0x8] sm:$0xff] %vm1387_vm3, %v5043_v16  ;;  %v4945_v30 = vadd.f32 %v4903_v60, %v4773_v2 }
 0x5c2   : > { %v4977_v50 = vadd.f32 %v4961_v11, %v4945_v30 }
 0x5c3   : > { %v5008_v39 = vld [vmem:[#allocation4 + $0x10] sm:$0xff] }
 0x5c4   : > { %v5028_v56 = vadd.f32 %v8224_v57, %v5008_v39  ;;  %4993 = vst.msk [vmem:[#allocation4 + $0x18] sm:$0xff] %vm1387_vm3, %v4977_v50  ;;  %v4662_v48 = vpop.f32.mrf.mxu2 }
 0x5c5   : > { %v4775_v34 = vpop.f32.mrf.mxu3  ;;  %v4921_v36 = vpop.f32.mrf.mxu0 }
 0x5c6   : > { %v5044_v10 = vmax.f32 %v5028_v56, 0.0  ;;  %v4776_v59 = vadd.f32 %v4775_v34, %v4662_v48  ;;  %v4968_v34 = vld [vmem:[#allocation4 + $0x50] sm:$0xff] }
 0x5c8   : > { %5060 = vst.msk [vmem:[%s6036_s19 + $0x10] sm:$0xff] %vm1387_vm3, %v5044_v10  ;;  %v4946_v14 = vadd.f32 %v4906_v58, %v4776_v59 }
 0x5ca   : > { %v4978_v22 = vadd.f32 %v4962_v53, %v4946_v14 }
 0x5cb   : > { %v5009_v54 = vld [vmem:[#allocation4 + $0x18] sm:$0xff] }
 0x5cc   : > { %v5029_v1 = vadd.f32 %v8224_v57, %v5009_v54  ;;  %4994 = vst.msk [vmem:[#allocation4 + $0x20] sm:$0xff] %vm1387_vm3, %v4978_v22  ;;  %v4665_v49 = vpop.f32.mrf.mxu2 }
 0x5cd   : > { %v4778_v44 = vpop.f32.mrf.mxu3  ;;  %v4924_v17 = vpop.f32.mrf.mxu0 }
 0x5ce   : > { %v5045_v47 = vmax.f32 %v5029_v1, 0.0  ;;  %v4779_v52 = vadd.f32 %v4778_v44, %v4665_v49  ;;  %v4969_v44 = vld [vmem:[#allocation4 + $0x58] sm:$0xff] }
 0x5d0   : > { %5061 = vst.msk [vmem:[%s6036_s19 + $0x18] sm:$0xff] %vm1387_vm3, %v5045_v47  ;;  %v4947_v26 = vadd.f32 %v4909_v27, %v4779_v52 }
 0x5d2   : > { %v4979_v42 = vadd.f32 %v4963_v0, %v4947_v26 }
 0x5d3   : > { %v5010_v61 = vld [vmem:[#allocation4 + $0x20] sm:$0xff] }
 0x5d4   : > { %v5030_v4 = vadd.f32 %v8224_v57, %v5010_v61  ;;  %4995 = vst.msk [vmem:[#allocation4 + $0x28] sm:$0xff] %vm1387_vm3, %v4979_v42  ;;  %v4668_v55 = vpop.f32.mrf.mxu2 }
 0x5d5   : > { %v4781_v37 = vpop.f32.mrf.mxu3  ;;  %v4927_v11 = vpop.f32.mrf.mxu0 }
 0x5d6   : > { %v5046_v15 = vmax.f32 %v5030_v4, 0.0  ;;  %v4782_v8 = vadd.f32 %v4781_v37, %v4668_v55 }
 0x5d8   : > { %5062 = vst.msk [vmem:[%s6036_s19 + $0x20] sm:$0xff] %vm1387_vm3, %v5046_v15  ;;  %v4948_v60 = vadd.f32 %v4912_v41, %v4782_v8  ;;  %v4970_v15 = vld [vmem:[#allocation4 + $0x60] sm:$0xff] }
 0x5da   : > { %v4980_v12 = vadd.f32 %v4964_v40, %v4948_v60 }
 0x5db   : > { %v5011_v45 = vld [vmem:[#allocation4 + $0x28] sm:$0xff] }
 0x5dc   : > { %v5031_v35 = vadd.f32 %v8224_v57, %v5011_v45  ;;  %4996 = vst.msk [vmem:[#allocation4 + $0x30] sm:$0xff] %vm1387_vm3, %v4980_v12  ;;  %v4671_v38 = vpop.f32.mrf.mxu2 }
 0x5dd   : > { %v4784_v31 = vpop.f32.mrf.mxu3 }
 0x5de   : > { %v5047_v5 = vmax.f32 %v5031_v35, 0.0  ;;  %v4785_v62 = vadd.f32 %v4784_v31, %v4671_v38  ;;  %v4971_v31 = vld [vmem:[#allocation4 + $0x68] sm:$0xff] }
 0x5e0   : > { %5063 = vst.msk [vmem:[%s6036_s19 + $0x28] sm:$0xff] %vm1387_vm3, %v5047_v5  ;;  %v4949_v21 = vadd.f32 %v4915_v19, %v4785_v62  ;;  %v4930_v19 = vpop.f32.mrf.mxu0 }
 0x5e2   : > { %v4981_v32 = vadd.f32 %v4965_v33, %v4949_v21 }
 0x5e3   : > { %v5012_v58 = vld [vmem:[#allocation4 + $0x30] sm:$0xff] }
 0x5e4   : > { %v5032_v29 = vadd.f32 %v8224_v57, %v5012_v58  ;;  %4997 = vst.msk [vmem:[#allocation4 + $0x38] sm:$0xff] %vm1387_vm3, %v4981_v32  ;;  %v4674_v24 = vpop.f32.mrf.mxu2 }
 0x5e5   : > { %v4787_v23 = vpop.f32.mrf.mxu3 }
 0x5e6   : > { %v5048_v7 = vmax.f32 %v5032_v29, 0.0  ;;  %v4788_v43 = vadd.f32 %v4787_v23, %v4674_v24  ;;  %v4972_v23 = vld [vmem:[#allocation4 + $0x70] sm:$0xff] }
 0x5e8   : > { %5064 = vst.msk [vmem:[%s6036_s19 + $0x30] sm:$0xff] %vm1387_vm3, %v5048_v7  ;;  %v4950_v25 = vadd.f32 %v4918_v28, %v4788_v43  ;;  %v4933_v37 = vpop.f32.mrf.mxu0 }
 0x5ea   : > { %v4982_v9 = vadd.f32 %v4966_v20, %v4950_v25 }
 0x5eb   : > { %v5013_v46 = vld [vmem:[#allocation4 + $0x38] sm:$0xff] }
 0x5ec   : > { %v5033_v27 = vadd.f32 %v8224_v57, %v5013_v46  ;;  %4998 = vst.msk [vmem:[#allocation4 + $0x40] sm:$0xff] %vm1387_vm3, %v4982_v9  ;;  %v4677_v3 = vpop.f32.mrf.mxu2 }
 0x5ed   : > { %v4790_v63 = vpop.f32.mrf.mxu3 }
 0x5ee   : > { %v5049_v18 = vmax.f32 %v5033_v27, 0.0  ;;  %v4791_v13 = vadd.f32 %v4790_v63, %v4677_v3  ;;  %v4973_v63 = vld [vmem:[#allocation4 + $0x78] sm:$0xff] }
 0x5f0   : > { %5065 = vst.msk [vmem:[%s6036_s19 + $0x38] sm:$0xff] %vm1387_vm3, %v5049_v18  ;;  %v4951_v6 = vadd.f32 %v4921_v36, %v4791_v13  ;;  %v4936_v62 = vpop.f32.mrf.mxu0 }
 0x5f2   : > { %v4983_v16 = vadd.f32 %v4967_v51, %v4951_v6 }
 0x5f3   : > { %v5014_v2 = vld [vmem:[#allocation4 + $0x40] sm:$0xff] }
 0x5f4   : > { %v5034_v30 = vadd.f32 %v8224_v57, %v5014_v2  ;;  %4999 = vst.msk [vmem:[#allocation4 + $0x48] sm:$0xff] %vm1387_vm3, %v4983_v16  ;;  %v4680_v50 = vpop.f32.mrf.mxu2 }
 0x5f5   : > { %v4793_v41 = vpop.f32.mrf.mxu3 }
 0x5f6   : > { %v5050_v39 = vmax.f32 %v5034_v30, 0.0  ;;  %v4794_v56 = vadd.f32 %v4793_v41, %v4680_v50 }
 0x5f8   : > { %5066 = vst.msk [vmem:[%s6036_s19 + $0x40] sm:$0xff] %vm1387_vm3, %v5050_v39  ;;  %v4952_v48 = vadd.f32 %v4924_v17, %v4794_v56  ;;  %v4939_v20 = vpop.f32.mrf.mxu0 }
 0x5fa   : > { %v4984_v10 = vadd.f32 %v4968_v34, %v4952_v48 }
 0x5fb   : > { %v5015_v59 = vld [vmem:[#allocation4 + $0x48] sm:$0xff] }
 0x5fc   : > { %v5035_v14 = vadd.f32 %v8224_v57, %v5015_v59  ;;  %5000 = vst.msk [vmem:[#allocation4 + $0x50] sm:$0xff] %vm1387_vm3, %v4984_v10  ;;  %v4683_v53 = vpop.f32.mrf.mxu2 }
 0x5fd   : > { %v4796_v22 = vpop.f32.mrf.mxu3 }
 0x5fe   : > { %v5051_v54 = vmax.f32 %v5035_v14, 0.0  ;;  %v4797_v1 = vadd.f32 %v4796_v22, %v4683_v53 }
 0x600   : > { %5067 = vst.msk [vmem:[%s6036_s19 + $0x48] sm:$0xff] %vm1387_vm3, %v5051_v54  ;;  %v4953_v49 = vadd.f32 %v4927_v11, %v4797_v1 }
 0x602   : > { %v4985_v47 = vadd.f32 %v4969_v44, %v4953_v49 }
 0x603   : > { %v5016_v52 = vld [vmem:[#allocation4 + $0x50] sm:$0xff] }
 0x604   : > { %v5036_v26 = vadd.f32 %v8224_v57, %v5016_v52  ;;  %5001 = vst.msk [vmem:[#allocation4 + $0x58] sm:$0xff] %vm1387_vm3, %v4985_v47  ;;  %v4686_v0 = vpop.f32.mrf.mxu2 }
 0x605   : > { %v4799_v42 = vpop.f32.mrf.mxu3 }
 0x606   : > { %v5052_v61 = vmax.f32 %v5036_v26, 0.0  ;;  %v4800_v4 = vadd.f32 %v4799_v42, %v4686_v0 }
 0x608   : > { %5068 = vst.msk [vmem:[%s6036_s19 + $0x50] sm:$0xff] %vm1387_vm3, %v5052_v61  ;;  %v4954_v55 = vadd.f32 %v4930_v19, %v4800_v4 }
 0x60a   : > { %v4986_v8 = vadd.f32 %v4970_v15, %v4954_v55 }
 0x60b   : > { %v5017_v28 = vld [vmem:[#allocation4 + $0x58] sm:$0xff] }
 0x60c   : > { %v5037_v60 = vadd.f32 %v8224_v57, %v5017_v28  ;;  %5002 = vst.msk [vmem:[#allocation4 + $0x60] sm:$0xff] %vm1387_vm3, %v4986_v8  ;;  %v4689_v40 = vpop.f32.mrf.mxu2 }
 0x60d   : > { %v4802_v12 = vpop.f32.mrf.mxu3 }
 0x60e   : > { %v5053_v45 = vmax.f32 %v5037_v60, 0.0  ;;  %v4803_v35 = vadd.f32 %v4802_v12, %v4689_v40 }
 0x610   : > { %5069 = vst.msk [vmem:[%s6036_s19 + $0x58] sm:$0xff] %vm1387_vm3, %v5053_v45  ;;  %v4955_v38 = vadd.f32 %v4933_v37, %v4803_v35 }
 0x612   : > { %v4987_v5 = vadd.f32 %v4971_v31, %v4955_v38 }
 0x613   : > { %v5018_v21 = vld [vmem:[#allocation4 + $0x60] sm:$0xff] }
 0x614   : > { %v5038_v36 = vadd.f32 %v8224_v57, %v5018_v21  ;;  %5003 = vst.msk [vmem:[#allocation4 + $0x68] sm:$0xff] %vm1387_vm3, %v4987_v5  ;;  %v4692_v33 = vpop.f32.mrf.mxu2 }
 0x615   : > { %v4805_v32 = vpop.f32.mrf.mxu3 }
 0x616   : > { %v5054_v58 = vmax.f32 %v5038_v36, 0.0  ;;  %v4806_v29 = vadd.f32 %v4805_v32, %v4692_v33 }
 0x618   : > { %5070 = vst.msk [vmem:[%s6036_s19 + $0x60] sm:$0xff] %vm1387_vm3, %v5054_v58  ;;  %v4956_v24 = vadd.f32 %v4936_v62, %v4806_v29 }
 0x61a   : > { %v4988_v7 = vadd.f32 %v4972_v23, %v4956_v24 }
 0x61b   : > { %v5019_v43 = vld [vmem:[#allocation4 + $0x68] sm:$0xff] }
 0x61c   : > { %v5039_v25 = vadd.f32 %v8224_v57, %v5019_v43  ;;  %5004 = vst.msk [vmem:[#allocation4 + $0x70] sm:$0xff] %vm1387_vm3, %v4988_v7  ;;  %v4695_v9 = vpop.f32.mrf.mxu2 }
 0x61d   : > { %v4808_v17 = vpop.f32.mrf.mxu3 }
 0x61e   : > { %v5055_v46 = vmax.f32 %v5039_v25, 0.0  ;;  %v4809_v27 = vadd.f32 %v4808_v17, %v4695_v9 }
 0x620   : > { %5071 = vst.msk [vmem:[%s6036_s19 + $0x68] sm:$0xff] %vm1387_vm3, %v5055_v46  ;;  %v4957_v3 = vadd.f32 %v4939_v20, %v4809_v27 }
 0x622   : > { %v4989_v18 = vadd.f32 %v4973_v63, %v4957_v3 }
 0x623   : > { %v5020_v13 = vld [vmem:[#allocation4 + $0x70] sm:$0xff] }
 0x624   : > { %v5040_v6 = vadd.f32 %v8224_v57, %v5020_v13  ;;  %5005 = vst.msk [vmem:[#allocation4 + $0x78] sm:$0xff] %vm1387_vm3, %v4989_v18 }
 0x626   : > { %v5056_v51 = vmax.f32 %v5040_v6, 0.0 }
 0x628   : > { %5072 = vst.msk [vmem:[%s6036_s19 + $0x70] sm:$0xff] %vm1387_vm3, %v5056_v51 }
 0x62b   : > { %v5021_v16 = vld [vmem:[#allocation4 + $0x78] sm:$0xff] }
 0x62c   : > { %v5041_v2 = vadd.f32 %v8224_v57, %v5021_v16 }
 0x62e   : > { %v5057_v30 = vmax.f32 %v5041_v2, 0.0 }
 0x630   : > { %5073 = vst.msk [vmem:[%s6036_s19 + $0x78] sm:$0xff] %vm1387_vm3, %v5057_v30 }
 0x631 PF: > { %s16_s25 = sadd.s32 1, %s5943_s25   ;;  %s8491_s21 = smov %s5935_s23 }
 0x632   : > { %p13_p10 = scmp.ge.s32.totalorder %s16_s25, 6   ;;  %s8492_s22 = smov %s5939_s24 }
 0x633   : > { %s8493_s23 = smov %s8496_s26  ;;  %s8494_s24 = smov %s8500_s27 }
 0x634   :  { %15 = sbr.rel (!%p13_p10) target bundleno = 3 (0x3), region = 108 }

</bundles_post_ra>
